<compile_context>
chip_gen: v7x
topology: tpu7x:2x2x1
jax: 0.10.0
libtpu: 0.0.40
codegen_flags: <defaults>
</compile_context>

<pallas_src>
import jax
import jax.numpy as jnp
from jax.experimental import pallas as pl
from jax.experimental.pallas import tpu as pltpu

LANES = 128            # all kernel output slabs are padded to this lane width
_NEG_BIG = -1e30       # bias pad for softmax logits -> exp() underflows to 0
_MAX_BLOCK_ROWS = 512  # per-block row budget (~0.5-1 MB per double-buffered DMA)
_ROW_ALIGN = 16        # bf16 sublane packing


# ---------------------------------------------------------------------------
# Small helpers
# ---------------------------------------------------------------------------
def _round_up(x, m):
    return (x + m - 1) // m * m


def _pick_block(m, max_rows=_MAX_BLOCK_ROWS, align=_ROW_ALIGN):
    """Choose (block_rows, padded_rows, grid) with minimal padding and
    sublane-aligned block rows."""
    m_aligned = _round_up(max(m, align), align)
    g = pl.cdiv(m_aligned, max_rows)
    tm = _round_up(pl.cdiv(m_aligned, g), align)
    return tm, tm * g, g


def _pad_axis(a, axis, size):
    if a.shape[axis] >= size:
        return a
    widths = [(0, 0)] * a.ndim
    widths[axis] = (0, size - a.shape[axis])
    return jnp.pad(a, widths)


def _sigmoid(z):
    # EUP-friendly sigmoid: exp + approximate reciprocal.  Clamp keeps
    # exp(-z) finite for very negative pre-activations.
    z = jnp.maximum(z, -30.0)
    return pl.reciprocal(1.0 + jnp.exp(-z), approx=True)


# ---------------------------------------------------------------------------
# Kernels
# ---------------------------------------------------------------------------
def _conv_sigmoid_pool_kernel(p_ref, w_ref, b_ref, o_ref):
    """Fused conv-as-matmul + bias + sigmoid + 2x2 average pool (one block).

    p_ref: (4, TM, Kp) bf16  im2col patches grouped by pool-window offset
    w_ref: (Kp, 128)   bf16  conv weight, K rows and output lanes zero-padded
    b_ref: (1, 128)    f32   bias, zero-padded
    o_ref: (TM, 128)   bf16  pooled activations for TM pooled positions
    """
    t, tm, kp = p_ref.shape
    p = p_ref[...].reshape(t * tm, kp)            # leading-dim merge: one long LHS
    z = jnp.dot(p, w_ref[...], preferred_element_type=jnp.float32) + b_ref[...]
    s = _sigmoid(z)                               # (4*TM, 128) f32
    pooled = (s[0 * tm:1 * tm] + s[1 * tm:2 * tm]
              + s[2 * tm:3 * tm] + s[3 * tm:4 * tm])   # 2x2 avg-pool (VPU adds)
    o_ref[...] = (0.25 * pooled).astype(o_ref.dtype)


def _tail_kernel(x_ref, w5_ref, b5_ref, w6_ref, b6_ref, w7_ref, b7_ref, o_ref):
    """Fused fc5 (conv 16->120 over the 5x5 map, NO activation, per reference)
    -> fc6 + sigmoid -> fc7 + softmax.

    x_ref: (TN, 512) bf16; weights (Kp, 128) bf16 zero-padded; biases (1, 128)
    f32 (b7's pad lanes are -1e30 so padded logits vanish in the softmax).
    o_ref: (TN, 128) f32; the wrapper keeps columns [:10].
    """
    h = jnp.dot(x_ref[...], w5_ref[...],
                preferred_element_type=jnp.float32) + b5_ref[...]       # fc5
    h = jnp.dot(h.astype(jnp.bfloat16), w6_ref[...],
                preferred_element_type=jnp.float32) + b6_ref[...]       # fc6
    h = _sigmoid(h)
    z = jnp.dot(h.astype(jnp.bfloat16), w7_ref[...],
                preferred_element_type=jnp.float32) + b7_ref[...]       # fc7 logits
    m = jnp.max(z, axis=-1, keepdims=True)
    e = jnp.exp(z - m)
    # exact divide so each output row sums to 1 within f32 rounding
    o_ref[...] = e / jnp.sum(e, axis=-1, keepdims=True)


# ---------------------------------------------------------------------------
# pallas_call wrappers (gridded over rows, "parallel" semantics)
# ---------------------------------------------------------------------------
def conv_sigmoid_pool(p, w, b):
    _, m, kp = p.shape
    cp = w.shape[1]
    tm, mp, g = _pick_block(m)
    if mp != m:
        p = jnp.pad(p, ((0, 0), (0, mp - m), (0, 0)))
    out = pl.pallas_call(
        _conv_sigmoid_pool_kernel,
        out_shape=jax.ShapeDtypeStruct((mp, cp), jnp.bfloat16),
        grid=(g,),
        in_specs=[
            pl.BlockSpec((4, tm, kp), lambda i: (0, i, 0)),
            pl.BlockSpec((kp, cp), lambda i: (0, 0)),
            pl.BlockSpec((1, cp), lambda i: (0, 0)),
        ],
        out_specs=pl.BlockSpec((tm, cp), lambda i: (i, 0)),
        compiler_params=pltpu.CompilerParams(
            dimension_semantics=("parallel",)),
    )(p, w, b)
    return out[:m]


def mlp_tail(x, w5, b5, w6, b6, w7, b7):
    n, kp = x.shape
    cp = w7.shape[1]
    tn, npad, g = _pick_block(n)
    if npad != n:
        x = jnp.pad(x, ((0, npad - n), (0, 0)))
    weights = (w5, b5, w6, b6, w7, b7)
    out = pl.pallas_call(
        _tail_kernel,
        out_shape=jax.ShapeDtypeStruct((npad, cp), jnp.float32),
        grid=(g,),
        in_specs=[pl.BlockSpec((tn, kp), lambda i: (i, 0))]
                + [pl.BlockSpec(a.shape, lambda i: (0, 0)) for a in weights],
        out_specs=pl.BlockSpec((tn, cp), lambda i: (i, 0)),
        compiler_params=pltpu.CompilerParams(
            dimension_semantics=("parallel",)),
    )(x, *weights)
    return out[:n]


# ---------------------------------------------------------------------------
# Plain-JAX glue: im2col with rows grouped by 2x2 pool-window offset.
# (Kept wrapper-side per the review's fallback; K is padded to a multiple of
#  128 so the HBM->VMEM copy of the largest operand is full-lane DMA.)
# ---------------------------------------------------------------------------
def pool_grouped_patches(x, kh, kw, *, k_pad=None):
    """x: (N, H, W, C) NHWC -> (4, N*(Ho//2)*(Wo//2), k_pad) conv patches.

    Row (t, m) with t = di*2 + dj and m = (n*(Ho//2) + i)*(Wo//2) + j holds the
    patch for conv-output pixel (2i+di, 2j+dj); feature order is (ki, kj, ci).
    """
    n, h, w, c = x.shape
    ho, wo = h - kh + 1, w - kw + 1
    taps = [x[:, ki:ki + ho, kj:kj + wo, :]
            for ki in range(kh) for kj in range(kw)]
    p = jnp.concatenate(taps, axis=-1)                   # (N, Ho, Wo, kh*kw*C)
    k = kh * kw * c
    p = p.reshape(n, ho // 2, 2, wo // 2, 2, k)
    p = p.transpose(2, 4, 0, 1, 3, 5)                    # (di, dj, N, i, j, K)
    p = p.reshape(4, n * (ho // 2) * (wo // 2), k)
    if k_pad is not None and k_pad > k:
        p = jnp.pad(p, ((0, 0), (0, 0), (0, k_pad - k)))
    return p


def _prepare_params(params):
    """Pad weights/biases to 128 output lanes and 128-multiple K rows; bf16."""
    def wpad(w, k_rows):
        w = _pad_axis(w, 0, k_rows)           # zero K rows matching padded inputs
        return _pad_axis(w, 1, LANES).astype(jnp.bfloat16)

    def bpad(b, fill=0.0):
        pad = LANES - b.shape[0]
        return jnp.concatenate(
            [b.astype(jnp.float32),
             jnp.full((pad,), fill, jnp.float32)]).reshape(1, LANES)

    return dict(
        w1=wpad(params["w1"], 128), b1=bpad(params["b1"]),
        w2=wpad(params["w2"], 256), b2=bpad(params["b2"]),
        w5=wpad(params["w3"], 512), b5=bpad(params["b3"]),
        w6=wpad(params["w6"], 128), b6=bpad(params["b6"]),
        # fc7: pad bias lanes with -1e30 so padded softmax logits contribute 0
        w7=wpad(params["w7"], 128), b7=bpad(params["b7"], fill=_NEG_BIG),
    )


# ---------------------------------------------------------------------------
# LeNet forward (matches the PyTorch module's forward() semantics).
# ---------------------------------------------------------------------------
def lenet_forward(x, params):
    """x: (N, 1, 28, 28) float32, NCHW (PyTorch convention) -> (N, 10) softmax."""
    n = x.shape[0]
    pp = _prepare_params(params)

    # NCHW -> NHWC once; spatial padding=2 for conv1.
    xh = jnp.transpose(x, (0, 2, 3, 1))
    xh = jnp.pad(xh, ((0, 0), (2, 2), (2, 2), (0, 0))).astype(jnp.bfloat16)

    # conv1 + sigmoid + avgpool:  (N,32,32,1) -> (N,14,14,6)
    p = pool_grouped_patches(xh, 5, 5, k_pad=128)         # (4, N*196, 128)
    y = conv_sigmoid_pool(p, pp["w1"], pp["b1"])          # (N*196, 128) bf16
    a1 = y.reshape(n, 14, 14, LANES)[..., :6]             # NHWC

    # conv3 + sigmoid + avgpool:  (N,14,14,6) -> (N,5,5,16)
    p = pool_grouped_patches(a1, 5, 5, k_pad=256)         # (4, N*25, 256)
    y = conv_sigmoid_pool(p, pp["w2"], pp["b2"])          # (N*25, 128) bf16
    a2 = y[:, :16].reshape(n, 5 * 5 * 16)                 # flatten in (i, j, c) order
    a2 = _pad_axis(a2, 1, 512)                            # lane-dense K for the tail

    # conv5 (16->120 over the whole 5x5 map, no act) -> fc6+sigmoid -> fc7+softmax
    out = mlp_tail(a2, pp["w5"], pp["b5"], pp["w6"], pp["b6"],
                   pp["w7"], pp["b7"])                    # (N, 128) f32
    return out[:, :10]


def init_params(key):
    """Deterministic synthetic parameters.

    Weights are stored ready for right-multiplication of NHWC im2col patches:
      conv weight (Cout, Cin, kh, kw)  ->  (kh*kw*Cin, Cout)
        (a PyTorch tensor maps via w.permute(2, 3, 1, 0).reshape(-1, Cout))
      linear weight (out, in)          ->  (in, out)  (w.T)
    (Real PyTorch fc weights must be permuted accordingly before use.)
    """
    ks = jax.random.split(key, 10)
    s = 0.1
    return {
        "w1": s * jax.random.normal(ks[0], (5 * 5 * 1, 6), jnp.float32),
        "b1": s * jax.random.normal(ks[1], (6,), jnp.float32),
        "w2": s * jax.random.normal(ks[2], (5 * 5 * 6, 16), jnp.float32),
        "b2": s * jax.random.normal(ks[3], (16,), jnp.float32),
        "w3": s * jax.random.normal(ks[4], (5 * 5 * 16, 120), jnp.float32),
        "b3": s * jax.random.normal(ks[5], (120,), jnp.float32),
        "w6": s * jax.random.normal(ks[6], (120, 84), jnp.float32),
        "b6": s * jax.random.normal(ks[7], (84,), jnp.float32),
        "w7": s * jax.random.normal(ks[8], (84, 10), jnp.float32),
        "b7": s * jax.random.normal(ks[9], (10,), jnp.float32),
    }


if __name__ == "__main__":
    key = jax.random.PRNGKey(0)
    k_x, k_p = jax.random.split(key)
    # LeNet's forward requires 28x28 inputs (conv5 reduces 5x5 -> 1x1).
    x = jax.random.normal(k_x, (2, 1, 28, 28), jnp.float32)
    params = init_params(k_p)

    out = jax.jit(lenet_forward)(x, params)
    out = jax.block_until_ready(out)

    assert out.shape == (2, 10)
    # softmax rows must sum to 1 (exact divide in-kernel keeps this tight)
    assert bool(jnp.allclose(jnp.sum(out, axis=1), 1.0, atol=1e-4))
    print("KERNEL_OK")
</pallas_src>

<mosaic_0001>
module attributes {stable_mosaic.version = 11 : i64} {
  func.func @_conv_sigmoid_pool_kernel(%arg0: i32, %arg1: memref<4x400x128xbf16, #tpu.memory_space<vmem>>, %arg2: memref<128x128xbf16, #tpu.memory_space<vmem>>, %arg3: memref<1x128xf32, #tpu.memory_space<vmem>>, %arg4: memref<400x128xbf16, #tpu.memory_space<vmem>>) attributes {dimension_semantics = [#tpu.dimension_semantics<parallel>], iteration_bounds = array<i64: 1>, scalar_prefetch = 0 : i64, scratch_operands = 0 : i64, tpu.core_type = #tpu.core_type<tc>, window_params = [{transform_indices = @transform_0, window_bounds = array<i64: 4, 400, 128>}, {pipeline_mode = #tpu.pipeline_mode<synchronous>, transform_indices = @transform_1, window_bounds = array<i64: 128, 128>}, {pipeline_mode = #tpu.pipeline_mode<synchronous>, transform_indices = @transform_2, window_bounds = array<i64: 1, 128>}, {transform_indices = @transform_3, window_bounds = array<i64: 400, 128>}]} {
    %c0 = arith.constant 0 : index
    %c0_0 = arith.constant 0 : index
    %c0_1 = arith.constant 0 : index
    %0 = vector.load %arg1[%c0, %c0_0, %c0_1] : memref<4x400x128xbf16, #tpu.memory_space<vmem>>, vector<4x400x128xbf16>
    %1 = vector.shape_cast %0 : vector<4x400x128xbf16> to vector<1600x128xbf16>
    %c0_2 = arith.constant 0 : index
    %c0_3 = arith.constant 0 : index
    %2 = vector.load %arg2[%c0_2, %c0_3] : memref<128x128xbf16, #tpu.memory_space<vmem>>, vector<128x128xbf16>
    %cst = arith.constant dense<0.000000e+00> : vector<1600x128xf32>
    %3 = tpu.matmul %1, %2, %cst {dimension_numbers = #tpu.dot_dimension_numbers<[1], [0], [0], [1], [0, 0, 1, 1], [], []>} : vector<1600x128xbf16>, vector<128x128xbf16>, vector<1600x128xf32> -> vector<1600x128xf32>
    %c0_4 = arith.constant 0 : index
    %c0_5 = arith.constant 0 : index
    %4 = vector.load %arg3[%c0_4, %c0_5] : memref<1x128xf32, #tpu.memory_space<vmem>>, vector<1x128xf32>
    %5 = vector.broadcast %4 : vector<1x128xf32> to vector<1600x128xf32>
    %6 = arith.addf %3, %5 : vector<1600x128xf32>
    %cst_6 = arith.constant -3.000000e+01 : f32
    %7 = vector.broadcast %cst_6 : f32 to vector<1600x128xf32>
    %8 = arith.maximumf %6, %7 : vector<1600x128xf32>
    %cst_7 = arith.constant 0.000000e+00 : f32
    %9 = vector.broadcast %cst_7 : f32 to vector<1600x128xf32>
    %10 = arith.subf %9, %8 : vector<1600x128xf32>
    %11 = math.exp %10 : vector<1600x128xf32>
    %cst_8 = arith.constant 1.000000e+00 : f32
    %12 = vector.broadcast %cst_8 : f32 to vector<1600x128xf32>
    %13 = arith.addf %12, %11 : vector<1600x128xf32>
    %14 = tpu.reciprocal %13 {approx = true} : vector<1600x128xf32> -> vector<1600x128xf32>
    %15 = vector.extract_strided_slice %14 {offsets = [0, 0], sizes = [400, 128], strides = [1, 1]} : vector<1600x128xf32> to vector<400x128xf32>
    %16 = vector.extract_strided_slice %14 {offsets = [400, 0], sizes = [400, 128], strides = [1, 1]} : vector<1600x128xf32> to vector<400x128xf32>
    %17 = arith.addf %15, %16 : vector<400x128xf32>
    %18 = vector.extract_strided_slice %14 {offsets = [800, 0], sizes = [400, 128], strides = [1, 1]} : vector<1600x128xf32> to vector<400x128xf32>
    %19 = arith.addf %17, %18 : vector<400x128xf32>
    %20 = vector.extract_strided_slice %14 {offsets = [1200, 0], sizes = [400, 128], strides = [1, 1]} : vector<1600x128xf32> to vector<400x128xf32>
    %21 = arith.addf %19, %20 : vector<400x128xf32>
    %cst_9 = arith.constant 2.500000e-01 : f32
    %22 = vector.broadcast %cst_9 : f32 to vector<400x128xf32>
    %23 = arith.mulf %22, %21 : vector<400x128xf32>
    %24 = arith.truncf %23 : vector<400x128xf32> to vector<400x128xbf16>
    %c0_10 = arith.constant 0 : index
    %c0_11 = arith.constant 0 : index
    %25 = vector.load %arg4[%c0_10, %c0_11] : memref<400x128xbf16, #tpu.memory_space<vmem>>, vector<400x128xbf16>
    tpu.vector_store %arg4[%c0_10, %c0_11], %24 {strides = array<i32>} : memref<400x128xbf16, #tpu.memory_space<vmem>>, vector<400x128xbf16>,
    return
  }
  func.func @transform_0(%arg0: i32) -> (i32, i32, i32) {
    %c0_i32 = arith.constant 0 : i32
    %c0_i32_0 = arith.constant 0 : i32
    %c0_i32_1 = arith.constant 0 : i32
    return %c0_i32, %arg0, %c0_i32_0 : i32, i32, i32
  }
  func.func @transform_1(%arg0: i32) -> (i32, i32) {
    %c0_i32 = arith.constant 0 : i32
    %c0_i32_0 = arith.constant 0 : i32
    %c0_i32_1 = arith.constant 0 : i32
    return %c0_i32, %c0_i32_0 : i32, i32
  }
  func.func @transform_2(%arg0: i32) -> (i32, i32) {
    %c0_i32 = arith.constant 0 : i32
    %c0_i32_0 = arith.constant 0 : i32
    %c0_i32_1 = arith.constant 0 : i32
    return %c0_i32, %c0_i32_0 : i32, i32
  }
  func.func @transform_3(%arg0: i32) -> (i32, i32) {
    %c0_i32 = arith.constant 0 : i32
    %c0_i32_0 = arith.constant 0 : i32
    return %arg0, %c0_i32 : i32, i32
  }
}

module attributes {stable_mosaic.version = 11 : i64} {
  func.func @_conv_sigmoid_pool_kernel(%arg0: i32, %arg1: memref<4x64x256xbf16, #tpu.memory_space<vmem>>, %arg2: memref<256x128xbf16, #tpu.memory_space<vmem>>, %arg3: memref<1x128xf32, #tpu.memory_space<vmem>>, %arg4: memref<64x128xbf16, #tpu.memory_space<vmem>>) attributes {dimension_semantics = [#tpu.dimension_semantics<parallel>], iteration_bounds = array<i64: 1>, scalar_prefetch = 0 : i64, scratch_operands = 0 : i64, tpu.core_type = #tpu.core_type<tc>, window_params = [{transform_indices = @transform_0, window_bounds = array<i64: 4, 64, 256>}, {pipeline_mode = #tpu.pipeline_mode<synchronous>, transform_indices = @transform_1, window_bounds = array<i64: 256, 128>}, {pipeline_mode = #tpu.pipeline_mode<synchronous>, transform_indices = @transform_2, window_bounds = array<i64: 1, 128>}, {transform_indices = @transform_3, window_bounds = array<i64: 64, 128>}]} {
    %c0 = arith.constant 0 : index
    %c0_0 = arith.constant 0 : index
    %c0_1 = arith.constant 0 : index
    %0 = vector.load %arg1[%c0, %c0_0, %c0_1] : memref<4x64x256xbf16, #tpu.memory_space<vmem>>, vector<4x64x256xbf16>
    %1 = vector.shape_cast %0 : vector<4x64x256xbf16> to vector<256x256xbf16>
    %c0_2 = arith.constant 0 : index
    %c0_3 = arith.constant 0 : index
    %2 = vector.load %arg2[%c0_2, %c0_3] : memref<256x128xbf16, #tpu.memory_space<vmem>>, vector<256x128xbf16>
    %cst = arith.constant dense<0.000000e+00> : vector<256x128xf32>
    %3 = tpu.matmul %1, %2, %cst {dimension_numbers = #tpu.dot_dimension_numbers<[1], [0], [0], [1], [0, 0, 1, 1], [], []>} : vector<256x256xbf16>, vector<256x128xbf16>, vector<256x128xf32> -> vector<256x128xf32>
    %c0_4 = arith.constant 0 : index
    %c0_5 = arith.constant 0 : index
    %4 = vector.load %arg3[%c0_4, %c0_5] : memref<1x128xf32, #tpu.memory_space<vmem>>, vector<1x128xf32>
    %5 = vector.broadcast %4 : vector<1x128xf32> to vector<256x128xf32>
    %6 = arith.addf %3, %5 : vector<256x128xf32>
    %cst_6 = arith.constant -3.000000e+01 : f32
    %7 = vector.broadcast %cst_6 : f32 to vector<256x128xf32>
    %8 = arith.maximumf %6, %7 : vector<256x128xf32>
    %cst_7 = arith.constant 0.000000e+00 : f32
    %9 = vector.broadcast %cst_7 : f32 to vector<256x128xf32>
    %10 = arith.subf %9, %8 : vector<256x128xf32>
    %11 = math.exp %10 : vector<256x128xf32>
    %cst_8 = arith.constant 1.000000e+00 : f32
    %12 = vector.broadcast %cst_8 : f32 to vector<256x128xf32>
    %13 = arith.addf %12, %11 : vector<256x128xf32>
    %14 = tpu.reciprocal %13 {approx = true} : vector<256x128xf32> -> vector<256x128xf32>
    %15 = vector.extract_strided_slice %14 {offsets = [0, 0], sizes = [64, 128], strides = [1, 1]} : vector<256x128xf32> to vector<64x128xf32>
    %16 = vector.extract_strided_slice %14 {offsets = [64, 0], sizes = [64, 128], strides = [1, 1]} : vector<256x128xf32> to vector<64x128xf32>
    %17 = arith.addf %15, %16 : vector<64x128xf32>
    %18 = vector.extract_strided_slice %14 {offsets = [128, 0], sizes = [64, 128], strides = [1, 1]} : vector<256x128xf32> to vector<64x128xf32>
    %19 = arith.addf %17, %18 : vector<64x128xf32>
    %20 = vector.extract_strided_slice %14 {offsets = [192, 0], sizes = [64, 128], strides = [1, 1]} : vector<256x128xf32> to vector<64x128xf32>
    %21 = arith.addf %19, %20 : vector<64x128xf32>
    %cst_9 = arith.constant 2.500000e-01 : f32
    %22 = vector.broadcast %cst_9 : f32 to vector<64x128xf32>
    %23 = arith.mulf %22, %21 : vector<64x128xf32>
    %24 = arith.truncf %23 : vector<64x128xf32> to vector<64x128xbf16>
    %c0_10 = arith.constant 0 : index
    %c0_11 = arith.constant 0 : index
    %25 = vector.load %arg4[%c0_10, %c0_11] : memref<64x128xbf16, #tpu.memory_space<vmem>>, vector<64x128xbf16>
    tpu.vector_store %arg4[%c0_10, %c0_11], %24 {strides = array<i32>} : memref<64x128xbf16, #tpu.memory_space<vmem>>, vector<64x128xbf16>,
    return
  }
  func.func @transform_0(%arg0: i32) -> (i32, i32, i32) {
    %c0_i32 = arith.constant 0 : i32
    %c0_i32_0 = arith.constant 0 : i32
    %c0_i32_1 = arith.constant 0 : i32
    return %c0_i32, %arg0, %c0_i32_0 : i32, i32, i32
  }
  func.func @transform_1(%arg0: i32) -> (i32, i32) {
    %c0_i32 = arith.constant 0 : i32
    %c0_i32_0 = arith.constant 0 : i32
    %c0_i32_1 = arith.constant 0 : i32
    return %c0_i32, %c0_i32_0 : i32, i32
  }
  func.func @transform_2(%arg0: i32) -> (i32, i32) {
    %c0_i32 = arith.constant 0 : i32
    %c0_i32_0 = arith.constant 0 : i32
    %c0_i32_1 = arith.constant 0 : i32
    return %c0_i32, %c0_i32_0 : i32, i32
  }
  func.func @transform_3(%arg0: i32) -> (i32, i32) {
    %c0_i32 = arith.constant 0 : i32
    %c0_i32_0 = arith.constant 0 : i32
    return %arg0, %c0_i32 : i32, i32
  }
}

module attributes {stable_mosaic.version = 11 : i64} {
  func.func @_tail_kernel(%arg0: i32, %arg1: memref<16x512xbf16, #tpu.memory_space<vmem>>, %arg2: memref<512x128xbf16, #tpu.memory_space<vmem>>, %arg3: memref<1x128xf32, #tpu.memory_space<vmem>>, %arg4: memref<128x128xbf16, #tpu.memory_space<vmem>>, %arg5: memref<1x128xf32, #tpu.memory_space<vmem>>, %arg6: memref<128x128xbf16, #tpu.memory_space<vmem>>, %arg7: memref<1x128xf32, #tpu.memory_space<vmem>>, %arg8: memref<16x128xf32, #tpu.memory_space<vmem>>) attributes {dimension_semantics = [#tpu.dimension_semantics<parallel>], iteration_bounds = array<i64: 1>, scalar_prefetch = 0 : i64, scratch_operands = 0 : i64, tpu.core_type = #tpu.core_type<tc>, window_params = [{transform_indices = @transform_0, window_bounds = array<i64: 16, 512>}, {pipeline_mode = #tpu.pipeline_mode<synchronous>, transform_indices = @transform_1, window_bounds = array<i64: 512, 128>}, {pipeline_mode = #tpu.pipeline_mode<synchronous>, transform_indices = @transform_2, window_bounds = array<i64: 1, 128>}, {pipeline_mode = #tpu.pipeline_mode<synchronous>, transform_indices = @transform_3, window_bounds = array<i64: 128, 128>}, {pipeline_mode = #tpu.pipeline_mode<synchronous>, transform_indices = @transform_4, window_bounds = array<i64: 1, 128>}, {pipeline_mode = #tpu.pipeline_mode<synchronous>, transform_indices = @transform_5, window_bounds = array<i64: 128, 128>}, {pipeline_mode = #tpu.pipeline_mode<synchronous>, transform_indices = @transform_6, window_bounds = array<i64: 1, 128>}, {transform_indices = @transform_7, window_bounds = array<i64: 16, 128>}]} {
    %c0 = arith.constant 0 : index
    %c0_0 = arith.constant 0 : index
    %0 = vector.load %arg1[%c0, %c0_0] : memref<16x512xbf16, #tpu.memory_space<vmem>>, vector<16x512xbf16>
    %c0_1 = arith.constant 0 : index
    %c0_2 = arith.constant 0 : index
    %1 = vector.load %arg2[%c0_1, %c0_2] : memref<512x128xbf16, #tpu.memory_space<vmem>>, vector<512x128xbf16>
    %cst = arith.constant dense<0.000000e+00> : vector<16x128xf32>
    %2 = tpu.matmul %0, %1, %cst {dimension_numbers = #tpu.dot_dimension_numbers<[1], [0], [0], [1], [0, 0, 1, 1], [], []>} : vector<16x512xbf16>, vector<512x128xbf16>, vector<16x128xf32> -> vector<16x128xf32>
    %c0_3 = arith.constant 0 : index
    %c0_4 = arith.constant 0 : index
    %3 = vector.load %arg3[%c0_3, %c0_4] : memref<1x128xf32, #tpu.memory_space<vmem>>, vector<1x128xf32>
    %4 = vector.broadcast %3 : vector<1x128xf32> to vector<16x128xf32>
    %5 = arith.addf %2, %4 : vector<16x128xf32>
    %6 = arith.truncf %5 : vector<16x128xf32> to vector<16x128xbf16>
    %c0_5 = arith.constant 0 : index
    %c0_6 = arith.constant 0 : index
    %7 = vector.load %arg4[%c0_5, %c0_6] : memref<128x128xbf16, #tpu.memory_space<vmem>>, vector<128x128xbf16>
    %cst_7 = arith.constant dense<0.000000e+00> : vector<16x128xf32>
    %8 = tpu.matmul %6, %7, %cst_7 {dimension_numbers = #tpu.dot_dimension_numbers<[1], [0], [0], [1], [0, 0, 1, 1], [], []>} : vector<16x128xbf16>, vector<128x128xbf16>, vector<16x128xf32> -> vector<16x128xf32>
    %c0_8 = arith.constant 0 : index
    %c0_9 = arith.constant 0 : index
    %9 = vector.load %arg5[%c0_8, %c0_9] : memref<1x128xf32, #tpu.memory_space<vmem>>, vector<1x128xf32>
    %10 = vector.broadcast %9 : vector<1x128xf32> to vector<16x128xf32>
    %11 = arith.addf %8, %10 : vector<16x128xf32>
    %cst_10 = arith.constant -3.000000e+01 : f32
    %12 = vector.broadcast %cst_10 : f32 to vector<16x128xf32>
    %13 = arith.maximumf %11, %12 : vector<16x128xf32>
    %cst_11 = arith.constant 0.000000e+00 : f32
    %14 = vector.broadcast %cst_11 : f32 to vector<16x128xf32>
    %15 = arith.subf %14, %13 : vector<16x128xf32>
    %16 = math.exp %15 : vector<16x128xf32>
    %cst_12 = arith.constant 1.000000e+00 : f32
    %17 = vector.broadcast %cst_12 : f32 to vector<16x128xf32>
    %18 = arith.addf %17, %16 : vector<16x128xf32>
    %19 = tpu.reciprocal %18 {approx = true} : vector<16x128xf32> -> vector<16x128xf32>
    %20 = arith.truncf %19 : vector<16x128xf32> to vector<16x128xbf16>
    %c0_13 = arith.constant 0 : index
    %c0_14 = arith.constant 0 : index
    %21 = vector.load %arg6[%c0_13, %c0_14] : memref<128x128xbf16, #tpu.memory_space<vmem>>, vector<128x128xbf16>
    %cst_15 = arith.constant dense<0.000000e+00> : vector<16x128xf32>
    %22 = tpu.matmul %20, %21, %cst_15 {dimension_numbers = #tpu.dot_dimension_numbers<[1], [0], [0], [1], [0, 0, 1, 1], [], []>} : vector<16x128xbf16>, vector<128x128xbf16>, vector<16x128xf32> -> vector<16x128xf32>
    %c0_16 = arith.constant 0 : index
    %c0_17 = arith.constant 0 : index
    %23 = vector.load %arg7[%c0_16, %c0_17] : memref<1x128xf32, #tpu.memory_space<vmem>>, vector<1x128xf32>
    %24 = vector.broadcast %23 : vector<1x128xf32> to vector<16x128xf32>
    %25 = arith.addf %22, %24 : vector<16x128xf32>
    %cst_18 = arith.constant dense<0xFF800000> : vector<16xf32>
    %26 = vector.multi_reduction <maximumf>, %25, %cst_18 [1] : vector<16x128xf32> to vector<16xf32>
    %27 = vector.shape_cast %26 : vector<16xf32> to vector<16x1xf32>
    %28 = vector.broadcast %27 : vector<16x1xf32> to vector<16x128xf32>
    %29 = arith.subf %25, %28 : vector<16x128xf32>
    %30 = math.exp %29 : vector<16x128xf32>
    %cst_19 = arith.constant dense<0.000000e+00> : vector<16xf32>
    %31 = vector.multi_reduction <add>, %30, %cst_19 [1] : vector<16x128xf32> to vector<16xf32>
    %32 = vector.shape_cast %31 : vector<16xf32> to vector<16x1xf32>
    %33 = vector.broadcast %32 : vector<16x1xf32> to vector<16x128xf32>
    %34 = arith.divf %30, %33 : vector<16x128xf32>
    %c0_20 = arith.constant 0 : index
    %c0_21 = arith.constant 0 : index
    %35 = vector.load %arg8[%c0_20, %c0_21] : memref<16x128xf32, #tpu.memory_space<vmem>>, vector<16x128xf32>
    tpu.vector_store %arg8[%c0_20, %c0_21], %34 {strides = array<i32>} : memref<16x128xf32, #tpu.memory_space<vmem>>, vector<16x128xf32>,
    return
  }
  func.func @transform_0(%arg0: i32) -> (i32, i32) {
    %c0_i32 = arith.constant 0 : i32
    %c0_i32_0 = arith.constant 0 : i32
    return %arg0, %c0_i32 : i32, i32
  }
  func.func @transform_1(%arg0: i32) -> (i32, i32) {
    %c0_i32 = arith.constant 0 : i32
    %c0_i32_0 = arith.constant 0 : i32
    %c0_i32_1 = arith.constant 0 : i32
    return %c0_i32, %c0_i32_0 : i32, i32
  }
  func.func @transform_2(%arg0: i32) -> (i32, i32) {
    %c0_i32 = arith.constant 0 : i32
    %c0_i32_0 = arith.constant 0 : i32
    %c0_i32_1 = arith.constant 0 : i32
    return %c0_i32, %c0_i32_0 : i32, i32
  }
  func.func @transform_3(%arg0: i32) -> (i32, i32) {
    %c0_i32 = arith.constant 0 : i32
    %c0_i32_0 = arith.constant 0 : i32
    %c0_i32_1 = arith.constant 0 : i32
    return %c0_i32, %c0_i32_0 : i32, i32
  }
  func.func @transform_4(%arg0: i32) -> (i32, i32) {
    %c0_i32 = arith.constant 0 : i32
    %c0_i32_0 = arith.constant 0 : i32
    %c0_i32_1 = arith.constant 0 : i32
    return %c0_i32, %c0_i32_0 : i32, i32
  }
  func.func @transform_5(%arg0: i32) -> (i32, i32) {
    %c0_i32 = arith.constant 0 : i32
    %c0_i32_0 = arith.constant 0 : i32
    %c0_i32_1 = arith.constant 0 : i32
    return %c0_i32, %c0_i32_0 : i32, i32
  }
  func.func @transform_6(%arg0: i32) -> (i32, i32) {
    %c0_i32 = arith.constant 0 : i32
    %c0_i32_0 = arith.constant 0 : i32
    %c0_i32_1 = arith.constant 0 : i32
    return %c0_i32, %c0_i32_0 : i32, i32
  }
  func.func @transform_7(%arg0: i32) -> (i32, i32) {
    %c0_i32 = arith.constant 0 : i32
    %c0_i32_0 = arith.constant 0 : i32
    return %arg0, %c0_i32 : i32, i32
  }
}

</mosaic_0001>

<bundles_post_ra>
// kernel: lenet_forward.3
= control target key start
LH: loop header
LB: loop body
LE: loop exit
PB: predicated region body
PF: predicated region fallthrough
CT: control target
= control target key end

     0   :  { %s6855_s1 = inlined_call_operand.vmem [shape: bf16[128,128], index: 1, kind: input, shape index: {}]   ;;  %s6856_s0 = inlined_call_operand.vmem [shape: bf16[4,400,128], index: 0, kind: input, shape index: {}]   ;;  %s6857_s2 = inlined_call_operand.vmem [shape: f32[1,128], index: 2, kind: input, shape index: {}]   ;;  %s6858_s3 = inlined_call_operand.vmem [shape: bf16[400,128], index: 3, kind: output, shape index: {}]  }
   0x1   :  { %v4071_v0 = vld [vmem:[%s6855_s1] sm:$0xff]   ;;  %v4072_v1 = vld [vmem:[%s6855_s1 + $0x8] sm:$0xff]   ;;  %v4073_v2 = vld [vmem:[%s6855_s1 + $0x10] sm:$0xff]  }
   0x2   :  { %3839 = vmatprep.subr.bf16.mxu0 %v4071_v0  ;;  %4055 = vmatprep.subr.bf16.mxu1 %v4071_v0  ;;  %v4074_v3 = vld [vmem:[%s6855_s1 + $0x18] sm:$0xff]   ;;  %v4079_v4 = vld [vmem:[%s6856_s0] sm:$0xff]   ;;  %v4081_v5 = vld [vmem:[%s6856_s0 + $0x190] sm:$0xff]  }
   0x3   :  { %3840 = vmatpush3.bf16.msra.mxu0 %v4071_v0  ;;  %4063 = vmatpush3.bf16.msra.mxu1 %v4071_v0  ;;  %v4075_v6 = vld [vmem:[%s6855_s1 + $0x20] sm:$0xff]   ;;  %v4076_v7 = vld [vmem:[%s6855_s1 + $0x28] sm:$0xff]   ;;  %v4077_v8 = vld [vmem:[%s6855_s1 + $0x30] sm:$0xff]  }
   0x4   :  { %3841 = vmatprep.subr.bf16.mxu0 %v4072_v1  ;;  %4056 = vmatprep.subr.bf16.mxu1 %v4072_v1  ;;  %v4078_v9 = vld [vmem:[%s6855_s1 + $0x38] sm:$0xff]   ;;  %v4080_v10 = vld [vmem:[%s6856_s0 + $0x8] sm:$0xff]   ;;  %v4083_v12 = vld [vmem:[%s6856_s0 + $0x10] sm:$0xff]  }
   0x5   :  { %3855 = vmatprep.mubr.bf16.mxu0 %v4079_v4  ;;  %3955 = vmatprep.mubr.bf16.mxu1 %v4081_v5  ;;  %v4082_v11 = vld [vmem:[%s6856_s0 + $0x198] sm:$0xff]   ;;  %v4085_v13 = vld [vmem:[%s6856_s0 + $0x1a0] sm:$0xff]   ;;  %v4086_v15 = vld [vmem:[%s6856_s0 + $0x1a8] sm:$0xff]  }
   0x6   :  { %v4084_v14 = vld [vmem:[%s6856_s0 + $0x18] sm:$0xff]   ;;  %v4087_v16 = vld [vmem:[%s6856_s0 + $0x20] sm:$0xff]   ;;  %v4089_v17 = vld [vmem:[%s6856_s0 + $0x1b0] sm:$0xff]  }
   0x7   :  { %3842 = vmatpush3.bf16.msra.mxu0 %v4072_v1  ;;  %4064 = vmatpush3.bf16.msra.mxu1 %v4072_v1  ;;  %v4088_v18 = vld [vmem:[%s6856_s0 + $0x28] sm:$0xff]   ;;  %v4090_v19 = vld [vmem:[%s6856_s0 + $0x1b8] sm:$0xff]   ;;  %v4091_v20 = vld [vmem:[%s6856_s0 + $0x30] sm:$0xff]  }
   0x8   :  { %3843 = vmatprep.subr.bf16.mxu0 %v4073_v2  ;;  %4057 = vmatprep.subr.bf16.mxu1 %v4073_v2  ;;  %v4093_v21 = vld [vmem:[%s6856_s0 + $0x1c0] sm:$0xff]   ;;  %v4092_v22 = vld [vmem:[%s6856_s0 + $0x38] sm:$0xff]   ;;  %v4094_v23 = vld [vmem:[%s6856_s0 + $0x1c8] sm:$0xff]  }
   0x9   :  { %v4095_v24 = vld [vmem:[%s6856_s0 + $0x40] sm:$0xff]   ;;  %v4097_v25 = vld [vmem:[%s6856_s0 + $0x1d0] sm:$0xff]   ;;  %v4096_v26 = vld [vmem:[%s6856_s0 + $0x48] sm:$0xff]  }
   0xa   :  { %v4098_v27 = vld [vmem:[%s6856_s0 + $0x1d8] sm:$0xff]   ;;  %v4099_v28 = vld [vmem:[%s6856_s0 + $0x50] sm:$0xff]   ;;  %v4101_v29 = vld [vmem:[%s6856_s0 + $0x1e0] sm:$0xff]  }
   0xb   :  { %3844 = vmatpush3.bf16.msra.mxu0 %v4073_v2  ;;  %4065 = vmatpush3.bf16.msra.mxu1 %v4073_v2  ;;  %v4100_v30 = vld [vmem:[%s6856_s0 + $0x58] sm:$0xff]   ;;  %v4102_v31 = vld [vmem:[%s6856_s0 + $0x1e8] sm:$0xff]   ;;  %v4103_v32 = vld [vmem:[%s6856_s0 + $0x60] sm:$0xff]  }
   0xc   :  { %3845 = vmatprep.subr.bf16.mxu0 %v4074_v3  ;;  %4058 = vmatprep.subr.bf16.mxu1 %v4074_v3  ;;  %v4105_v33 = vld [vmem:[%s6856_s0 + $0x1f0] sm:$0xff]   ;;  %v4104_v34 = vld [vmem:[%s6856_s0 + $0x68] sm:$0xff]   ;;  %v4106_v35 = vld [vmem:[%s6856_s0 + $0x1f8] sm:$0xff]  }
   0xd   :  { %v4107_v36 = vld [vmem:[%s6856_s0 + $0x70] sm:$0xff]   ;;  %v4109_v37 = vld [vmem:[%s6856_s0 + $0x200] sm:$0xff]   ;;  %v4108_v38 = vld [vmem:[%s6856_s0 + $0x78] sm:$0xff]  }
   0xe   :  { %v4110_v39 = vld [vmem:[%s6856_s0 + $0x208] sm:$0xff]   ;;  %v4111_v40 = vld [vmem:[%s6856_s0 + $0x80] sm:$0xff]   ;;  %v4113_v41 = vld [vmem:[%s6856_s0 + $0x210] sm:$0xff]  }
   0xf   :  { %3846 = vmatpush3.bf16.msra.mxu0 %v4074_v3  ;;  %4066 = vmatpush3.bf16.msra.mxu1 %v4074_v3  ;;  %v4112_v42 = vld [vmem:[%s6856_s0 + $0x88] sm:$0xff]   ;;  %v4114_v43 = vld [vmem:[%s6856_s0 + $0x218] sm:$0xff]   ;;  %v4115_v44 = vld [vmem:[%s6856_s0 + $0x90] sm:$0xff]  }
  0x10   :  { %3847 = vmatprep.subr.bf16.mxu0 %v4075_v6  ;;  %4059 = vmatprep.subr.bf16.mxu1 %v4075_v6  ;;  %v4117_v45 = vld [vmem:[%s6856_s0 + $0x220] sm:$0xff]   ;;  %v4116_v46 = vld [vmem:[%s6856_s0 + $0x98] sm:$0xff]   ;;  %v4118_v47 = vld [vmem:[%s6856_s0 + $0x228] sm:$0xff]  }
  0x11   :  { %v4119_v48 = vld [vmem:[%s6856_s0 + $0xa0] sm:$0xff]   ;;  %v4121_v49 = vld [vmem:[%s6856_s0 + $0x230] sm:$0xff]   ;;  %v4120_v50 = vld [vmem:[%s6856_s0 + $0xa8] sm:$0xff]  }
  0x12   :  { %v4122_v51 = vld [vmem:[%s6856_s0 + $0x238] sm:$0xff]   ;;  %v4123_v52 = vld [vmem:[%s6856_s0 + $0xb0] sm:$0xff]   ;;  %v4125_v53 = vld [vmem:[%s6856_s0 + $0x240] sm:$0xff]  }
  0x13   :  { %3848 = vmatpush3.bf16.msra.mxu0 %v4075_v6  ;;  %4067 = vmatpush3.bf16.msra.mxu1 %v4075_v6  ;;  %v4124_v54 = vld [vmem:[%s6856_s0 + $0xb8] sm:$0xff]   ;;  %v4126_v55 = vld [vmem:[%s6856_s0 + $0x248] sm:$0xff]   ;;  %v4127_v56 = vld [vmem:[%s6856_s0 + $0xc0] sm:$0xff]  }
  0x14   :  { %3849 = vmatprep.subr.bf16.mxu0 %v4076_v7  ;;  %4060 = vmatprep.subr.bf16.mxu1 %v4076_v7  ;;  %v4129_v57 = vld [vmem:[%s6856_s0 + $0x250] sm:$0xff]   ;;  %v4128_v58 = vld [vmem:[%s6856_s0 + $0xc8] sm:$0xff]   ;;  %v4130_v59 = vld [vmem:[%s6856_s0 + $0x258] sm:$0xff]  }
  0x15   :  { %v4131_v60 = vld [vmem:[%s6856_s0 + $0xd0] sm:$0xff]   ;;  %v4133_v61 = vld [vmem:[%s6856_s0 + $0x260] sm:$0xff]   ;;  %v4132_v62 = vld [vmem:[%s6856_s0 + $0xd8] sm:$0xff]  }
  0x16   :  { %v4134_v63 = vld [vmem:[%s6856_s0 + $0x268] sm:$0xff]   ;;  %v4135_v0 = vld [vmem:[%s6856_s0 + $0xe0] sm:$0xff]   ;;  %v4137_v1 = vld [vmem:[%s6856_s0 + $0x270] sm:$0xff]  }
  0x17   :  { %3850 = vmatpush3.bf16.msra.mxu0 %v4076_v7  ;;  %4068 = vmatpush3.bf16.msra.mxu1 %v4076_v7  ;;  %v4136_v2 = vld [vmem:[%s6856_s0 + $0xe8] sm:$0xff]   ;;  %v4138_v3 = vld [vmem:[%s6856_s0 + $0x278] sm:$0xff]   ;;  %v4139_v4 = vld [vmem:[%s6856_s0 + $0xf0] sm:$0xff]  }
  0x18   :  { %3851 = vmatprep.subr.bf16.mxu0 %v4077_v8  ;;  %4061 = vmatprep.subr.bf16.mxu1 %v4077_v8  ;;  %v4141_v5 = vld [vmem:[%s6856_s0 + $0x280] sm:$0xff]   ;;  %v4140_v6 = vld [vmem:[%s6856_s0 + $0xf8] sm:$0xff]   ;;  %v4142_v7 = vld [vmem:[%s6856_s0 + $0x288] sm:$0xff]  }
  0x1b   :  { %3852 = vmatpush3.bf16.msra.mxu0 %v4077_v8  ;;  %4069 = vmatpush3.bf16.msra.mxu1 %v4077_v8  ;;  %v4143_v8 = vld [vmem:[%s6856_s0 + $0x100] sm:$0xff]  }
  0x1c   :  { %3853 = vmatprep.subr.bf16.mxu0 %v4078_v9  ;;  %4062 = vmatprep.subr.bf16.mxu1 %v4078_v9 }
  0x1f   :  { %3854 = vmatpush3.bf16.msra.mxu0 %v4078_v9  ;;  %4070 = vmatpush3.bf16.msra.mxu1 %v4078_v9  ;;  %v4145_v9 = vld [vmem:[%s6856_s0 + $0x290] sm:$0xff]  }
  0x22   :  { %3856 = vmatmul.mubr.bf16.vlgmr.msra.gmra.mrb[0].mxu0 %v4080_v10  ;;  %3956 = vmatmul.mubr.bf16.vlgmr.msra.gmra.mrb[0].mxu1 %v4082_v11  ;;  %v4144_v10 = vld [vmem:[%s6856_s0 + $0x108] sm:$0xff]   ;;  %v4146_v11 = vld [vmem:[%s6856_s0 + $0x298] sm:$0xff]  }
  0x23   :  { %3859 = vmatprep.mubr.bf16.mxu0 %v4083_v12  ;;  %3959 = vmatprep.mubr.bf16.mxu1 %v4085_v13  ;;  %v4147_v12 = vld [vmem:[%s6856_s0 + $0x110] sm:$0xff]   ;;  %v4149_v13 = vld [vmem:[%s6856_s0 + $0x2a0] sm:$0xff]  }
  0x2a   :  { %3860 = vmatmul.mubr.bf16.gmra.mrb[4].mxu0 %v4084_v14  ;;  %3960 = vmatmul.mubr.bf16.gmra.mrb[4].mxu1 %v4086_v15  ;;  %v4148_v14 = vld [vmem:[%s6856_s0 + $0x118] sm:$0xff]   ;;  %v4150_v15 = vld [vmem:[%s6856_s0 + $0x2a8] sm:$0xff]  }
  0x2b   :  { %3863 = vmatprep.mubr.bf16.mxu0 %v4087_v16  ;;  %3963 = vmatprep.mubr.bf16.mxu1 %v4089_v17  ;;  %v4151_v16 = vld [vmem:[%s6856_s0 + $0x120] sm:$0xff]   ;;  %v4153_v17 = vld [vmem:[%s6856_s0 + $0x2b0] sm:$0xff]  }
  0x32   :  { %3864 = vmatmul.mubr.bf16.gmra.mrb[8].mxu0 %v4088_v18  ;;  %3964 = vmatmul.mubr.bf16.gmra.mrb[8].mxu1 %v4090_v19  ;;  %v4152_v18 = vld [vmem:[%s6856_s0 + $0x128] sm:$0xff]   ;;  %v4154_v19 = vld [vmem:[%s6856_s0 + $0x2b8] sm:$0xff]  }
  0x33   :  { %3867 = vmatprep.mubr.bf16.mxu0 %v4091_v20  ;;  %3967 = vmatprep.mubr.bf16.mxu1 %v4093_v21  ;;  %v4155_v20 = vld [vmem:[%s6856_s0 + $0x130] sm:$0xff]   ;;  %v4157_v21 = vld [vmem:[%s6856_s0 + $0x2c0] sm:$0xff]  }
  0x3a   :  { %3868 = vmatmul.mubr.bf16.gmra.mrb[12].mxu0 %v4092_v22  ;;  %3968 = vmatmul.mubr.bf16.gmra.mrb[12].mxu1 %v4094_v23  ;;  %v4156_v22 = vld [vmem:[%s6856_s0 + $0x138] sm:$0xff]   ;;  %v4158_v23 = vld [vmem:[%s6856_s0 + $0x2c8] sm:$0xff]  }
  0x3b   :  { %3871 = vmatprep.mubr.bf16.mxu0 %v4095_v24  ;;  %3971 = vmatprep.mubr.bf16.mxu1 %v4097_v25  ;;  %v4159_v24 = vld [vmem:[%s6856_s0 + $0x140] sm:$0xff]   ;;  %v4161_v25 = vld [vmem:[%s6856_s0 + $0x2d0] sm:$0xff]  }
  0x42   :  { %3872 = vmatmul.mubr.bf16.gmra.mrb[16].mxu0 %v4096_v26  ;;  %3972 = vmatmul.mubr.bf16.gmra.mrb[16].mxu1 %v4098_v27  ;;  %v4160_v26 = vld [vmem:[%s6856_s0 + $0x148] sm:$0xff]   ;;  %v4162_v27 = vld [vmem:[%s6856_s0 + $0x2d8] sm:$0xff]  }
  0x43   :  { %3875 = vmatprep.mubr.bf16.mxu0 %v4099_v28  ;;  %3975 = vmatprep.mubr.bf16.mxu1 %v4101_v29  ;;  %v4163_v28 = vld [vmem:[%s6856_s0 + $0x150] sm:$0xff]   ;;  %v4165_v29 = vld [vmem:[%s6856_s0 + $0x2e0] sm:$0xff]  }
  0x4a   :  { %3876 = vmatmul.mubr.bf16.gmra.mrb[20].mxu0 %v4100_v30  ;;  %3976 = vmatmul.mubr.bf16.gmra.mrb[20].mxu1 %v4102_v31  ;;  %v4164_v30 = vld [vmem:[%s6856_s0 + $0x158] sm:$0xff]   ;;  %v4166_v31 = vld [vmem:[%s6856_s0 + $0x2e8] sm:$0xff]  }
  0x4b   :  { %3879 = vmatprep.mubr.bf16.mxu0 %v4103_v32  ;;  %3979 = vmatprep.mubr.bf16.mxu1 %v4105_v33  ;;  %v4167_v32 = vld [vmem:[%s6856_s0 + $0x160] sm:$0xff]   ;;  %v4169_v33 = vld [vmem:[%s6856_s0 + $0x2f0] sm:$0xff]  }
  0x52   :  { %3880 = vmatmul.mubr.bf16.gmra.mrb[24].mxu0 %v4104_v34  ;;  %3980 = vmatmul.mubr.bf16.gmra.mrb[24].mxu1 %v4106_v35  ;;  %v4168_v34 = vld [vmem:[%s6856_s0 + $0x168] sm:$0xff]   ;;  %v4170_v35 = vld [vmem:[%s6856_s0 + $0x2f8] sm:$0xff]  }
  0x53   :  { %3883 = vmatprep.mubr.bf16.mxu0 %v4107_v36  ;;  %3983 = vmatprep.mubr.bf16.mxu1 %v4109_v37  ;;  %v4171_v36 = vld [vmem:[%s6856_s0 + $0x170] sm:$0xff]   ;;  %v4173_v37 = vld [vmem:[%s6856_s0 + $0x300] sm:$0xff]  }
  0x5a   :  { %3884 = vmatmul.mubr.bf16.gmra.mrb[28].mxu0 %v4108_v38  ;;  %3984 = vmatmul.mubr.bf16.gmra.mrb[28].mxu1 %v4110_v39  ;;  %v4172_v38 = vld [vmem:[%s6856_s0 + $0x178] sm:$0xff]   ;;  %v4174_v39 = vld [vmem:[%s6856_s0 + $0x308] sm:$0xff]  }
  0x5b   :  { %3887 = vmatprep.mubr.bf16.mxu0 %v4111_v40  ;;  %3987 = vmatprep.mubr.bf16.mxu1 %v4113_v41  ;;  %v4175_v40 = vld [vmem:[%s6856_s0 + $0x180] sm:$0xff]   ;;  %v4177_v41 = vld [vmem:[%s6856_s0 + $0x310] sm:$0xff]  }
  0x62   :  { %3888 = vmatmul.mubr.bf16.gmra.mrb[32].mxu0 %v4112_v42  ;;  %3988 = vmatmul.mubr.bf16.gmra.mrb[32].mxu1 %v4114_v43  ;;  %v4176_v42 = vld [vmem:[%s6856_s0 + $0x188] sm:$0xff]   ;;  %v4178_v43 = vld [vmem:[%s6856_s0 + $0x318] sm:$0xff]  }
  0x63   :  { %3891 = vmatprep.mubr.bf16.mxu0 %v4115_v44  ;;  %3991 = vmatprep.mubr.bf16.mxu1 %v4117_v45  ;;  %v5330_v44 = vld [vmem:[%s6857_s2] ss:$0 sm:$0xff] }
  0x6a   :  { %3892 = vmatmul.mubr.bf16.gmra.mrb[36].mxu0 %v4116_v46  ;;  %3992 = vmatmul.mubr.bf16.gmra.mrb[36].mxu1 %v4118_v47 }
  0x6b   :  { %3895 = vmatprep.mubr.bf16.mxu0 %v4119_v48  ;;  %3995 = vmatprep.mubr.bf16.mxu1 %v4121_v49 }
  0x72   :  { %3896 = vmatmul.mubr.bf16.gmra.mrb[40].mxu0 %v4120_v50  ;;  %3996 = vmatmul.mubr.bf16.gmra.mrb[40].mxu1 %v4122_v51 }
  0x73   :  { %3899 = vmatprep.mubr.bf16.mxu0 %v4123_v52  ;;  %3999 = vmatprep.mubr.bf16.mxu1 %v4125_v53 }
  0x7a   :  { %3900 = vmatmul.mubr.bf16.gmra.mrb[44].mxu0 %v4124_v54  ;;  %4000 = vmatmul.mubr.bf16.gmra.mrb[44].mxu1 %v4126_v55 }
  0x7b   :  { %3903 = vmatprep.mubr.bf16.mxu0 %v4127_v56  ;;  %4003 = vmatprep.mubr.bf16.mxu1 %v4129_v57 }
  0x82   :  { %3904 = vmatmul.mubr.bf16.gmra.mrb[48].mxu0 %v4128_v58  ;;  %4004 = vmatmul.mubr.bf16.gmra.mrb[48].mxu1 %v4130_v59 }
  0x83   :  { %3907 = vmatprep.mubr.bf16.mxu0 %v4131_v60  ;;  %4007 = vmatprep.mubr.bf16.mxu1 %v4133_v61 }
  0x8a   :  { %3908 = vmatmul.mubr.bf16.gmra.mrb[52].mxu0 %v4132_v62  ;;  %4008 = vmatmul.mubr.bf16.gmra.mrb[52].mxu1 %v4134_v63 }
  0x8b   :  { %3911 = vmatprep.mubr.bf16.mxu0 %v4135_v0  ;;  %4011 = vmatprep.mubr.bf16.mxu1 %v4137_v1 }
  0x92   :  { %3912 = vmatmul.mubr.bf16.gmra.mrb[56].mxu0 %v4136_v2  ;;  %4012 = vmatmul.mubr.bf16.gmra.mrb[56].mxu1 %v4138_v3 }
  0x93   :  { %3915 = vmatprep.mubr.bf16.mxu0 %v4139_v4  ;;  %4015 = vmatprep.mubr.bf16.mxu1 %v4141_v5 }
  0x9a   :  { %3916 = vmatmul.mubr.bf16.gmra.mrb[60].mxu0 %v4140_v6  ;;  %4016 = vmatmul.mubr.bf16.gmra.mrb[60].mxu1 %v4142_v7 }
  0x9b   :  { %3919 = vmatprep.mubr.bf16.mxu0 %v4143_v8  ;;  %4019 = vmatprep.mubr.bf16.mxu1 %v4145_v9 }
  0xa2   :  { %3920 = vmatmul.mubr.bf16.gmra.mrb[64].mxu0 %v4144_v10  ;;  %4020 = vmatmul.mubr.bf16.gmra.mrb[64].mxu1 %v4146_v11 }
  0xa3   :  { %3923 = vmatprep.mubr.bf16.mxu0 %v4147_v12  ;;  %4023 = vmatprep.mubr.bf16.mxu1 %v4149_v13 }
  0xaa   :  { %3924 = vmatmul.mubr.bf16.gmra.mrb[68].mxu0 %v4148_v14  ;;  %4024 = vmatmul.mubr.bf16.gmra.mrb[68].mxu1 %v4150_v15 }
  0xab   :  { %3927 = vmatprep.mubr.bf16.mxu0 %v4151_v16  ;;  %4027 = vmatprep.mubr.bf16.mxu1 %v4153_v17 }
  0xb2   :  { %3928 = vmatmul.mubr.bf16.gmra.mrb[72].mxu0 %v4152_v18  ;;  %4028 = vmatmul.mubr.bf16.gmra.mrb[72].mxu1 %v4154_v19 }
  0xb3   :  { %3931 = vmatprep.mubr.bf16.mxu0 %v4155_v20  ;;  %4031 = vmatprep.mubr.bf16.mxu1 %v4157_v21 }
  0xba   :  { %3932 = vmatmul.mubr.bf16.gmra.mrb[76].mxu0 %v4156_v22  ;;  %4032 = vmatmul.mubr.bf16.gmra.mrb[76].mxu1 %v4158_v23 }
  0xbb   :  { %3935 = vmatprep.mubr.bf16.mxu0 %v4159_v24  ;;  %4035 = vmatprep.mubr.bf16.mxu1 %v4161_v25 }
  0xc2   :  { %3936 = vmatmul.mubr.bf16.gmra.mrb[80].mxu0 %v4160_v26  ;;  %4036 = vmatmul.mubr.bf16.gmra.mrb[80].mxu1 %v4162_v27 }
  0xc3   :  { %3939 = vmatprep.mubr.bf16.mxu0 %v4163_v28  ;;  %4039 = vmatprep.mubr.bf16.mxu1 %v4165_v29 }
  0xca   :  { %3940 = vmatmul.mubr.bf16.gmra.mrb[84].mxu0 %v4164_v30  ;;  %4040 = vmatmul.mubr.bf16.gmra.mrb[84].mxu1 %v4166_v31 }
  0xcb   :  { %3943 = vmatprep.mubr.bf16.mxu0 %v4167_v32  ;;  %4043 = vmatprep.mubr.bf16.mxu1 %v4169_v33 }
  0xd2   :  { %3944 = vmatmul.mubr.bf16.gmra.mrb[88].mxu0 %v4168_v34  ;;  %4044 = vmatmul.mubr.bf16.gmra.mrb[88].mxu1 %v4170_v35 }
  0xd3   :  { %3947 = vmatprep.mubr.bf16.mxu0 %v4171_v36  ;;  %4047 = vmatprep.mubr.bf16.mxu1 %v4173_v37 }
  0xda   :  { %3948 = vmatmul.mubr.bf16.gmra.mrb[92].mxu0 %v4172_v38  ;;  %4048 = vmatmul.mubr.bf16.gmra.mrb[92].mxu1 %v4174_v39 }
  0xdb   :  { %3951 = vmatprep.mubr.bf16.mxu0 %v4175_v40  ;;  %4051 = vmatprep.mubr.bf16.mxu1 %v4177_v41 }
  0xe2   :  { %3952 = vmatmul.mubr.bf16.gmra.mrb[96].mxu0 %v4176_v42  ;;  %4052 = vmatmul.mubr.bf16.gmra.mrb[96].mxu1 %v4178_v43 }
  0xf5   :  { %v3857_v45 = vpop.f32.mrb[0].mxu0  ;;  %v3957_v46 = vpop.f32.mrb[0].mxu1 }
  0xf6   :  { %v929_v47 = vadd.f32 %v3857_v45, %v5330_v44  ;;  %v920_v48 = vpop.f32.mrb[1].mxu0  ;;  %v1329_v49 = vadd.f32 %v3957_v46, %v5330_v44  ;;  %v1320_v50 = vpop.f32.mrb[1].mxu1 }
  0xf7   :  { %v921_v51 = vadd.f32 %v5330_v44, %v920_v48  ;;  %v3858_v52 = vpop.f32.mrb[2].mxu0  ;;  %v1321_v53 = vadd.f32 %v5330_v44, %v1320_v50  ;;  %v3958_v54 = vpop.f32.mrb[2].mxu1 }
  0xf8   :  { %v1721_v55 = vmax.f32 %v929_v47, -30.0  ;;  %v1821_v56 = vmax.f32 %v1329_v49, -30.0  ;;  %v932_v57 = vadd.f32 %v3858_v52, %v5330_v44  ;;  %v923_v58 = vpop.f32.mrb[3].mxu0  ;;  %v1332_v59 = vadd.f32 %v3958_v54, %v5330_v44  ;;  %v1323_v60 = vpop.f32.mrb[3].mxu1 }
  0xf9   :  { %v1719_v61 = vmax.f32 %v921_v51, -30.0  ;;  %v1819_v62 = vmax.f32 %v1321_v53, -30.0  ;;  %v924_v63 = vadd.f32 %v5330_v44, %v923_v58  ;;  %v1324_v0 = vadd.f32 %v5330_v44, %v1323_v60 }
  0xfa   :  { %v1921_v1 = vsub.f32 0.0, %v1721_v55  ;;  %v2021_v2 = vsub.f32 0.0, %v1821_v56  ;;  %v1722_v3 = vmax.f32 %v932_v57, -30.0  ;;  %v1822_v4 = vmax.f32 %v1332_v59, -30.0 }
  0xfb   :  { %v1919_v5 = vsub.f32 0.0, %v1719_v61  ;;  %v2019_v6 = vsub.f32 0.0, %v1819_v62  ;;  %v1720_v7 = vmax.f32 %v924_v63, -30.0  ;;  %v1820_v8 = vmax.f32 %v1324_v0, -30.0 }
  0xfc   :  { %v2123_v9 = vmul.f32 1.442695, %v1921_v1  ;;  %v2323_v10 = vmul.f32 1.442695, %v2021_v2  ;;  %v1922_v11 = vsub.f32 0.0, %v1722_v3  ;;  %v2022_v14 = vsub.f32 0.0, %v1822_v4 }
  0xfd   :  { %v2119_v12 = vmul.f32 1.442695, %v1919_v5  ;;  %v1920_v13 = vsub.f32 0.0, %v1720_v7  ;;  %v2020_v16 = vsub.f32 0.0, %v1820_v8  ;;  %v3861_v17 = vpop.f32.mrb[4].mxu0  ;;  %v3961_v18 = vpop.f32.mrb[4].mxu1 }
  0xfe   :  { %4179 = vpow2.f32 %v2123_v9  ;;  %v2125_v15 = vmul.f32 1.442695, %v1922_v11  ;;  %v2319_v19 = vmul.f32 1.442695, %v2019_v6  ;;  %v945_v20 = vadd.f32 %v3861_v17, %v5330_v44  ;;  %v936_v21 = vpop.f32.mrb[5].mxu0  ;;  %v1336_v22 = vpop.f32.mrb[5].mxu1 }
  0xff   :  { %4181 = vpow2.f32 %v2119_v12  ;;  %v2121_v23 = vmul.f32 1.442695, %v1920_v13  ;;  %v937_v24 = vadd.f32 %v5330_v44, %v936_v21  ;;  %v1345_v25 = vadd.f32 %v3961_v18, %v5330_v44  ;;  %v3862_v26 = vpop.f32.mrb[6].mxu0  ;;  %v3962_v27 = vpop.f32.mrb[6].mxu1 }
 0x100   :  { %4183 = vpow2.f32 %v2323_v10  ;;  %v2325_v28 = vmul.f32 1.442695, %v2022_v14  ;;  %v1725_v29 = vmax.f32 %v945_v20, -30.0  ;;  %v948_v30 = vadd.f32 %v3862_v26, %v5330_v44  ;;  %v939_v31 = vpop.f32.mrb[7].mxu0  ;;  %v1339_v32 = vpop.f32.mrb[7].mxu1 }
 0x101   :  { %4185 = vpow2.f32 %v2125_v15  ;;  %v2321_v33 = vmul.f32 1.442695, %v2020_v16  ;;  %v1723_v34 = vmax.f32 %v937_v24, -30.0  ;;  %v1825_v35 = vmax.f32 %v1345_v25, -30.0 }
 0x102   :  { %4187 = vpow2.f32 %v2319_v19  ;;  %v1925_v36 = vsub.f32 0.0, %v1725_v29  ;;  %v1726_v37 = vmax.f32 %v948_v30, -30.0  ;;  %v1337_v38 = vadd.f32 %v5330_v44, %v1336_v22 }
 0x103   :  { %4189 = vpow2.f32 %v2121_v23  ;;  %v1923_v39 = vsub.f32 0.0, %v1723_v34  ;;  %v2025_v40 = vsub.f32 0.0, %v1825_v35  ;;  %v940_v51 = vadd.f32 %v5330_v44, %v939_v31 }
 0x104   :  { %4191 = vpow2.f32 %v2325_v28  ;;  %v1926_v43 = vsub.f32 0.0, %v1726_v37  ;;  %v2131_v45 = vmul.f32 1.442695, %v1925_v36  ;;  %v1823_v46 = vmax.f32 %v1337_v38, -30.0 }
 0x105   :  { %v3865_v41 = vpop.f32.mrb[8].mxu0  ;;  %v3965_v42 = vpop.f32.mrb[8].mxu1  ;;  %4193 = vpow2.f32 %v2321_v33  ;;  %v2127_v50 = vmul.f32 1.442695, %v1923_v39  ;;  %v2331_v55 = vmul.f32 1.442695, %v2025_v40  ;;  %v1348_v56 = vadd.f32 %v3962_v27, %v5330_v44 }
 0x106   :  { %v952_v47 = vpop.f32.mrb[9].mxu0  ;;  %v1352_v48 = vpop.f32.mrb[9].mxu1  ;;  %v2133_v60 = vmul.f32 1.442695, %v1926_v43  ;;  %v1340_v61 = vadd.f32 %v5330_v44, %v1339_v32  ;;  %4195 = vpow2.f32 %v2131_v45  ;;  %v2023_v0 = vsub.f32 0.0, %v1823_v46 }
 0x107   :  { %v3866_v52 = vpop.f32.mrb[10].mxu0  ;;  %v5346_v53 = vpop.f32.mrb[10].mxu1  ;;  %v961_v1 = vadd.f32 %v3865_v41, %v5330_v44  ;;  %4197 = vpow2.f32 %v2127_v50  ;;  %v1724_v3 = vmax.f32 %v940_v51, -30.0  ;;  %v1826_v6 = vmax.f32 %v1348_v56, -30.0 }
 0x108   :  { %v4180_v49 = vpop.eup %4179  ;;  %v955_v57 = vpop.f32.mrb[11].mxu0  ;;  %4199 = vpow2.f32 %v2331_v55  ;;  %v953_v7 = vadd.f32 %v5330_v44, %v952_v47  ;;  %v1824_v12 = vmax.f32 %v1340_v61, -30.0  ;;  %v1361_v13 = vadd.f32 %v3965_v42, %v5330_v44 }
 0x109   :  { %v4182_v54 = vpop.eup %4181  ;;  %v5349_v58 = vpop.f32.mrb[11].mxu1  ;;  %v2521_v63 = vadd.f32 1.0, %v4180_v49  ;;  %4201 = vpow2.f32 %v2133_v60  ;;  %v2327_v17 = vmul.f32 1.442695, %v2023_v0  ;;  %v1729_v18 = vmax.f32 %v961_v1, -30.0 }
 0x10a   :  { %v4184_v59 = vpop.eup %4183  ;;  %v2519_v2 = vadd.f32 1.0, %v4182_v54  ;;  %v964_v19 = vadd.f32 %v3866_v52, %v5330_v44  ;;  %v1924_v24 = vsub.f32 0.0, %v1724_v3  ;;  %v1353_v25 = vadd.f32 %v5330_v44, %v1352_v48 }
 0x10b   :  { %v4186_v62 = vpop.eup %4185  ;;  %v2621_v5 = vadd.f32 1.0, %v4184_v59  ;;  %4203 = vrcp.f32 %v2521_v63  ;;  %v2026_v29 = vsub.f32 0.0, %v1826_v6  ;;  %v1727_v30 = vmax.f32 %v953_v7, -30.0 }
 0x10c   :  { %v4188_v4 = vpop.eup %4187  ;;  %v2522_v11 = vadd.f32 1.0, %v4186_v62  ;;  %4205 = vrcp.f32 %v2519_v2  ;;  %v2024_v32 = vsub.f32 0.0, %v1824_v12  ;;  %v1829_v33 = vmax.f32 %v1361_v13, -30.0 }
 0x10d   :  { %v5354_v8 = vpop.f32.mrb[12].mxu0  ;;  %v5356_v9 = vpop.f32.mrb[12].mxu1  ;;  %v2619_v23 = vadd.f32 1.0, %v4188_v4  ;;  %4207 = vrcp.f32 %v2621_v5  ;;  %v1929_v35 = vsub.f32 0.0, %v1729_v18  ;;  %v1730_v36 = vmax.f32 %v964_v19, -30.0 }
 0x10e   :  { %v4190_v10 = vpop.eup %4189  ;;  %v5359_v14 = vpop.f32.mrb[13].mxu0  ;;  %4209 = vrcp.f32 %v2522_v11  ;;  %v2129_v37 = vmul.f32 1.442695, %v1924_v24  ;;  %v1827_v38 = vmax.f32 %v1353_v25, -30.0  ;;  %v2333_v40 = vmul.f32 1.442695, %v2026_v29 }
 0x10f   :  { %v5361_v15 = vpop.f32.mrb[13].mxu1  ;;  %v4192_v16 = vpop.eup %4191  ;;  %v2520_v28 = vadd.f32 1.0, %v4190_v10  ;;  %4211 = vpow2.f32 %v2327_v17  ;;  %v1927_v41 = vsub.f32 0.0, %v1727_v30  ;;  %v956_v42 = vadd.f32 %v5330_v44, %v955_v57 }
 0x110   :  { %v5364_v20 = vpop.f32.mrb[14].mxu0  ;;  %v5366_v21 = vpop.f32.mrb[14].mxu1  ;;  %v2622_v31 = vadd.f32 1.0, %v4192_v16  ;;  %4213 = vrcp.f32 %v2619_v23  ;;  %v2329_v47 = vmul.f32 1.442695, %v2024_v32  ;;  %v2029_v48 = vsub.f32 0.0, %v1829_v33 }
 0x111   :  { %v4194_v22 = vpop.eup %4193  ;;  %v5369_v26 = vpop.f32.mrb[15].mxu0  ;;  %4215 = vrcp.f32 %v2520_v28  ;;  %v1364_v49 = vadd.f32 %v5346_v53, %v5330_v44  ;;  %v2139_v54 = vmul.f32 1.442695, %v1929_v35  ;;  %v1930_v55 = vsub.f32 0.0, %v1730_v36 }
 0x112   :  { %v5371_v27 = vpop.f32.mrb[15].mxu1  ;;  %v2620_v34 = vadd.f32 1.0, %v4194_v22  ;;  %v4196_v39 = vpop.eup %4195  ;;  %4217 = vrcp.f32 %v2622_v31  ;;  %v1356_v56 = vadd.f32 %v5330_v44, %v5349_v58  ;;  %v2027_v62 = vsub.f32 0.0, %v1827_v38 }
 0x113   :  { %v4198_v46 = vpop.eup %4197  ;;  %v2525_v61 = vadd.f32 1.0, %v4196_v39  ;;  %v977_v53 = vadd.f32 %v5354_v8, %v5330_v44  ;;  %v2135_v2 = vmul.f32 1.442695, %v1927_v41  ;;  %v1728_v58 = vmax.f32 %v956_v42, -30.0 }
 0x114   :  { %v4200_v52 = vpop.eup %4199  ;;  %4219 = vrcp.f32 %v2620_v34  ;;  %v2339_v4 = vmul.f32 1.442695, %v2029_v48  ;;  %v1830_v5 = vmax.f32 %v1364_v49, -30.0  ;;  %v2141_v7 = vmul.f32 1.442695, %v1930_v55 }
 0x115   :  { %v5374_v43 = vpop.f32.mrb[16].mxu0  ;;  %v5376_v45 = vpop.f32.mrb[16].mxu1  ;;  %4221 = vpow2.f32 %v2129_v37  ;;  %v1828_v10 = vmax.f32 %v1356_v56, -30.0  ;;  %v2335_v11 = vmul.f32 1.442695, %v2027_v62  ;;  %v1733_v12 = vmax.f32 %v977_v53, -30.0 }
 0x116   :  { %v5380_v50 = vpop.f32.mrb[17].mxu0  ;;  %v5382_v51 = vpop.f32.mrb[17].mxu1  ;;  %4223 = vpow2.f32 %v2333_v40  ;;  %v2523_v16 = vadd.f32 1.0, %v4198_v46  ;;  %v1928_v17 = vsub.f32 0.0, %v1728_v58  ;;  %v969_v18 = vadd.f32 %v5330_v44, %v5359_v14 }
 0x117   :  { %v5386_v57 = vpop.f32.mrb[18].mxu0  ;;  %v5388_v59 = vpop.f32.mrb[18].mxu1  ;;  %4225 = vpow2.f32 %v2329_v47  ;;  %v2625_v24 = vadd.f32 1.0, %v4200_v52  ;;  %v2030_v25 = vsub.f32 0.0, %v1830_v5  ;;  %v2028_v32 = vsub.f32 0.0, %v1828_v10 }
 0x118   :  { %v4202_v60 = vpop.eup %4201  ;;  %v5392_v63 = vpop.f32.mrb[19].mxu0  ;;  %4227 = vpow2.f32 %v2139_v54  ;;  %v1933_v36 = vsub.f32 0.0, %v1733_v12  ;;  %v2137_v40 = vmul.f32 1.442695, %v1928_v17  ;;  %v1731_v41 = vmax.f32 %v969_v18, -30.0 }
 0x119   :  { %v5394_v0 = vpop.f32.mrb[19].mxu1  ;;  %v5396_v1 = vpop.eup %4203  ;;  %4229 = vrcp.f32 %v2525_v61  ;;  %v2526_v31 = vadd.f32 1.0, %v4202_v60  ;;  %v2341_v46 = vmul.f32 1.442695, %v2030_v25  ;;  %v1377_v47 = vadd.f32 %v5356_v9, %v5330_v44 }
 0x11a   :  { %6859 = vst [vmem:[#allocation2_spill] sm:$0xff] %v5396_v1  ;;  %v5398_v3 = vpop.eup %4205  ;;  %4231 = vpow2.f32 %v2135_v2  ;;  %v980_v48 = vadd.f32 %v5364_v20, %v5330_v44  ;;  %v2337_v52 = vmul.f32 1.442695, %v2028_v32  ;;  %v1369_v54 = vadd.f32 %v5330_v44, %v5361_v15 }
 0x11b   :  { %6860 = vst [vmem:[#allocation3_spill] sm:$0xff] %v5398_v3  ;;  %v5400_v6 = vpop.eup %4207  ;;  %4233 = vpow2.f32 %v2339_v4  ;;  %v2147_v56 = vmul.f32 1.442695, %v1933_v36  ;;  %v972_v60 = vadd.f32 %v5330_v44, %v5369_v26  ;;  %v1931_v53 = vsub.f32 0.0, %v1731_v41 }
 0x11c   :  { %6861 = vst [vmem:[#allocation4_spill] sm:$0xff] %v5400_v6  ;;  %v5402_v8 = vpop.eup %4209  ;;  %4235 = vpow2.f32 %v2141_v7  ;;  %v1833_v4 = vmax.f32 %v1377_v47, -30.0  ;;  %v1734_v15 = vmax.f32 %v980_v48, -30.0  ;;  %v1380_v12 = vadd.f32 %v5366_v21, %v5330_v44 }
 0x11d   :  { %6862 = vst [vmem:[#allocation5_spill] sm:$0xff] %v5402_v8  ;;  %v4212_v13 = vpop.eup %4211  ;;  %v5406_v19 = vpop.f32.mrb[20].mxu0  ;;  %4237 = vpow2.f32 %v2335_v11  ;;  %v1831_v11 = vmax.f32 %v1369_v54, -30.0  ;;  %v1372_v25 = vadd.f32 %v5330_v44, %v5371_v27  ;;  %v2143_v36 = vmul.f32 1.442695, %v1931_v53 }
 0x11e   :  { %v5408_v22 = vpop.f32.mrb[20].mxu1  ;;  %v5410_v23 = vpop.eup %4213  ;;  %v2623_v35 = vadd.f32 1.0, %v4212_v13  ;;  %4239 = vrcp.f32 %v2523_v16  ;;  %v993_v21 = vadd.f32 %v5374_v43, %v5330_v44  ;;  %v1934_v47 = vsub.f32 0.0, %v1734_v15 }
 0x11f   :  { %6863 = vst [vmem:[#allocation6_spill] sm:$0xff] %v5410_v23  ;;  %v5412_v28 = vpop.f32.mrb[21].mxu0  ;;  %v5414_v29 = vpop.f32.mrb[21].mxu1  ;;  %4241 = vrcp.f32 %v2625_v24  ;;  %v1732_v24 = vmax.f32 %v972_v60, -30.0  ;;  %v1832_v43 = vmax.f32 %v1372_v25, -30.0  ;;  %v996_v25 = vadd.f32 %v5386_v57, %v5330_v44 }
 0x120   :  { %v5416_v30 = vpop.eup %4215  ;;  %v5418_v33 = vpop.f32.mrb[22].mxu0  ;;  %4243 = vrcp.f32 %v2526_v31 }
 0x121   :  { %6864 = vst [vmem:[#allocation7_spill] sm:$0xff] %v5416_v30  ;;  %v5420_v14 = vpop.f32.mrb[22].mxu1  ;;  %v5422_v34 = vpop.eup %4217  ;;  %4245 = vrcp.f32 %v2623_v35 }
 0x122   :  { %6865 = vst [vmem:[#allocation8_spill] sm:$0xff] %v5422_v34  ;;  %v5424_v37 = vpop.f32.mrb[23].mxu0  ;;  %v5426_v38 = vpop.f32.mrb[23].mxu1  ;;  %4247 = vpow2.f32 %v2137_v40  ;;  %v985_v40 = vadd.f32 %v5330_v44, %v5380_v50 }
 0x123   :  { %v5428_v39 = vpop.eup %4219  ;;  %4249 = vpow2.f32 %v2341_v46  ;;  %v2033_v46 = vsub.f32 0.0, %v1833_v4 }
 0x124   :  { %6866 = vst [vmem:[#allocation9_spill] sm:$0xff] %v5428_v39  ;;  %v4222_v42 = vpop.eup %4221  ;;  %4251 = vpow2.f32 %v2337_v52  ;;  %v1834_v52 = vmax.f32 %v1380_v12, -30.0 }
 0x125   :  { %v4224_v49 = vpop.eup %4223  ;;  %v2524_v62 = vadd.f32 1.0, %v4222_v42  ;;  %v5438_v9 = vpop.f32.mrb[24].mxu0  ;;  %4253 = vpow2.f32 %v2147_v56  ;;  %v1932_v56 = vsub.f32 0.0, %v1732_v24  ;;  %v2347_v15 = vmul.f32 1.442695, %v2033_v46 }
 0x126   :  { %v4226_v55 = vpop.eup %4225  ;;  %v5440_v2 = vpop.f32.mrb[24].mxu1  ;;  %v2626_v58 = vadd.f32 1.0, %v4224_v49  ;;  %v2031_v49 = vsub.f32 0.0, %v1831_v11  ;;  %v2034_v24 = vsub.f32 0.0, %v1834_v52 }
 0x127   :  { %v4228_v61 = vpop.eup %4227  ;;  %v5444_v5 = vpop.f32.mrb[25].mxu0  ;;  %v2624_v26 = vadd.f32 1.0, %v4226_v55  ;;  %4255 = vrcp.f32 %v2524_v62  ;;  %v1735_v62 = vmax.f32 %v985_v40, -30.0  ;;  %v2145_v40 = vmul.f32 1.442695, %v1932_v56 }
 0x128   :  { %v5442_v20 = vpop.eup %4229  ;;  %v5446_v7 = vpop.f32.mrb[25].mxu1  ;;  %v2529_v18 = vadd.f32 1.0, %v4228_v61  ;;  %4257 = vrcp.f32 %v2626_v58  ;;  %v1737_v61 = vmax.f32 %v993_v21, -30.0 }
 0x129   :  { %6867 = vst [vmem:[#allocation10_spill] sm:$0xff] %v5442_v20  ;;  %v4232_v10 = vpop.eup %4231  ;;  %v5450_v13 = vpop.f32.mrb[26].mxu0  ;;  %4259 = vrcp.f32 %v2624_v26  ;;  %v1393_v26 = vadd.f32 %v5376_v45, %v5330_v44 }
 0x12a   :  { %v5452_v16 = vpop.f32.mrb[26].mxu1  ;;  %v4234_v17 = vpop.eup %4233  ;;  %v2527_v42 = vadd.f32 1.0, %v4232_v10  ;;  %4261 = vrcp.f32 %v2529_v18  ;;  %v2149_v10 = vmul.f32 1.442695, %v1934_v47  ;;  %v2343_v18 = vmul.f32 1.442695, %v2031_v49 }
 0x12b   :  { %v5456_v31 = vpop.f32.mrb[27].mxu0  ;;  %v5458_v32 = vpop.f32.mrb[27].mxu1  ;;  %v2629_v27 = vadd.f32 1.0, %v4234_v17  ;;  %4263 = vpow2.f32 %v2143_v36  ;;  %v1937_v47 = vsub.f32 0.0, %v1737_v61  ;;  %v1385_v49 = vadd.f32 %v5330_v44, %v5382_v51 }
 0x12c   :  { %v4236_v35 = vpop.eup %4235  ;;  %4265 = vrcp.f32 %v2527_v42 }
 0x12d   :  { %v4238_v41 = vpop.eup %4237  ;;  %v2530_v55 = vadd.f32 1.0, %v4236_v35  ;;  %v5470_v53 = vpop.f32.mrb[28].mxu0  ;;  %4267 = vrcp.f32 %v2629_v27  ;;  %v1935_v27 = vsub.f32 0.0, %v1735_v62 }
 0x12e   :  { %v5464_v48 = vpop.eup %4239  ;;  %v2627_v50 = vadd.f32 1.0, %v4238_v41  ;;  %v5472_v58 = vpop.f32.mrb[28].mxu1  ;;  %v2032_v41 = vsub.f32 0.0, %v1832_v43  ;;  %v2349_v43 = vmul.f32 1.442695, %v2034_v24 }
 0x12f   :  { %6868 = vst [vmem:[#allocation11_spill] sm:$0xff] %v5464_v48  ;;  %v5466_v54 = vpop.eup %4241  ;;  %v5478_v11 = vpop.f32.mrb[29].mxu0  ;;  %4269 = vrcp.f32 %v2530_v55  ;;  %v988_v55 = vadd.f32 %v5330_v44, %v5392_v63 }
 0x130   :  { %6869 = vst [vmem:[#allocation12_spill] sm:$0xff] %v5466_v54  ;;  %v5468_v60 = vpop.eup %4243  ;;  %v5480_v12 = vpop.f32.mrb[29].mxu1  ;;  %4271 = vrcp.f32 %v2627_v50  ;;  %v1738_v54 = vmax.f32 %v996_v25, -30.0  ;;  %v1396_v50 = vadd.f32 %v5388_v59, %v5330_v44  ;;  %v2345_v62 = vmul.f32 1.442695, %v2032_v41 }
 0x131   :  { %6870 = vst [vmem:[#allocation13_spill] sm:$0xff] %v5468_v60  ;;  %v5474_v4 = vpop.eup %4245  ;;  %v5484_v35 = vpop.f32.mrb[30].mxu0  ;;  %4273 = vpow2.f32 %v2347_v15  ;;  %v1837_v60 = vmax.f32 %v1393_v26, -30.0  ;;  %v2155_v15 = vmul.f32 1.442695, %v1937_v47  ;;  %v1835_v26 = vmax.f32 %v1385_v49, -30.0 }
 0x132   :  { %6871 = vst [vmem:[#allocation14_spill] sm:$0xff] %v5474_v4  ;;  %v4248_v17 = vpop.eup %4247  ;;  %v5486_v36 = vpop.f32.mrb[30].mxu1  ;;  %4275 = vpow2.f32 %v2149_v10  ;;  %v2151_v10 = vmul.f32 1.442695, %v1935_v27  ;;  %v1736_v25 = vmax.f32 %v988_v55, -30.0  ;;  %v1938_v41 = vsub.f32 0.0, %v1738_v54 }
 0x133   :  { %v4250_v21 = vpop.eup %4249  ;;  %v5488_v45 = vpop.f32.mrb[31].mxu0  ;;  %v2528_v52 = vadd.f32 1.0, %v4248_v17  ;;  %4277 = vpow2.f32 %v2343_v18  ;;  %v2037_v24 = vsub.f32 0.0, %v1837_v60  ;;  %v1838_v34 = vmax.f32 %v1396_v50, -30.0 }
 0x134   :  { %v5490_v42 = vpop.f32.mrb[31].mxu1  ;;  %v4252_v46 = vpop.eup %4251  ;;  %4279 = vpow2.f32 %v2145_v40  ;;  %v2630_v18 = vadd.f32 1.0, %v4250_v21  ;;  %v1009_v60 = vadd.f32 %v5406_v19, %v5330_v44  ;;  %v2035_v55 = vsub.f32 0.0, %v1835_v26 }
 0x135   :  { %v4254_v57 = vpop.eup %4253  ;;  %v5504_v17 = vpop.f32.mrb[32].mxu0  ;;  %4281 = vrcp.f32 %v2528_v52  ;;  %v2628_v49 = vadd.f32 1.0, %v4252_v46  ;;  %v2157_v26 = vmul.f32 1.442695, %v1938_v41 }
 0x136   :  { %v5496_v56 = vpop.eup %4255  ;;  %v5506_v63 = vpop.f32.mrb[32].mxu1  ;;  %4283 = vpow2.f32 %v2349_v43  ;;  %v2533_v54 = vadd.f32 1.0, %v4254_v57  ;;  %v1409_v57 = vadd.f32 %v5408_v22, %v5330_v44 }
 0x137   :  { %6872 = vst [vmem:[#allocation15_spill] sm:$0xff] %v5496_v56  ;;  %v5500_v61 = vpop.eup %4257  ;;  %v5510_v59 = vpop.f32.mrb[33].mxu0  ;;  %4285 = vpow2.f32 %v2345_v62  ;;  %v1936_v62 = vsub.f32 0.0, %v1736_v25  ;;  %v2351_v25 = vmul.f32 1.442695, %v2035_v55 }
 0x138   :  { %6873 = vst [vmem:[#allocation16_spill] sm:$0xff] %v5500_v61  ;;  %v5502_v51 = vpop.eup %4259  ;;  %v5512_v40 = vpop.f32.mrb[34].mxu0  ;;  %4287 = vpow2.f32 %v2155_v15 }
 0x139   :  { %6874 = vst [vmem:[#allocation17_spill] sm:$0xff] %v5502_v51  ;;  %v5508_v20 = vpop.eup %4261  ;;  %v5520_v27 = vpop.f32.mrb[33].mxu1  ;;  %4289 = vpow2.f32 %v2151_v10  ;;  %v2355_v51 = vmul.f32 1.442695, %v2037_v24 }
 0x13a   :  { %6875 = vst [vmem:[#allocation18_spill] sm:$0xff] %v5508_v20  ;;  %v4264_v61 = vpop.eup %4263  ;;  %v1388_v20 = vadd.f32 %v5330_v44, %v5394_v0  ;;  %v5522_v52 = vpop.f32.mrb[35].mxu0  ;;  %v1001_v0 = vadd.f32 %v5330_v44, %v5412_v28  ;;  %4291 = vrcp.f32 %v2630_v18  ;;  %v1012_v28 = vadd.f32 %v5418_v33, %v5330_v44 }
 0x13b   :  { %v5514_v47 = vpop.eup %4265  ;;  %v5526_v43 = vpop.f32.mrb[34].mxu1  ;;  %v2531_v46 = vadd.f32 1.0, %v4264_v61  ;;  %4293 = vrcp.f32 %v2628_v49  ;;  %v1741_v61 = vmax.f32 %v1009_v60, -30.0 }
 0x13c   :  { %6876 = vst [vmem:[#allocation19_spill] sm:$0xff] %v5514_v47  ;;  %v5524_v21 = vpop.eup %4267  ;;  %v5532_v19 = vpop.f32.mrb[35].mxu1  ;;  %4295 = vrcp.f32 %v2533_v54  ;;  %v1739_v18 = vmax.f32 %v1001_v0, -30.0  ;;  %v1841_v54 = vmax.f32 %v1409_v57, -30.0  ;;  %v1742_v48 = vmax.f32 %v1012_v28, -30.0 }
 0x13d   :  { %6877 = vst [vmem:[#allocation20_spill] sm:$0xff] %v5524_v21  ;;  %v5528_v50 = vpop.eup %4269  ;;  %v2038_v21 = vsub.f32 0.0, %v1838_v34  ;;  %v5540_v8 = vpop.f32.mrb[36].mxu0  ;;  %4297 = vrcp.f32 %v2531_v46  ;;  %v2153_v34 = vmul.f32 1.442695, %v1936_v62  ;;  %v1941_v4 = vsub.f32 0.0, %v1741_v61 }
 0x13e   :  { %6878 = vst [vmem:[#allocation21_spill] sm:$0xff] %v5528_v50  ;;  %v5534_v47 = vpop.eup %4271  ;;  %v1836_v50 = vmax.f32 %v1388_v20, -30.0  ;;  %v5544_v22 = vpop.f32.mrb[37].mxu0  ;;  %4299 = vpow2.f32 %v2355_v51  ;;  %v1401_v51 = vadd.f32 %v5330_v44, %v5414_v29  ;;  %v2041_v61 = vsub.f32 0.0, %v1841_v54 }
 0x13f   :  { %6879 = vst [vmem:[#allocation22_spill] sm:$0xff] %v5534_v47  ;;  %v4274_v15 = vpop.eup %4273  ;;  %v5542_v47 = vpop.f32.mrb[36].mxu1  ;;  %v2357_v60 = vmul.f32 1.442695, %v2038_v21  ;;  %4301 = vpow2.f32 %v2157_v26  ;;  %v2163_v39 = vmul.f32 1.442695, %v1941_v4 }
 0x140   :  { %v4276_v10 = vpop.eup %4275  ;;  %v5546_v49 = vpop.f32.mrb[37].mxu1  ;;  %v2633_v41 = vadd.f32 1.0, %v4274_v15  ;;  %v2036_v56 = vsub.f32 0.0, %v1836_v50  ;;  %4303 = vpow2.f32 %v2351_v25  ;;  %v1004_v50 = vadd.f32 %v5330_v44, %v5424_v37 }
 0x141   :  { %v4278_v24 = vpop.eup %4277  ;;  %v5548_v55 = vpop.f32.mrb[38].mxu0  ;;  %v2534_v6 = vadd.f32 1.0, %v4276_v10  ;;  %4305 = vpow2.f32 %v2153_v34  ;;  %v1939_v10 = vsub.f32 0.0, %v1739_v18  ;;  %v1404_v25 = vadd.f32 %v5330_v44, %v5426_v38 }
 0x142   :  { %v4280_v20 = vpop.eup %4279  ;;  %v5552_v46 = vpop.f32.mrb[39].mxu0  ;;  %v2631_v1 = vadd.f32 1.0, %v4278_v24  ;;  %4307 = vrcp.f32 %v2633_v41  ;;  %v1412_v24 = vadd.f32 %v5420_v14, %v5330_v44  ;;  %v1839_v18 = vmax.f32 %v1401_v51, -30.0 }
 0x143   :  { %v5550_v33 = vpop.eup %4281  ;;  %v5554_v62 = vpop.f32.mrb[38].mxu1  ;;  %v2532_v15 = vadd.f32 1.0, %v4280_v20  ;;  %4309 = vrcp.f32 %v2534_v6  ;;  %v1025_v37 = vadd.f32 %v5438_v9, %v5330_v44  ;;  %v1942_v6 = vsub.f32 0.0, %v1742_v48 }
 0x144   :  { %6880 = vst [vmem:[#allocation23_spill] sm:$0xff] %v5550_v33  ;;  %v4284_v0 = vpop.eup %4283  ;;  %v5558_v21 = vpop.f32.mrb[39].mxu1  ;;  %v2353_v33 = vmul.f32 1.442695, %v2036_v56  ;;  %4311 = vrcp.f32 %v2631_v1  ;;  %v1840_v9 = vmax.f32 %v1404_v25, -30.0  ;;  %v2039_v23 = vsub.f32 0.0, %v1839_v18 }
 0x145   :  { %v4286_v57 = vpop.eup %4285  ;;  %v2634_v29 = vadd.f32 1.0, %v4284_v0  ;;  %v5570_v41 = vpop.f32.mrb[40].mxu0  ;;  %4313 = vrcp.f32 %v2532_v15  ;;  %v1740_v0 = vmax.f32 %v1004_v50, -30.0  ;;  %v2363_v15 = vmul.f32 1.442695, %v2041_v61 }
 0x146   :  { %v4288_v26 = vpop.eup %4287  ;;  %v2632_v34 = vadd.f32 1.0, %v4286_v57  ;;  %v5572_v54 = vpop.f32.mrb[40].mxu1  ;;  %4315 = vpow2.f32 %v2357_v60  ;;  %v1842_v57 = vmax.f32 %v1412_v24, -30.0  ;;  %v1745_v3 = vmax.f32 %v1025_v37, -30.0 }
 0x147   :  { %v4290_v28 = vpop.eup %4289  ;;  %v2537_v38 = vadd.f32 1.0, %v4288_v26  ;;  %v5576_v56 = vpop.f32.mrb[41].mxu0  ;;  %4317 = vrcp.f32 %v2634_v29  ;;  %v1017_v60 = vadd.f32 %v5330_v44, %v5444_v5  ;;  %v1417_v5 = vadd.f32 %v5330_v44, %v5446_v7 }
 0x148   :  { %v5566_v20 = vpop.eup %4291  ;;  %v5578_v4 = vpop.f32.mrb[41].mxu1  ;;  %v2535_v51 = vadd.f32 1.0, %v4290_v28  ;;  %4319 = vrcp.f32 %v2632_v34  ;;  %v2165_v28 = vmul.f32 1.442695, %v1942_v6  ;;  %v2042_v29 = vsub.f32 0.0, %v1842_v57 }
 0x149   :  { %6881 = vst [vmem:[#allocation24_spill] sm:$0xff] %v5566_v20  ;;  %v5574_v14 = vpop.eup %4293  ;;  %v5582_v20 = vpop.f32.mrb[42].mxu0  ;;  %4321 = vrcp.f32 %v2537_v38  ;;  %v1028_v34 = vadd.f32 %v5450_v13, %v5330_v44  ;;  %v1020_v38 = vadd.f32 %v5330_v44, %v5456_v31  ;;  %v1428_v7 = vadd.f32 %v5452_v16, %v5330_v44 }
 0x14a   :  { %6882 = vst [vmem:[#allocation25_spill] sm:$0xff] %v5574_v14  ;;  %v5580_v1 = vpop.eup %4295  ;;  %v2159_v14 = vmul.f32 1.442695, %v1939_v10  ;;  %v5586_v26 = vpop.f32.mrb[43].mxu0  ;;  %v1425_v10 = vadd.f32 %v5440_v2, %v5330_v44  ;;  %4323 = vrcp.f32 %v2535_v51  ;;  %v2359_v2 = vmul.f32 1.442695, %v2039_v23 }
 0x14b   :  { %6883 = vst [vmem:[#allocation26_spill] sm:$0xff] %v5580_v1  ;;  %v5584_v30 = vpop.eup %4297  ;;  %v5588_v48 = vpop.f32.mrb[42].mxu1  ;;  %v1940_v1 = vsub.f32 0.0, %v1740_v0  ;;  %4325 = vpow2.f32 %v2353_v33  ;;  %v1945_v0 = vsub.f32 0.0, %v1745_v3  ;;  %v1743_v51 = vmax.f32 %v1017_v60, -30.0 }
 0x14c   :  { %6884 = vst [vmem:[#allocation27_spill] sm:$0xff] %v5584_v30  ;;  %v4300_v50 = vpop.eup %4299  ;;  %v5592_v24 = vpop.f32.mrb[43].mxu1  ;;  %v2040_v30 = vsub.f32 0.0, %v1840_v9  ;;  %4327 = vpow2.f32 %v2163_v39  ;;  %v2365_v3 = vmul.f32 1.442695, %v2042_v29  ;;  %v1746_v23 = vmax.f32 %v1028_v34, -30.0 }
 0x14d   :  { %6885 = vst [vmem:[#allocation28_spill] sm:$0xff] %v5592_v24  ;;  %v4302_v25 = vpop.eup %4301  ;;  %v2637_v37 = vadd.f32 1.0, %v4300_v50  ;;  %v5604_v57 = vpop.f32.mrb[44].mxu0  ;;  %4329 = vpow2.f32 %v2159_v14  ;;  %v2161_v33 = vmul.f32 1.442695, %v1940_v1  ;;  %v1845_v50 = vmax.f32 %v1425_v10, -30.0 }
 0x14e   :  { %v4304_v61 = vpop.eup %4303  ;;  %v5606_v9 = vpop.f32.mrb[44].mxu1  ;;  %4331 = vpow2.f32 %v2363_v15  ;;  %v2361_v14 = vmul.f32 1.442695, %v2040_v30  ;;  %v1843_v1 = vmax.f32 %v1417_v5, -30.0  ;;  %v1744_v10 = vmax.f32 %v1020_v38, -30.0 }
 0x14f   :  { %v4306_v18 = vpop.eup %4305  ;;  %6887 = vst [vmem:[#allocation30_spill] sm:$0xff] %v5606_v9  ;;  %v5612_v24 = vpop.f32.mrb[45].mxu0  ;;  %4333 = vrcp.f32 %v2637_v37  ;;  %v2635_v34 = vadd.f32 1.0, %v4304_v61  ;;  %v1946_v37 = vsub.f32 0.0, %v1746_v23  ;;  %v1420_v5 = vadd.f32 %v5330_v44, %v5458_v32 }
 0x150   :  { %v5602_v6 = vpop.eup %4307  ;;  %6889 = vst [vmem:[#allocation32_spill] sm:$0xff] %v5612_v24  ;;  %v5614_v31 = vpop.f32.mrb[45].mxu1  ;;  %v2538_v24 = vadd.f32 1.0, %v4302_v25  ;;  %4335 = vpow2.f32 %v2165_v28  ;;  %v2536_v30 = vadd.f32 1.0, %v4306_v18  ;;  %v2043_v38 = vsub.f32 0.0, %v1843_v1 }
 0x151   :  { %6886 = vst [vmem:[#allocation29_spill] sm:$0xff] %v5602_v6  ;;  %v5608_v13 = vpop.eup %4309  ;;  %6890 = vst [vmem:[#allocation33_spill] sm:$0xff] %v5614_v31  ;;  %v5618_v60 = vpop.f32.mrb[46].mxu0  ;;  %v2171_v31 = vmul.f32 1.442695, %v1945_v0  ;;  %4337 = vpow2.f32 %v2359_v2  ;;  %v1944_v0 = vsub.f32 0.0, %v1744_v10  ;;  %v1041_v2 = vadd.f32 %v5470_v53, %v5330_v44 }
 0x152   :  { %6888 = vst [vmem:[#allocation31_spill] sm:$0xff] %v5608_v13  ;;  %v5616_v39 = vpop.eup %4311  ;;  %6892 = vst [vmem:[#allocation35_spill] sm:$0xff] %v5618_v60  ;;  %v5620_v6 = vpop.f32.mrb[46].mxu1  ;;  %v1846_v60 = vmax.f32 %v1428_v7, -30.0  ;;  %4339 = vpow2.f32 %v2161_v33  ;;  %v1033_v18 = vadd.f32 %v5330_v44, %v5478_v11  ;;  %v1844_v1 = vmax.f32 %v1420_v5, -30.0 }
 0x153   :  { %6891 = vst [vmem:[#allocation34_spill] sm:$0xff] %v5616_v39  ;;  %6893 = vst [vmem:[#allocation36_spill] sm:$0xff] %v5620_v6  ;;  %v5622_v13 = vpop.eup %4313  ;;  %v5624_v16 = vpop.f32.mrb[47].mxu0  ;;  %v1943_v39 = vsub.f32 0.0, %v1743_v51  ;;  %v2045_v6 = vsub.f32 0.0, %v1845_v50  ;;  %4341 = vpow2.f32 %v2365_v3 }
 0x154   :  { %6894 = vst [vmem:[#allocation37_spill] sm:$0xff] %v5622_v13  ;;  %v4316_v9 = vpop.eup %4315  ;;  %v5626_v15 = vpop.f32.mrb[47].mxu1  ;;  %4343 = vrcp.f32 %v2538_v24  ;;  %v2046_v7 = vsub.f32 0.0, %v1846_v60  ;;  %v5653_v44 = vld [vmem:[%s6857_s2] ss:$0 sm:$0xff] }
 0x155   :  { %v5628_v29 = vpop.eup %4317  ;;  %v2638_v28 = vadd.f32 1.0, %v4316_v9  ;;  %v2167_v61 = vmul.f32 1.442695, %v1943_v39  ;;  %v5642_v33 = vpop.f32.mrb[48].mxu0  ;;  %4345 = vrcp.f32 %v2635_v34  ;;  %v2371_v9 = vmul.f32 1.442695, %v2045_v6 }
 0x156   :  { %6895 = vst [vmem:[#allocation38_spill] sm:$0xff] %v5628_v29  ;;  %v5630_v13 = vpop.eup %4319  ;;  %v5644_v50 = vpop.f32.mrb[48].mxu1  ;;  %4347 = vrcp.f32 %v2536_v30  ;;  %v2173_v39 = vmul.f32 1.442695, %v1946_v37  ;;  %v1441_v53 = vadd.f32 %v5653_v44, %v5472_v58  ;;  %v5661_v10 = vmul.f32 1.442695, %v2043_v38 }
 0x157   :  { %6896 = vst [vmem:[#allocation39_spill] sm:$0xff] %v5630_v13  ;;  %v5634_v25 = vpop.eup %4321  ;;  %v5646_v3 = vpop.f32.mrb[49].mxu0  ;;  %4349 = vrcp.f32 %v2638_v28  ;;  %v5663_v34 = vmul.f32 1.442695, %v1944_v0  ;;  %v1749_v29 = vmax.f32 %v1041_v2, -30.0  ;;  %v1044_v28 = vadd.f32 %v5653_v44, %v5484_v35 }
 0x158   :  { %6897 = vst [vmem:[#allocation40_spill] sm:$0xff] %v5634_v25  ;;  %v5636_v51 = vpop.eup %4323  ;;  %v5648_v23 = vpop.f32.mrb[49].mxu1  ;;  %4351 = vpow2.f32 %v2361_v14  ;;  %v1433_v14 = vadd.f32 %v5653_v44, %v5480_v12  ;;  %v1036_v2 = vadd.f32 %v5653_v44, %v5488_v45  ;;  %v1444_v35 = vadd.f32 %v5653_v44, %v5486_v36 }
 0x159   :  { %6898 = vst [vmem:[#allocation41_spill] sm:$0xff] %v5636_v51  ;;  %v4326_v32 = vpop.eup %4325  ;;  %6899 = vst [vmem:[#allocation42_spill] sm:$0xff] %v5648_v23  ;;  %v5657_v11 = vpop.f32.mrb[50].mxu0  ;;  %v1747_v51 = vmax.f32 %v1033_v18, -30.0  ;;  %4353 = vpow2.f32 %v2171_v31  ;;  %v1849_v23 = vmax.f32 %v1441_v53, -30.0  ;;  %v1949_v18 = vsub.f32 0.0, %v1749_v29 }
 0x15a   :  { %v4328_v24 = vpop.eup %4327  ;;  %6900 = vst [vmem:[#allocation43_spill] sm:$0xff] %v5657_v11  ;;  %v5659_v6 = vpop.f32.mrb[50].mxu1  ;;  %v2636_v25 = vadd.f32 1.0, %v4326_v32  ;;  %4355 = vpow2.f32 %v2167_v61  ;;  %v1436_v12 = vadd.f32 %v5653_v44, %v5490_v42  ;;  %v1748_v42 = vmax.f32 %v1036_v2, -30.0 }
 0x15b   :  { %6901 = vst [vmem:[#allocation44_spill] sm:$0xff] %v5659_v6  ;;  %v4330_v60 = vpop.eup %4329  ;;  %v5665_v30 = vpop.f32.mrb[51].mxu0  ;;  %v2541_v13 = vadd.f32 1.0, %v4328_v24  ;;  %v5671_v6 = vmul.f32 1.442695, %v2046_v7  ;;  %4357 = vpow2.f32 %v2371_v9  ;;  %v1947_v32 = vsub.f32 0.0, %v1747_v51 }
 0x15c   :  { %6902 = vst [vmem:[#allocation45_spill] sm:$0xff] %v5665_v30  ;;  %v5667_v37 = vpop.f32.mrb[51].mxu1  ;;  %v4332_v5 = vpop.eup %4331  ;;  %v2539_v0 = vadd.f32 1.0, %v4330_v60  ;;  %v2044_v30 = vsub.f32 0.0, %v1844_v1  ;;  %4359 = vrcp.f32 %v2636_v25  ;;  %v1750_v1 = vmax.f32 %v1044_v28, -30.0 }
 0x15d   :  { %6903 = vst [vmem:[#allocation46_spill] sm:$0xff] %v5667_v37  ;;  %v5669_v58 = vpop.eup %4333  ;;  %v2641_v11 = vadd.f32 1.0, %v4332_v5  ;;  %v5681_v7 = vpop.f32.mrb[52].mxu0  ;;  %4361 = vrcp.f32 %v2541_v13  ;;  %v2049_v51 = vsub.f32 0.0, %v1849_v23  ;;  %v1850_v23 = vmax.f32 %v1444_v35, -30.0 }
 0x15e   :  { %6904 = vst [vmem:[#allocation47_spill] sm:$0xff] %v5669_v58  ;;  %v4336_v38 = vpop.eup %4335  ;;  %v5683_v61 = vpop.f32.mrb[52].mxu1  ;;  %4363 = vrcp.f32 %v2539_v0  ;;  %v2369_v36 = vmul.f32 1.442695, %v2044_v30  ;;  %v2179_v30 = vmul.f32 1.442695, %v1949_v18 }
 0x15f   :  { %v4338_v37 = vpop.eup %4337  ;;  %6905 = vst [vmem:[#allocation48_spill] sm:$0xff] %v5683_v61  ;;  %v2542_v9 = vadd.f32 1.0, %v4336_v38  ;;  %v5687_v53 = vpop.f32.mrb[53].mxu0  ;;  %4365 = vrcp.f32 %v2641_v11  ;;  %v1847_v38 = vmax.f32 %v1433_v14, -30.0  ;;  %v1057_v11 = vadd.f32 %v5653_v44, %v5504_v17 }
 0x160   :  { %v4340_v31 = vpop.eup %4339  ;;  %v5689_v45 = vpop.f32.mrb[53].mxu1  ;;  %v2639_v25 = vadd.f32 1.0, %v4338_v37  ;;  %4367 = vpow2.f32 %v2173_v39  ;;  %v1950_v2 = vsub.f32 0.0, %v1750_v1  ;;  %v2379_v18 = vmul.f32 1.442695, %v2049_v51 }
 0x161   :  { %v4342_v24 = vpop.eup %4341  ;;  %6906 = vst [vmem:[#allocation49_spill] sm:$0xff] %v5689_v45  ;;  %v5693_v60 = vpop.f32.mrb[54].mxu0  ;;  %v2540_v28 = vadd.f32 1.0, %v4340_v31  ;;  %4369 = vrcp.f32 %v2542_v9  ;;  %v1049_v31 = vadd.f32 %v5653_v44, %v5510_v59  ;;  %v2047_v35 = vsub.f32 0.0, %v1847_v38 }
 0x162   :  { %v5691_v29 = vpop.eup %4343  ;;  %v5695_v5 = vpop.f32.mrb[54].mxu1  ;;  %v2642_v0 = vadd.f32 1.0, %v4342_v24  ;;  %4371 = vrcp.f32 %v2639_v25  ;;  %v1457_v24 = vadd.f32 %v5653_v44, %v5506_v63  ;;  %v1060_v17 = vadd.f32 %v5653_v44, %v5512_v40 }
 0x163   :  { %6907 = vst [vmem:[#allocation50_spill] sm:$0xff] %v5691_v29  ;;  %6908 = vst [vmem:[#allocation51_spill] sm:$0xff] %v5695_v5  ;;  %v5697_v13 = vpop.eup %4345  ;;  %v5699_v58 = vpop.f32.mrb[55].mxu0  ;;  %v2175_v29 = vmul.f32 1.442695, %v1947_v32  ;;  %v1848_v5 = vmax.f32 %v1436_v12, -30.0  ;;  %4373 = vrcp.f32 %v2540_v28  ;;  %v1449_v1 = vadd.f32 %v5653_v44, %v5520_v27 }
 0x164   :  { %6909 = vst [vmem:[#allocation52_spill] sm:$0xff] %v5697_v13  ;;  %v5701_v61 = vpop.f32.mrb[55].mxu1  ;;  %v5703_v45 = vpop.eup %4347  ;;  %4375 = vrcp.f32 %v2642_v0  ;;  %v2050_v32 = vsub.f32 0.0, %v1850_v23  ;;  %v1753_v28 = vmax.f32 %v1057_v11, -30.0  ;;  %v2181_v40 = vmul.f32 1.442695, %v1950_v2 }
 0x165   :  { %6910 = vst [vmem:[#allocation53_spill] sm:$0xff] %v5703_v45  ;;  %v5705_v37 = vpop.eup %4349  ;;  %v5717_v12 = vpop.f32.mrb[56].mxu0  ;;  %4377 = vpow2.f32 %v5661_v10  ;;  %v2048_v51 = vsub.f32 0.0, %v1848_v5  ;;  %v1751_v27 = vmax.f32 %v1049_v31, -30.0  ;;  %v1853_v23 = vmax.f32 %v1457_v24, -30.0 }
 0x166   :  { %6911 = vst [vmem:[#allocation54_spill] sm:$0xff] %v5705_v37  ;;  %v4352_v14 = vpop.eup %4351  ;;  %v1948_v37 = vsub.f32 0.0, %v1748_v42  ;;  %v5719_v59 = vpop.f32.mrb[56].mxu1  ;;  %4379 = vpow2.f32 %v5663_v34  ;;  %v5736_v10 = vmul.f32 1.442695, %v2047_v35  ;;  %v1052_v11 = vadd.f32 %v5653_v44, %v5522_v52 }
 0x167   :  { %v4354_v39 = vpop.eup %4353  ;;  %v2640_v63 = vadd.f32 1.0, %v4352_v14  ;;  %v5722_v38 = vpop.f32.mrb[57].mxu0  ;;  %4381 = vpow2.f32 %v5671_v6  ;;  %v5748_v31 = vmul.f32 1.442695, %v2050_v32  ;;  %v1754_v24 = vmax.f32 %v1060_v17, -30.0 }
 0x168   :  { %v4356_v9 = vpop.eup %4355  ;;  %v5724_v42 = vpop.f32.mrb[57].mxu1  ;;  %v5738_v5 = vmul.f32 1.442695, %v1948_v37  ;;  %4383 = vpow2.f32 %v2369_v36  ;;  %v5752_v6 = vmul.f32 1.442695, %v2048_v51  ;;  %v1953_v37 = vsub.f32 0.0, %v1753_v28 }
 0x169   :  { %v4358_v25 = vpop.eup %4357  ;;  %6912 = vst [vmem:[#allocation55_spill] sm:$0xff] %v5724_v42  ;;  %v5729_v45 = vpop.f32.mrb[58].mxu0  ;;  %4385 = vrcp.f32 %v2640_v63  ;;  %v1460_v52 = vadd.f32 %v5653_v44, %v5526_v43  ;;  %v2053_v42 = vsub.f32 0.0, %v1853_v23  ;;  %v2543_v36 = vadd.f32 1.0, %v4356_v9 }
 0x16a   :  { %v5726_v0 = vpop.eup %4359  ;;  %v5731_v13 = vpop.f32.mrb[58].mxu1  ;;  %4387 = vpow2.f32 %v2179_v30  ;;  %v1752_v32 = vmax.f32 %v1052_v11, -30.0  ;;  %v1452_v17 = vadd.f32 %v5653_v44, %v5532_v19  ;;  %v2645_v63 = vadd.f32 1.0, %v4358_v25 }
 0x16b   :  { %6913 = vst [vmem:[#allocation56_spill] sm:$0xff] %v5726_v0  ;;  %6914 = vst [vmem:[#allocation57_spill] sm:$0xff] %v5731_v13  ;;  %v5733_v14 = vpop.eup %4361  ;;  %v5742_v0 = vpop.f32.mrb[59].mxu0  ;;  %4389 = vpow2.f32 %v2175_v29  ;;  %v1954_v51 = vsub.f32 0.0, %v1754_v24  ;;  %v1854_v9 = vmax.f32 %v1460_v52, -30.0  ;;  %v1073_v29 = vadd.f32 %v5653_v44, %v5540_v8 }
 0x16c   :  { %6915 = vst [vmem:[#allocation58_spill] sm:$0xff] %v5733_v14  ;;  %6916 = vst [vmem:[#allocation59_spill] sm:$0xff] %v5742_v0  ;;  %v5744_v34 = vpop.f32.mrb[59].mxu1  ;;  %v5746_v2 = vpop.eup %4363  ;;  %v1851_v14 = vmax.f32 %v1449_v1, -30.0  ;;  %v2545_v0 = vadd.f32 1.0, %v4354_v39  ;;  %4391 = vpow2.f32 %v2379_v18  ;;  %v1065_v11 = vadd.f32 %v5653_v44, %v5544_v22 }
 0x16d   :  { %6917 = vst [vmem:[#allocation60_spill] sm:$0xff] %v5744_v34  ;;  %6918 = vst [vmem:[#allocation61_spill] sm:$0xff] %v5746_v2  ;;  %v5750_v13 = vpop.eup %4365  ;;  %v1951_v34 = vsub.f32 0.0, %v1751_v27  ;;  %v5762_v43 = vpop.f32.mrb[60].mxu0  ;;  %4393 = vpow2.f32 %v2181_v40  ;;  %v5776_v18 = vmul.f32 1.442695, %v1953_v37  ;;  %v1473_v22 = vadd.f32 %v5653_v44, %v5542_v47 }
 0x16e   :  { %6919 = vst [vmem:[#allocation62_spill] sm:$0xff] %v5750_v13  ;;  %v4368_v35 = vpop.eup %4367  ;;  %v2051_v28 = vsub.f32 0.0, %v1851_v14  ;;  %v5764_v39 = vpop.f32.mrb[60].mxu1  ;;  %4395 = vrcp.f32 %v2545_v0  ;;  %v5786_v8 = vmul.f32 1.442695, %v2053_v42  ;;  %v1757_v42 = vmax.f32 %v1073_v29, -30.0 }
 0x16f   :  { %v5756_v2 = vpop.eup %4369  ;;  %v2546_v27 = vadd.f32 1.0, %v4368_v35  ;;  %v5770_v23 = vpop.f32.mrb[61].mxu0  ;;  %v5778_v14 = vmul.f32 1.442695, %v1951_v34  ;;  %4397 = vrcp.f32 %v2543_v36  ;;  %v1952_v35 = vsub.f32 0.0, %v1752_v32 }
 0x170   :  { %6920 = vst [vmem:[#allocation63_spill] sm:$0xff] %v5756_v2  ;;  %v5760_v1 = vpop.eup %4371  ;;  %v5772_v19 = vpop.f32.mrb[61].mxu1  ;;  %v1852_v2 = vmax.f32 %v1452_v17, -30.0  ;;  %4399 = vrcp.f32 %v2645_v63  ;;  %v5792_v34 = vmul.f32 1.442695, %v1954_v51  ;;  %v2054_v36 = vsub.f32 0.0, %v1854_v9 }
 0x171   :  { %6921 = vst [vmem:[#allocation64_spill] sm:$0xff] %v5760_v1  ;;  %v5766_v30 = vpop.eup %4373  ;;  %v5782_v24 = vpop.f32.mrb[62].mxu0  ;;  %4401 = vrcp.f32 %v2546_v27  ;;  %v1076_v32 = vadd.f32 %v5653_v44, %v5548_v55  ;;  %v1465_v63 = vadd.f32 %v5653_v44, %v5546_v49  ;;  %v5806_v47 = vmul.f32 1.442695, %v1952_v35 }
 0x172   :  { %6922 = vst [vmem:[#allocation65_spill] sm:$0xff] %v5766_v30  ;;  %v5774_v25 = vpop.eup %4375  ;;  %v5784_v40 = vpop.f32.mrb[62].mxu1  ;;  %4403 = vpow2.f32 %v5736_v10  ;;  %v2052_v27 = vsub.f32 0.0, %v1852_v2  ;;  %v1857_v55 = vmax.f32 %v1473_v22, -30.0  ;;  %v1068_v10 = vadd.f32 %v5653_v44, %v5552_v46 }
 0x173   :  { %6923 = vst [vmem:[#allocation66_spill] sm:$0xff] %v5774_v25  ;;  %6924 = vst [vmem:[#allocation67_spill] sm:$0xff] %v5784_v40  ;;  %v4378_v52 = vpop.eup %4377  ;;  %v5788_v13 = vpop.f32.mrb[63].mxu0  ;;  %v5794_v25 = vmul.f32 1.442695, %v2051_v28  ;;  %4405 = vpow2.f32 %v5738_v5  ;;  %v1957_v5 = vsub.f32 0.0, %v1757_v42 }
 0x174   :  { %v5790_v0 = vpop.f32.mrb[63].mxu1  ;;  %v4380_v37 = vpop.eup %4379  ;;  %v2643_v1 = vadd.f32 1.0, %v4378_v52  ;;  %4407 = vpow2.f32 %v5748_v31  ;;  %v1758_v35 = vmax.f32 %v1076_v32, -30.0  ;;  %v1855_v22 = vmax.f32 %v1465_v63, -30.0 }
 0x175   :  { %6925 = vst [vmem:[#allocation68_spill] sm:$0xff] %v5790_v0  ;;  %v4382_v30 = vpop.eup %4381  ;;  %v1755_v0 = vmax.f32 %v1065_v11, -30.0  ;;  %v2544_v28 = vadd.f32 1.0, %v4380_v37  ;;  %v5811_v11 = vpop.f32.mrb[64].mxu0  ;;  %4409 = vpow2.f32 %v5752_v6  ;;  %v1476_v6 = vadd.f32 %v5653_v44, %v5554_v62 }
 0x176   :  { %v4384_v17 = vpop.eup %4383  ;;  %v2646_v29 = vadd.f32 1.0, %v4382_v30  ;;  %6927 = vst [vmem:[#allocation70_spill] sm:$0xff] %v5811_v11  ;;  %v5813_v52 = vpop.f32.mrb[64].mxu1  ;;  %4411 = vrcp.f32 %v2643_v1  ;;  %v5818_v30 = vmul.f32 1.442695, %v2054_v36  ;;  %v1756_v1 = vmax.f32 %v1068_v10, -30.0 }
 0x177   :  { %v5803_v51 = vpop.eup %4385  ;;  %6928 = vst [vmem:[#allocation71_spill] sm:$0xff] %v5813_v52  ;;  %v5816_v37 = vpop.f32.mrb[65].mxu0  ;;  %v1955_v31 = vsub.f32 0.0, %v1755_v0  ;;  %4413 = vrcp.f32 %v2544_v28  ;;  %v5822_v52 = vmul.f32 1.442695, %v2052_v27  ;;  %v2055_v62 = vsub.f32 0.0, %v1855_v22 }
 0x178   :  { %6926 = vst [vmem:[#allocation69_spill] sm:$0xff] %v5803_v51  ;;  %v4388_v9 = vpop.eup %4387  ;;  %v2644_v51 = vadd.f32 1.0, %v4384_v17  ;;  %v5820_v40 = vpop.f32.mrb[66].mxu0  ;;  %4415 = vrcp.f32 %v2646_v29  ;;  %v2057_v17 = vsub.f32 0.0, %v1857_v55  ;;  %v5830_v63 = vmul.f32 1.442695, %v1957_v5 }
 0x179   :  { %v4390_v49 = vpop.eup %4389  ;;  %6929 = vst [vmem:[#allocation72_spill] sm:$0xff] %v5820_v40  ;;  %v2549_v11 = vadd.f32 1.0, %v4388_v9  ;;  %v1958_v40 = vsub.f32 0.0, %v1758_v35  ;;  %v5832_v28 = vpop.f32.mrb[65].mxu1  ;;  %v1468_v29 = vadd.f32 %v5653_v44, %v5558_v21  ;;  %v1089_v5 = vadd.f32 %v5653_v44, %v5570_v41 }
 0x17a   :  { %v4392_v2 = vpop.eup %4391  ;;  %v2547_v32 = vadd.f32 1.0, %v4390_v49  ;;  %4417 = vrcp.f32 %v2644_v51  ;;  %v5839_v55 = vpop.f32.mrb[67].mxu0  ;;  %v5843_v51 = vmul.f32 1.442695, %v1955_v31  ;;  %v1858_v49 = vmax.f32 %v1476_v6, -30.0 }
 0x17b   :  { %v4394_v46 = vpop.eup %4393  ;;  %v2649_v0 = vadd.f32 1.0, %v4392_v2  ;;  %4419 = vpow2.f32 %v5776_v18  ;;  %v5847_v35 = vpop.f32.mrb[66].mxu1  ;;  %v5849_v18 = vmul.f32 1.442695, %v2057_v17  ;;  %v1956_v22 = vsub.f32 0.0, %v1756_v1 }
 0x17c   :  { %v5826_v42 = vpop.eup %4395  ;;  %v2550_v9 = vadd.f32 1.0, %v4394_v46  ;;  %4421 = vrcp.f32 %v2549_v11  ;;  %v1081_v21 = vadd.f32 %v5653_v44, %v5576_v56  ;;  %v5853_v46 = vpop.f32.mrb[67].mxu1  ;;  %v5855_v11 = vmul.f32 1.442695, %v1958_v40 }
 0x17d   :  { %6930 = vst [vmem:[#allocation73_spill] sm:$0xff] %v5826_v42  ;;  %v5828_v36 = vpop.eup %4397  ;;  %4423 = vrcp.f32 %v2547_v32  ;;  %v1489_v31 = vadd.f32 %v5653_v44, %v5572_v54  ;;  %v1092_v41 = vadd.f32 %v5653_v44, %v5582_v20  ;;  %v5861_v32 = vmul.f32 1.442695, %v2055_v62  ;;  %v6937_v42 = vld [vmem:[#allocation28_spill] sm:$0xff] }
 0x17e   :  { %6931 = vst [vmem:[#allocation74_spill] sm:$0xff] %v5828_v36  ;;  %v5834_v27 = vpop.eup %4399  ;;  %4425 = vrcp.f32 %v2649_v0  ;;  %v1856_v17 = vmax.f32 %v1468_v29, -30.0  ;;  %v1481_v56 = vadd.f32 %v5653_v44, %v5578_v4  ;;  %v2058_v0 = vsub.f32 0.0, %v1858_v49 }
 0x17f   :  { %6932 = vst [vmem:[#allocation75_spill] sm:$0xff] %v5834_v27  ;;  %v5841_v10 = vpop.eup %4401  ;;  %4427 = vrcp.f32 %v2550_v9  ;;  %v1761_v40 = vmax.f32 %v1089_v5, -30.0  ;;  %v1084_v27 = vadd.f32 %v5653_v44, %v5586_v26  ;;  %v5871_v20 = vmul.f32 1.442695, %v1956_v22  ;;  %v5878_v5 = vpop.f32.mrb[68].mxu0 }
 0x180   :  { %6933 = vst [vmem:[#allocation76_spill] sm:$0xff] %v5841_v10  ;;  %v4404_v2 = vpop.eup %4403  ;;  %4429 = vpow2.f32 %v5778_v14  ;;  %v1759_v9 = vmax.f32 %v1081_v21, -30.0  ;;  %v1492_v62 = vadd.f32 %v5653_v44, %v5588_v48  ;;  %v1861_v14 = vmax.f32 %v1489_v31, -30.0  ;;  %v5887_v48 = vpop.f32.mrb[68].mxu1 }
 0x181   :  { %v4406_v10 = vpop.eup %4405  ;;  %4431 = vpow2.f32 %v5786_v8  ;;  %v2647_v4 = vadd.f32 1.0, %v4404_v2  ;;  %v1762_v49 = vmax.f32 %v1092_v41, -30.0  ;;  %v2056_v8 = vsub.f32 0.0, %v1856_v17  ;;  %6939 = vst [vmem:[#allocation80_spill] sm:$0xff] %v5887_v48 }
 0x182   :  { %v4408_v6 = vpop.eup %4407  ;;  %4433 = vpow2.f32 %v5792_v34  ;;  %v1859_v22 = vmax.f32 %v1481_v56, -30.0  ;;  %v1484_v21 = vadd.f32 %v5653_v44, %v6937_v42  ;;  %v5892_v34 = vmul.f32 1.442695, %v2058_v0 }
 0x183   :  { %v4410_v1 = vpop.eup %4409  ;;  %4435 = vpow2.f32 %v5794_v25  ;;  %v1961_v31 = vsub.f32 0.0, %v1761_v40  ;;  %v1760_v41 = vmax.f32 %v1084_v27, -30.0  ;;  %v2548_v17 = vadd.f32 1.0, %v4406_v10 }
 0x184   :  { %v5868_v54 = vpop.eup %4411  ;;  %4437 = vpow2.f32 %v5806_v47  ;;  %v1959_v56 = vsub.f32 0.0, %v1759_v9  ;;  %v1862_v42 = vmax.f32 %v1492_v62, -30.0  ;;  %v2061_v48 = vsub.f32 0.0, %v1861_v14 }
 0x185   :  { %6934 = vst [vmem:[#allocation77_spill] sm:$0xff] %v5868_v54  ;;  %v5875_v29 = vpop.eup %4413  ;;  %v5885_v54 = vpop.f32.mrb[69].mxu0  ;;  %4439 = vpow2.f32 %v5818_v30  ;;  %v1962_v47 = vsub.f32 0.0, %v1762_v49  ;;  %v2648_v27 = vadd.f32 1.0, %v4410_v1  ;;  %v2059_v10 = vsub.f32 0.0, %v1859_v22 }
 0x186   :  { %6935 = vst [vmem:[#allocation78_spill] sm:$0xff] %v5875_v29  ;;  %v5880_v26 = vpop.eup %4415  ;;  %6938 = vst [vmem:[#allocation28_spill] sm:$0xff] %v5885_v54  ;;  %v5897_v29 = vpop.f32.mrb[69].mxu1  ;;  %4441 = vrcp.f32 %v2647_v4  ;;  %v5909_v62 = vmul.f32 1.442695, %v2056_v8  ;;  %v1960_v4 = vsub.f32 0.0, %v1760_v41  ;;  %v1105_v1 = vadd.f32 %v5653_v44, %v5604_v57 }
 0x187   :  { %6936 = vst [vmem:[#allocation79_spill] sm:$0xff] %v5880_v26  ;;  %v5889_v2 = vpop.eup %4417  ;;  %v5894_v26 = vpop.f32.mrb[70].mxu0  ;;  %6942 = vst [vmem:[#allocation83_spill] sm:$0xff] %v5897_v29  ;;  %4443 = vpow2.f32 %v5822_v52  ;;  %v5913_v14 = vmul.f32 1.442695, %v1961_v31  ;;  %v2062_v49 = vsub.f32 0.0, %v1862_v42 }
 0x188   :  { %6940 = vst [vmem:[#allocation81_spill] sm:$0xff] %v5889_v2  ;;  %6941 = vst [vmem:[#allocation82_spill] sm:$0xff] %v5894_v26  ;;  %v4420_v25 = vpop.eup %4419  ;;  %v2650_v2 = vadd.f32 1.0, %v4408_v6  ;;  %v5901_v0 = vpop.f32.mrb[71].mxu0  ;;  %v1860_v26 = vmax.f32 %v1484_v21, -30.0  ;;  %4445 = vpow2.f32 %v5830_v63  ;;  %v6949_v57 = vld [vmem:[#allocation30_spill] sm:$0xff] }
 0x189   :  { %v5899_v36 = vpop.eup %4421  ;;  %6944 = vst [vmem:[#allocation85_spill] sm:$0xff] %v5901_v0  ;;  %v2553_v9 = vadd.f32 1.0, %v4420_v25  ;;  %4447 = vrcp.f32 %v2548_v17  ;;  %v5917_v22 = vmul.f32 1.442695, %v1959_v56  ;;  %v5919_v21 = vmul.f32 1.442695, %v2061_v48 }
 0x18a   :  { %6943 = vst [vmem:[#allocation84_spill] sm:$0xff] %v5899_v36  ;;  %v5903_v40 = vpop.eup %4423  ;;  %4449 = vrcp.f32 %v2650_v2  ;;  %v6948_v25 = vld [vmem:[#allocation32_spill] sm:$0xff]  ;;  %v5923_v41 = vmul.f32 1.442695, %v1962_v47  ;;  %v5925_v17 = vmul.f32 1.442695, %v2059_v10  ;;  %v1505_v2 = vadd.f32 %v5653_v44, %v6949_v57 }
 0x18b   :  { %6945 = vst [vmem:[#allocation86_spill] sm:$0xff] %v5903_v40  ;;  %v5906_v30 = vpop.eup %4425  ;;  %v1097_v63 = vadd.f32 %v5653_v44, %v6948_v25  ;;  %4451 = vrcp.f32 %v2648_v27  ;;  %v2060_v31 = vsub.f32 0.0, %v1860_v26  ;;  %v6950_v56 = vld [vmem:[#allocation35_spill] sm:$0xff]  ;;  %v5936_v47 = vmul.f32 1.442695, %v2062_v49 }
 0x18c   :  { %6946 = vst [vmem:[#allocation87_spill] sm:$0xff] %v5906_v30  ;;  %v5911_v6 = vpop.eup %4427  ;;  %4453 = vrcp.f32 %v2553_v9  ;;  %v1108_v48 = vadd.f32 %v5653_v44, %v6950_v56  ;;  %v5933_v30 = vpop.f32.mrb[70].mxu1  ;;  %v1765_v27 = vmax.f32 %v1105_v1, -30.0 }
 0x18d   :  { %6947 = vst [vmem:[#allocation88_spill] sm:$0xff] %v5911_v6  ;;  %v4430_v52 = vpop.eup %4429  ;;  %v5927_v6 = vmul.f32 1.442695, %v1960_v4  ;;  %6951 = vst [vmem:[#allocation32_spill] sm:$0xff] %v5933_v30  ;;  %4455 = vpow2.f32 %v5843_v51  ;;  %v1763_v9 = vmax.f32 %v1097_v63, -30.0  ;;  %v6952_v4 = vld [vmem:[#allocation33_spill] sm:$0xff]  ;;  %v1100_v51 = vadd.f32 %v5653_v44, %v5624_v16 }
 0x18e   :  { %v4432_v8 = vpop.eup %4431  ;;  %v2551_v36 = vadd.f32 1.0, %v4430_v52  ;;  %4457 = vpow2.f32 %v5849_v18  ;;  %v1497_v57 = vadd.f32 %v5653_v44, %v6952_v4  ;;  %v5941_v40 = vpop.f32.mrb[71].mxu1  ;;  %v5944_v52 = vmul.f32 1.442695, %v2060_v31  ;;  %v6955_v30 = vld [vmem:[#allocation36_spill] sm:$0xff] }
 0x18f   :  { %v4434_v42 = vpop.eup %4433  ;;  %v2653_v10 = vadd.f32 1.0, %v4432_v8  ;;  %6953 = vst [vmem:[#allocation30_spill] sm:$0xff] %v5941_v40  ;;  %4459 = vpow2.f32 %v5855_v11  ;;  %v1865_v18 = vmax.f32 %v1505_v2, -30.0  ;;  %v1766_v63 = vmax.f32 %v1108_v48, -30.0 }
 0x190   :  { %v4436_v25 = vpop.eup %4435  ;;  %v2554_v0 = vadd.f32 1.0, %v4434_v42  ;;  %4461 = vpow2.f32 %v5861_v32  ;;  %v1965_v40 = vsub.f32 0.0, %v1765_v27  ;;  %v1508_v42 = vadd.f32 %v5653_v44, %v6955_v30 }
 0x191   :  { %v4438_v26 = vpop.eup %4437  ;;  %v2651_v1 = vadd.f32 1.0, %v4436_v25  ;;  %4463 = vrcp.f32 %v2551_v36  ;;  %v1963_v29 = vsub.f32 0.0, %v1763_v9  ;;  %v1863_v54 = vmax.f32 %v1497_v57, -30.0 }
 0x192   :  { %v4440_v56 = vpop.eup %4439  ;;  %v2552_v4 = vadd.f32 1.0, %v4438_v26  ;;  %4465 = vrcp.f32 %v2653_v10  ;;  %v1764_v25 = vmax.f32 %v1100_v51, -30.0  ;;  %v1500_v32 = vadd.f32 %v5653_v44, %v5626_v15 }
 0x193   :  { %v5948_v49 = vpop.eup %4441  ;;  %v2654_v31 = vadd.f32 1.0, %v4440_v56  ;;  %4467 = vrcp.f32 %v2554_v0  ;;  %v1121_v36 = vadd.f32 %v5653_v44, %v5642_v33  ;;  %v2065_v30 = vsub.f32 0.0, %v1865_v18 }
 0x194   :  { %6954 = vst [vmem:[#allocation35_spill] sm:$0xff] %v5948_v49  ;;  %v4444_v8 = vpop.eup %4443  ;;  %4469 = vrcp.f32 %v2651_v1  ;;  %v1113_v27 = vadd.f32 %v5653_v44, %v5646_v3  ;;  %v1966_v0 = vsub.f32 0.0, %v1766_v63  ;;  %v1866_v9 = vmax.f32 %v1508_v42, -30.0 }
 0x195   :  { %v4446_v11 = vpop.eup %4445  ;;  %v2652_v48 = vadd.f32 1.0, %v4444_v8  ;;  %4471 = vrcp.f32 %v2552_v4  ;;  %v5967_v15 = vmul.f32 1.442695, %v1965_v40  ;;  %v5969_v33 = vmul.f32 1.442695, %v1963_v29  ;;  %v5972_v8 = vpop.f32.mrb[72].mxu0 }
 0x196   :  { %v5953_v16 = vpop.eup %4447  ;;  %v2557_v10 = vadd.f32 1.0, %v4446_v11  ;;  %4473 = vrcp.f32 %v2654_v31  ;;  %v2063_v56 = vsub.f32 0.0, %v1863_v54  ;;  %v1964_v1 = vsub.f32 0.0, %v1764_v25  ;;  %v5978_v11 = vpop.f32.mrb[73].mxu0  ;;  %v6960_v31 = vld [vmem:[#allocation43_spill] sm:$0xff] }
 0x197   :  { %6956 = vst [vmem:[#allocation33_spill] sm:$0xff] %v5953_v16  ;;  %v5959_v2 = vpop.eup %4449  ;;  %4475 = vpow2.f32 %v5871_v20  ;;  %v1864_v18 = vmax.f32 %v1500_v32, -30.0  ;;  %v1769_v3 = vmax.f32 %v1121_v36, -30.0  ;;  %v5974_v63 = vmul.f32 1.442695, %v2065_v30  ;;  %v5980_v29 = vpop.f32.mrb[72].mxu1 }
 0x198   :  { %6957 = vst [vmem:[#allocation36_spill] sm:$0xff] %v5959_v2  ;;  %v5963_v26 = vpop.eup %4451  ;;  %4477 = vrcp.f32 %v2652_v48  ;;  %v1767_v42 = vmax.f32 %v1113_v27, -30.0  ;;  %v1521_v40 = vadd.f32 %v5653_v44, %v5644_v50  ;;  %v2066_v20 = vsub.f32 0.0, %v1866_v9  ;;  %v6961_v32 = vld [vmem:[#allocation42_spill] sm:$0xff]  ;;  %v5986_v48 = vpop.f32.mrb[74].mxu0  ;;  %v6963_v2 = vld [vmem:[#allocation45_spill] sm:$0xff] }
 0x199   :  { %6958 = vst [vmem:[#allocation89_spill] sm:$0xff] %v5963_v26  ;;  %v5965_v57 = vpop.eup %4453  ;;  %4479 = vrcp.f32 %v2557_v10  ;;  %v1124_v25 = vadd.f32 %v5653_v44, %v6960_v31  ;;  %v1513_v36 = vadd.f32 %v5653_v44, %v6961_v32  ;;  %v5988_v30 = vpop.f32.mrb[73].mxu1  ;;  %v5991_v50 = vmul.f32 1.442695, %v1966_v0 }
 0x19a   :  { %6959 = vst [vmem:[#allocation90_spill] sm:$0xff] %v5965_v57  ;;  %v4456_v51 = vpop.eup %4455  ;;  %6962 = vst [vmem:[#allocation43_spill] sm:$0xff] %v5988_v30  ;;  %4481 = vpow2.f32 %v5892_v34  ;;  %v5993_v57 = vmul.f32 1.442695, %v2063_v56  ;;  %v1116_v10 = vadd.f32 %v5653_v44, %v6963_v2  ;;  %v5997_v9 = vpop.f32.mrb[75].mxu0  ;;  %v2064_v26 = vsub.f32 0.0, %v1864_v18 }
 0x19b   :  { %v4458_v4 = vpop.eup %4457  ;;  %6964 = vst [vmem:[#allocation42_spill] sm:$0xff] %v5997_v9  ;;  %4483 = vpow2.f32 %v5909_v62  ;;  %v6002_v32 = vmul.f32 1.442695, %v1964_v1  ;;  %v1969_v16 = vsub.f32 0.0, %v1769_v3  ;;  %v2555_v34 = vadd.f32 1.0, %v4456_v51  ;;  %v6012_v62 = vpop.f32.mrb[74].mxu1 }
 0x19c   :  { %v4460_v54 = vpop.eup %4459  ;;  %4485 = vpow2.f32 %v5913_v14  ;;  %v1967_v0 = vsub.f32 0.0, %v1767_v42  ;;  %v1869_v56 = vmax.f32 %v1521_v40, -30.0  ;;  %v6010_v2 = vmul.f32 1.442695, %v2066_v20  ;;  %v6969_v51 = vld [vmem:[#allocation44_spill] sm:$0xff]  ;;  %v6970_v3 = vld [vmem:[#allocation46_spill] sm:$0xff] }
 0x19d   :  { %v4462_v27 = vpop.eup %4461  ;;  %4487 = vpow2.f32 %v5917_v22  ;;  %v1867_v9 = vmax.f32 %v1513_v36, -30.0  ;;  %v1768_v18 = vmax.f32 %v1116_v10, -30.0  ;;  %v1524_v14 = vadd.f32 %v5653_v44, %v6969_v51 }
 0x19e   :  { %v5999_v31 = vpop.eup %4463  ;;  %4489 = vpow2.f32 %v5919_v21  ;;  %v1516_v42 = vadd.f32 %v5653_v44, %v6970_v3  ;;  %v6024_v22 = vmul.f32 1.442695, %v2064_v26  ;;  %v6026_v20 = vmul.f32 1.442695, %v1969_v16 }
 0x19f   :  { %6965 = vst [vmem:[#allocation45_spill] sm:$0xff] %v5999_v31  ;;  %v6004_v49 = vpop.eup %4465  ;;  %v1770_v31 = vmax.f32 %v1124_v25, -30.0  ;;  %4491 = vpow2.f32 %v5923_v41  ;;  %v6028_v25 = vpop.f32.mrb[75].mxu1  ;;  %v2657_v21 = vadd.f32 1.0, %v4458_v4  ;;  %v6032_v10 = vmul.f32 1.442695, %v1967_v0 }
 0x1a0   :  { %6966 = vst [vmem:[#allocation91_spill] sm:$0xff] %v6004_v49  ;;  %v6007_v30 = vpop.eup %4467  ;;  %6972 = vst [vmem:[#allocation46_spill] sm:$0xff] %v6028_v25  ;;  %4493 = vrcp.f32 %v2555_v34  ;;  %v2069_v51 = vsub.f32 0.0, %v1869_v56  ;;  %v2558_v49 = vadd.f32 1.0, %v4460_v54  ;;  %v1968_v16 = vsub.f32 0.0, %v1768_v18 }
 0x1a1   :  { %6967 = vst [vmem:[#allocation92_spill] sm:$0xff] %v6007_v30  ;;  %v6014_v1 = vpop.eup %4469  ;;  %4495 = vpow2.f32 %v5925_v17  ;;  %v1970_v3 = vsub.f32 0.0, %v1770_v31  ;;  %v1870_v26 = vmax.f32 %v1524_v14, -30.0  ;;  %v2655_v34 = vadd.f32 1.0, %v4462_v27 }
 0x1a2   :  { %6968 = vst [vmem:[#allocation93_spill] sm:$0xff] %v6014_v1  ;;  %v6021_v40 = vpop.eup %4471  ;;  %4497 = vpow2.f32 %v5927_v6  ;;  %v1868_v1 = vmax.f32 %v1516_v42, -30.0  ;;  %v1137_v4 = vadd.f32 %v5653_v44, %v5681_v7  ;;  %v1129_v17 = vadd.f32 %v5653_v44, %v5687_v53  ;;  %v6976_v6 = vld [vmem:[#allocation48_spill] sm:$0xff] }
 0x1a3   :  { %6971 = vst [vmem:[#allocation44_spill] sm:$0xff] %v6021_v40  ;;  %v6030_v36 = vpop.eup %4473  ;;  %v2067_v40 = vsub.f32 0.0, %v1867_v9  ;;  %4499 = vpow2.f32 %v5936_v47  ;;  %v6045_v31 = vmul.f32 1.442695, %v2069_v51  ;;  %v1537_v0 = vadd.f32 %v5653_v44, %v6976_v6 }
 0x1a4   :  { %6973 = vst [vmem:[#allocation94_spill] sm:$0xff] %v6030_v36  ;;  %v4476_v30 = vpop.eup %4475  ;;  %4501 = vrcp.f32 %v2657_v21  ;;  %v6049_v18 = vmul.f32 1.442695, %v1970_v3  ;;  %v1140_v7 = vadd.f32 %v5653_v44, %v5693_v60  ;;  %v6056_v53 = vmul.f32 1.442695, %v1968_v16 }
 0x1a5   :  { %v6035_v41 = vpop.eup %4477  ;;  %v2556_v9 = vadd.f32 1.0, %v4476_v30  ;;  %4503 = vrcp.f32 %v2558_v49  ;;  %v6051_v27 = vmul.f32 1.442695, %v2067_v40  ;;  %v2070_v30 = vsub.f32 0.0, %v1870_v26 }
 0x1a6   :  { %6974 = vst [vmem:[#allocation95_spill] sm:$0xff] %v6035_v41  ;;  %v6038_v25 = vpop.eup %4479  ;;  %4505 = vpow2.f32 %v5944_v52  ;;  %v2068_v14 = vsub.f32 0.0, %v1868_v1  ;;  %v1773_v51 = vmax.f32 %v1137_v4, -30.0  ;;  %v1771_v6 = vmax.f32 %v1129_v17, -30.0  ;;  %v6070_v17 = vpop.f32.mrb[76].mxu0 }
 0x1a7   :  { %6975 = vst [vmem:[#allocation96_spill] sm:$0xff] %v6038_v25  ;;  %v4482_v54 = vpop.eup %4481  ;;  %4507 = vrcp.f32 %v2655_v34  ;;  %v1873_v40 = vmax.f32 %v1537_v0, -30.0  ;;  %v6977_v25 = vld [vmem:[#allocation49_spill] sm:$0xff]  ;;  %v1774_v52 = vmax.f32 %v1140_v7, -30.0  ;;  %v1132_v1 = vadd.f32 %v5653_v44, %v5699_v58  ;;  %v6072_v0 = vpop.f32.mrb[77].mxu0 }
 0x1a8   :  { %v4484_v56 = vpop.eup %4483  ;;  %v2658_v21 = vadd.f32 1.0, %v4482_v54  ;;  %4509 = vrcp.f32 %v2556_v9  ;;  %v1529_v36 = vadd.f32 %v5653_v44, %v6977_v25  ;;  %v6066_v34 = vmul.f32 1.442695, %v2070_v30  ;;  %6979 = vst [vmem:[#allocation49_spill] sm:$0xff] %v6072_v0  ;;  %v6076_v30 = vpop.f32.mrb[78].mxu0 }
 0x1a9   :  { %v4486_v47 = vpop.eup %4485  ;;  %v2656_v3 = vadd.f32 1.0, %v4484_v56  ;;  %4511 = vpow2.f32 %v5967_v15  ;;  %v6068_v4 = vmul.f32 1.442695, %v2068_v14  ;;  %v1973_v9 = vsub.f32 0.0, %v1773_v51  ;;  %v6074_v56 = vpop.f32.mrb[76].mxu1 }
 0x1aa   :  { %v4488_v42 = vpop.eup %4487  ;;  %v2561_v41 = vadd.f32 1.0, %v4486_v47  ;;  %4513 = vpow2.f32 %v5969_v33  ;;  %v1971_v15 = vsub.f32 0.0, %v1771_v6  ;;  %v2073_v47 = vsub.f32 0.0, %v1873_v40  ;;  %v6078_v14 = vpop.f32.mrb[77].mxu1 }
 0x1ab   :  { %v4490_v49 = vpop.eup %4489  ;;  %v2559_v26 = vadd.f32 1.0, %v4488_v42  ;;  %4515 = vrcp.f32 %v2658_v21  ;;  %v1871_v33 = vmax.f32 %v1529_v36, -30.0  ;;  %6980 = vst [vmem:[#allocation97_spill] sm:$0xff] %v6078_v14  ;;  %v1772_v21 = vmax.f32 %v1132_v1, -30.0  ;;  %v6082_v6 = vpop.f32.mrb[79].mxu0 }
 0x1ac   :  { %v4492_v60 = vpop.eup %4491  ;;  %v2661_v54 = vadd.f32 1.0, %v4490_v49  ;;  %4517 = vrcp.f32 %v2656_v3  ;;  %v6981_v49 = vld [vmem:[#allocation51_spill] sm:$0xff]  ;;  %v1532_v36 = vadd.f32 %v5653_v44, %v5701_v61  ;;  %v1153_v40 = vadd.f32 %v5653_v44, %v5717_v12 }
 0x1ad   :  { %v6063_v16 = vpop.eup %4493  ;;  %v2562_v7 = vadd.f32 1.0, %v4492_v60  ;;  %4519 = vrcp.f32 %v2561_v41  ;;  %v1540_v51 = vadd.f32 %v5653_v44, %v6981_v49  ;;  %6982 = vst [vmem:[#allocation51_spill] sm:$0xff] %v6082_v6  ;;  %v6090_v60 = vpop.f32.mrb[78].mxu1  ;;  %v6094_v1 = vmul.f32 1.442695, %v1973_v9 }
 0x1ae   :  { %6978 = vst [vmem:[#allocation48_spill] sm:$0xff] %v6063_v16  ;;  %v4496_v25 = vpop.eup %4495  ;;  %v1974_v16 = vsub.f32 0.0, %v1774_v52  ;;  %4521 = vrcp.f32 %v2559_v26  ;;  %v6096_v49 = vmul.f32 1.442695, %v1971_v15  ;;  %v6098_v6 = vpop.f32.mrb[79].mxu1  ;;  %v2071_v61 = vsub.f32 0.0, %v1871_v33 }
 0x1af   :  { %v4498_v58 = vpop.eup %4497  ;;  %v2659_v3 = vadd.f32 1.0, %v4496_v25  ;;  %4523 = vrcp.f32 %v2661_v54  ;;  %6985 = vst [vmem:[#allocation100_spill] sm:$0xff] %v6098_v6  ;;  %v1874_v54 = vmax.f32 %v1540_v51, -30.0  ;;  %v1145_v9 = vadd.f32 %v5653_v44, %v5722_v38  ;;  %v6114_v33 = vld [vmem:[%s6857_s2] ss:$0 sm:$0xff] }
 0x1b0   :  { %v4500_v42 = vpop.eup %4499  ;;  %v2560_v52 = vadd.f32 1.0, %v4498_v58  ;;  %4525 = vrcp.f32 %v2562_v7  ;;  %v6105_v12 = vmul.f32 1.442695, %v1974_v16  ;;  %v1972_v58 = vsub.f32 0.0, %v1772_v21  ;;  %v6988_v21 = vld [vmem:[#allocation55_spill] sm:$0xff] }
 0x1b1   :  { %v6084_v0 = vpop.eup %4501  ;;  %v2662_v25 = vadd.f32 1.0, %v4500_v42  ;;  %4527 = vpow2.f32 %v5974_v63  ;;  %v1777_v7 = vmax.f32 %v1153_v40, -30.0  ;;  %v1553_v63 = vadd.f32 %v6114_v33, %v5719_v59  ;;  %v6126_v40 = vpop.f32.mrb[80].mxu0 }
 0x1b2   :  { %6983 = vst [vmem:[#allocation98_spill] sm:$0xff] %v6084_v0  ;;  %v6092_v41 = vpop.eup %4503  ;;  %v6100_v0 = vmul.f32 1.442695, %v2073_v47  ;;  %4529 = vrcp.f32 %v2659_v3  ;;  %v1156_v44 = vadd.f32 %v6114_v33, %v5729_v45  ;;  %v6120_v16 = vmul.f32 1.442695, %v2071_v61  ;;  %v6989_v3 = vld [vmem:[#allocation59_spill] sm:$0xff] }
 0x1b3   :  { %6984 = vst [vmem:[#allocation99_spill] sm:$0xff] %v6092_v41  ;;  %v4506_v26 = vpop.eup %4505  ;;  %v1872_v41 = vmax.f32 %v1532_v36, -30.0  ;;  %4531 = vrcp.f32 %v2560_v52  ;;  %v1545_v51 = vadd.f32 %v6114_v33, %v6988_v21  ;;  %v1148_v36 = vadd.f32 %v6114_v33, %v6989_v3  ;;  %6990 = vst [vmem:[#allocation55_spill] sm:$0xff] %v6126_v40  ;;  %v6135_v61 = vpop.f32.mrb[80].mxu1  ;;  %v6996_v40 = vld [vmem:[#allocation60_spill] sm:$0xff] }
 0x1b4   :  { %v6102_v14 = vpop.eup %4507  ;;  %v2660_v47 = vadd.f32 1.0, %v4506_v26  ;;  %4533 = vrcp.f32 %v2662_v25  ;;  %v2074_v59 = vsub.f32 0.0, %v1874_v54  ;;  %v1775_v26 = vmax.f32 %v1145_v9, -30.0  ;;  %v6133_v25 = vpop.f32.mrb[81].mxu0  ;;  %6994 = vst [vmem:[#allocation103_spill] sm:$0xff] %v6135_v61 }
 0x1b5   :  { %6986 = vst [vmem:[#allocation101_spill] sm:$0xff] %v6102_v14  ;;  %v6109_v15 = vpop.eup %4509  ;;  %4535 = vpow2.f32 %v5993_v57  ;;  %v6140_v21 = vmul.f32 1.442695, %v1972_v58  ;;  %v2072_v3 = vsub.f32 0.0, %v1872_v41  ;;  %v6144_v57 = vpop.f32.mrb[82].mxu0  ;;  %v1977_v9 = vsub.f32 0.0, %v1777_v7 }
 0x1b6   :  { %6987 = vst [vmem:[#allocation102_spill] sm:$0xff] %v6109_v15  ;;  %v4512_v42 = vpop.eup %4511  ;;  %v6992_v15 = vld [vmem:[#allocation57_spill] sm:$0xff]  ;;  %4537 = vpow2.f32 %v6002_v32  ;;  %6997 = vst [vmem:[#allocation60_spill] sm:$0xff] %v6144_v57  ;;  %v1875_v32 = vmax.f32 %v1545_v51, -30.0  ;;  %v1776_v58 = vmax.f32 %v1148_v36, -30.0 }
 0x1b7   :  { %v4514_v38 = vpop.eup %4513  ;;  %v1556_v45 = vadd.f32 %v6114_v33, %v6992_v15  ;;  %6993 = vst [vmem:[#allocation57_spill] sm:$0xff] %v6133_v25  ;;  %4539 = vrcp.f32 %v2660_v47  ;;  %v1877_v15 = vmax.f32 %v1553_v63, -30.0  ;;  %v1778_v25 = vmax.f32 %v1156_v44, -30.0 }
 0x1b8   :  { %v6128_v52 = vpop.eup %4515  ;;  %v2565_v61 = vadd.f32 1.0, %v4512_v42  ;;  %4541 = vpow2.f32 %v6024_v22  ;;  %v6154_v41 = vmul.f32 1.442695, %v2074_v59  ;;  %v2563_v47 = vadd.f32 1.0, %v4514_v38 }
 0x1b9   :  { %6991 = vst [vmem:[#allocation59_spill] sm:$0xff] %v6128_v52  ;;  %v6137_v14 = vpop.eup %4517  ;;  %v1548_v52 = vadd.f32 %v6114_v33, %v6996_v40  ;;  %4543 = vpow2.f32 %v6026_v20  ;;  %v1975_v40 = vsub.f32 0.0, %v1775_v26  ;;  %v1878_v57 = vmax.f32 %v1556_v45, -30.0 }
 0x1ba   :  { %6995 = vst [vmem:[#allocation104_spill] sm:$0xff] %v6137_v14  ;;  %v6146_v54 = vpop.eup %4519  ;;  %4545 = vpow2.f32 %v6032_v10  ;;  %v6161_v42 = vmul.f32 1.442695, %v2072_v3  ;;  %v2077_v44 = vsub.f32 0.0, %v1877_v15  ;;  %v1978_v51 = vsub.f32 0.0, %v1778_v25 }
 0x1bb   :  { %6998 = vst [vmem:[#allocation105_spill] sm:$0xff] %v6146_v54  ;;  %v6148_v6 = vpop.eup %4521  ;;  %v6156_v54 = vpop.f32.mrb[81].mxu1  ;;  %v1876_v22 = vmax.f32 %v1548_v52, -30.0  ;;  %4547 = vpow2.f32 %v6045_v31  ;;  %v1169_v20 = vadd.f32 %v6114_v33, %v5762_v43  ;;  %v6168_v59 = vmul.f32 1.442695, %v1977_v9 }
 0x1bc   :  { %6999 = vst [vmem:[#allocation106_spill] sm:$0xff] %v6148_v6  ;;  %v6151_v14 = vpop.eup %4523  ;;  %4549 = vrcp.f32 %v2565_v61  ;;  %v2075_v26 = vsub.f32 0.0, %v1875_v32  ;;  %v1976_v38 = vsub.f32 0.0, %v1776_v58  ;;  %v6173_v10 = vmul.f32 1.442695, %v1975_v40 }
 0x1bd   :  { %7000 = vst [vmem:[#allocation107_spill] sm:$0xff] %v6151_v14  ;;  %v6158_v7 = vpop.eup %4525  ;;  %4551 = vpow2.f32 %v6049_v18  ;;  %v2078_v52 = vsub.f32 0.0, %v1878_v57  ;;  %v1161_v31 = vadd.f32 %v6114_v33, %v5770_v23  ;;  %v2076_v3 = vsub.f32 0.0, %v1876_v22  ;;  %v6186_v57 = vpop.f32.mrb[83].mxu0 }
 0x1be   :  { %7001 = vst [vmem:[#allocation108_spill] sm:$0xff] %v6158_v7  ;;  %v4528_v63 = vpop.eup %4527  ;;  %4553 = vrcp.f32 %v2563_v47  ;;  %v1569_v61 = vadd.f32 %v6114_v33, %v5764_v39  ;;  %v6182_v15 = vmul.f32 1.442695, %v2077_v44  ;;  %v6184_v18 = vmul.f32 1.442695, %v1978_v51  ;;  %v6200_v44 = vpop.f32.mrb[82].mxu1 }
 0x1bf   :  { %v6166_v36 = vpop.eup %4529  ;;  %v2665_v43 = vadd.f32 1.0, %v4528_v63  ;;  %4555 = vpow2.f32 %v5991_v50  ;;  %v1781_v32 = vmax.f32 %v1169_v20, -30.0  ;;  %v6189_v23 = vmul.f32 1.442695, %v2075_v26 }
 0x1c0   :  { %7002 = vst [vmem:[#allocation109_spill] sm:$0xff] %v6166_v36  ;;  %v6170_v45 = vpop.eup %4531  ;;  %4557 = vpow2.f32 %v6066_v34  ;;  %v6191_v40 = vmul.f32 1.442695, %v1976_v38  ;;  %v1172_v39 = vadd.f32 %v6114_v33, %v5782_v24  ;;  %v6198_v22 = vmul.f32 1.442695, %v2078_v52  ;;  %v6206_v38 = vpop.f32.mrb[83].mxu1 }
 0x1c1   :  { %7003 = vst [vmem:[#allocation110_spill] sm:$0xff] %v6170_v45  ;;  %v6177_v25 = vpop.eup %4533  ;;  %4559 = vpow2.f32 %v6010_v2  ;;  %v1779_v63 = vmax.f32 %v1161_v31, -30.0  ;;  %v6202_v34 = vmul.f32 1.442695, %v2076_v3  ;;  %v1881_v20 = vmax.f32 %v1569_v61, -30.0  ;;  %v7006_v3 = vld [vmem:[#allocation67_spill] sm:$0xff] }
 0x1c2   :  { %7004 = vst [vmem:[#allocation111_spill] sm:$0xff] %v6177_v25  ;;  %v4536_v9 = vpop.eup %4535  ;;  %4561 = vrcp.f32 %v2665_v43  ;;  %v1561_v26 = vadd.f32 %v6114_v33, %v5772_v19  ;;  %v1981_v2 = vsub.f32 0.0, %v1781_v32  ;;  %v1164_v52 = vadd.f32 %v6114_v33, %v5788_v13 }
 0x1c3   :  { %v4538_v58 = vpop.eup %4537  ;;  %v2663_v50 = vadd.f32 1.0, %v4536_v9  ;;  %4563 = vpow2.f32 %v6051_v27  ;;  %v1782_v43 = vmax.f32 %v1172_v39, -30.0  ;;  %v1572_v61 = vadd.f32 %v6114_v33, %v7006_v3  ;;  %v6220_v3 = vpop.f32.mrb[84].mxu0 }
 0x1c4   :  { %v6195_v47 = vpop.eup %4539  ;;  %v2564_v25 = vadd.f32 1.0, %v4538_v58  ;;  %4565 = vpow2.f32 %v6056_v53  ;;  %v1979_v14 = vsub.f32 0.0, %v1779_v63  ;;  %v2081_v13 = vsub.f32 0.0, %v1881_v20 }
 0x1c5   :  { %7005 = vst [vmem:[#allocation112_spill] sm:$0xff] %v6195_v47  ;;  %v4542_v51 = vpop.eup %4541  ;;  %4567 = vrcp.f32 %v2663_v50  ;;  %v7007_v47 = vld [vmem:[#allocation68_spill] sm:$0xff]  ;;  %v1879_v45 = vmax.f32 %v1561_v26, -30.0  ;;  %v6218_v39 = vmul.f32 1.442695, %v1981_v2  ;;  %v1780_v36 = vmax.f32 %v1164_v52, -30.0 }
 0x1c6   :  { %v4544_v24 = vpop.eup %4543  ;;  %v2664_v19 = vadd.f32 1.0, %v4542_v51  ;;  %v1564_v58 = vadd.f32 %v6114_v33, %v7007_v47  ;;  %v1882_v51 = vmax.f32 %v1572_v61, -30.0  ;;  %v7010_v47 = vld [vmem:[#allocation70_spill] sm:$0xff]  ;;  %v1177_v2 = vadd.f32 %v6114_v33, %v5816_v37 }
 0x1c7   :  { %v4546_v31 = vpop.eup %4545  ;;  %v2569_v9 = vadd.f32 1.0, %v4544_v24  ;;  %v6246_v37 = vmul.f32 1.442695, %v1979_v14 }
 0x1c8   :  { %v4548_v7 = vpop.eup %4547  ;;  %v2567_v53 = vadd.f32 1.0, %v4546_v31  ;;  %v1880_v26 = vmax.f32 %v1564_v58, -30.0  ;;  %v1980_v58 = vsub.f32 0.0, %v1780_v36  ;;  %v1783_v14 = vmax.f32 %v1177_v2, -30.0 }
 0x1c9   :  { %v6216_v27 = vpop.eup %4549  ;;  %4569 = vrcp.f32 %v2569_v9  ;;  %v2669_v32 = vadd.f32 1.0, %v4548_v7  ;;  %v6226_v9 = vpop.f32.mrb[85].mxu0 }
 0x1ca   :  { %7008 = vst [vmem:[#allocation67_spill] sm:$0xff] %v6216_v27  ;;  %v4552_v24 = vpop.eup %4551  ;;  %4571 = vrcp.f32 %v2564_v25  ;;  %v1185_v27 = vadd.f32 %v6114_v33, %v7010_v47  ;;  %v6228_v7 = vpop.f32.mrb[84].mxu1  ;;  %v1982_v25 = vsub.f32 0.0, %v1782_v43 }
 0x1cb   :  { %v6222_v50 = vpop.eup %4553  ;;  %4573 = vrcp.f32 %v2669_v32  ;;  %v2570_v63 = vadd.f32 1.0, %v4552_v24  ;;  %v6234_v52 = vpop.f32.mrb[86].mxu0  ;;  %v2079_v32 = vsub.f32 0.0, %v1879_v45  ;;  %v7014_v24 = vld [vmem:[#allocation71_spill] sm:$0xff]  ;;  %v6253_v45 = vmul.f32 1.442695, %v2081_v13 }
 0x1cc   :  { %7009 = vst [vmem:[#allocation68_spill] sm:$0xff] %v6222_v50  ;;  %v6230_v20 = vpop.eup %4555  ;;  %4575 = vrcp.f32 %v2664_v19  ;;  %7012 = vst [vmem:[#allocation113_spill] sm:$0xff] %v6234_v52  ;;  %v6236_v31 = vpop.f32.mrb[85].mxu1  ;;  %v1585_v47 = vadd.f32 %v6114_v33, %v7014_v24  ;;  %v7015_v50 = vld [vmem:[#allocation72_spill] sm:$0xff]  ;;  %v1785_v24 = vmax.f32 %v1185_v27, -30.0 }
 0x1cd   :  { %7011 = vst [vmem:[#allocation70_spill] sm:$0xff] %v6230_v20  ;;  %7013 = vst [vmem:[#allocation114_spill] sm:$0xff] %v6236_v31  ;;  %v4558_v61 = vpop.eup %4557  ;;  %4577 = vrcp.f32 %v2570_v63  ;;  %v1188_v6 = vadd.f32 %v6114_v33, %v7015_v50  ;;  %v6242_v20 = vpop.f32.mrb[87].mxu0  ;;  %v2082_v63 = vsub.f32 0.0, %v1882_v51  ;;  %v6262_v36 = vmul.f32 1.442695, %v2079_v32 }
 0x1ce   :  { %7016 = vst [vmem:[#allocation71_spill] sm:$0xff] %v6242_v20  ;;  %v6244_v43 = vpop.eup %4559  ;;  %4579 = vrcp.f32 %v2567_v53  ;;  %v2670_v19 = vadd.f32 1.0, %v4558_v61  ;;  %v6248_v52 = vpop.f32.mrb[86].mxu1  ;;  %v2080_v53 = vsub.f32 0.0, %v1880_v26  ;;  %v6267_v27 = vmul.f32 1.442695, %v1980_v58 }
 0x1cf   :  { %7017 = vst [vmem:[#allocation72_spill] sm:$0xff] %v6244_v43  ;;  %v6250_v31 = vpop.eup %4561  ;;  %4581 = vpow2.f32 %v6068_v4  ;;  %v6255_v50 = vpop.f32.mrb[87].mxu1  ;;  %v6257_v43 = vmul.f32 1.442695, %v1982_v25  ;;  %v1786_v4 = vmax.f32 %v1188_v6, -30.0  ;;  %v1577_v51 = vadd.f32 %v6114_v33, %v5832_v28 }
 0x1d0   :  { %7018 = vst [vmem:[#allocation115_spill] sm:$0xff] %v6250_v31  ;;  %v4564_v20 = vpop.eup %4563  ;;  %4583 = vrcp.f32 %v2670_v19  ;;  %v1885_v31 = vmax.f32 %v1585_v47, -30.0  ;;  %v1180_v25 = vadd.f32 %v6114_v33, %v5839_v55  ;;  %v1985_v2 = vsub.f32 0.0, %v1785_v24  ;;  %v7024_v24 = vld [vmem:[#allocation6_spill] sm:$0xff] }
 0x1d1   :  { %v6259_v61 = vpop.eup %4565  ;;  %4585 = vpow2.f32 %v6094_v1  ;;  %v6274_v1 = vmul.f32 1.442695, %v2082_v63  ;;  %v1588_v6 = vadd.f32 %v6114_v33, %v5847_v35  ;;  %v6282_v19 = vmul.f32 1.442695, %v2080_v53 }
 0x1d2   :  { %7019 = vst [vmem:[#allocation116_spill] sm:$0xff] %v6259_v61  ;;  %v6264_v13 = vpop.eup %4567  ;;  %4587 = vpow2.f32 %v6096_v49  ;;  %v7022_v49 = vld [vmem:[#allocation3_spill] sm:$0xff]  ;;  %v1983_v28 = vsub.f32 0.0, %v1783_v14  ;;  %v2667_v55 = vadd.f32 1.0, %v4564_v20  ;;  %v1986_v63 = vsub.f32 0.0, %v1786_v4 }
 0x1d3   :  { %7020 = vst [vmem:[#allocation117_spill] sm:$0xff] %v6264_v13  ;;  %v4570_v26 = vpop.eup %4569  ;;  %4589 = vpow2.f32 %v6100_v0  ;;  %v2085_v0 = vsub.f32 0.0, %v1885_v31  ;;  %v1883_v35 = vmax.f32 %v1577_v51, -30.0  ;;  %v1886_v53 = vmax.f32 %v1588_v6, -30.0  ;;  %v7026_v14 = vld [vmem:[#allocation7_spill] sm:$0xff]  ;;  %v7029_v6 = vld [vmem:[#allocation9_spill] sm:$0xff] }
 0x1d4   :  { %v6278_v32 = vpop.eup %4571  ;;  %v2919_v47 = vadd.f32 %v4570_v26, %v7022_v49  ;;  %4591 = vpow2.f32 %v6105_v12  ;;  %v6290_v12 = vmul.f32 1.442695, %v1985_v2  ;;  %v1580_v20 = vadd.f32 %v6114_v33, %v5853_v46 }
 0x1d5   :  { %7021 = vst [vmem:[#allocation118_spill] sm:$0xff] %v6278_v32  ;;  %v4574_v58 = vpop.eup %4573  ;;  %4593 = vpow2.f32 %v6120_v16  ;;  %v1784_v32 = vmax.f32 %v1180_v25, -30.0  ;;  %v6298_v49 = vmul.f32 1.442695, %v1983_v28  ;;  %v6306_v25 = vmul.f32 1.442695, %v1986_v63 }
 0x1d6   :  { %v6285_v61 = vpop.eup %4575  ;;  %v2969_v13 = vadd.f32 %v7024_v24, %v2919_v47  ;;  %4595 = vpow2.f32 %v6140_v21  ;;  %v6300_v21 = vpop.f32.mrb[88].mxu0  ;;  %v2083_v47 = vsub.f32 0.0, %v1883_v35  ;;  %v1884_v24 = vmax.f32 %v1580_v20, -30.0  ;;  %v7032_v35 = vld [vmem:[#allocation82_spill] sm:$0xff] }
 0x1d7   :  { %7023 = vst [vmem:[#allocation3_spill] sm:$0xff] %v6285_v61  ;;  %v4578_v26 = vpop.eup %4577  ;;  %4597 = vpow2.f32 %v6154_v41  ;;  %v6304_v41 = vmul.f32 1.442695, %v2085_v0  ;;  %v6308_v2 = vpop.f32.mrb[89].mxu0 }
 0x1d8   :  { %v6294_v16 = vpop.eup %4579  ;;  %v3019_v31 = vadd.f32 %v4574_v58, %v2969_v13  ;;  %v2920_v4 = vadd.f32 %v4578_v26, %v7026_v14  ;;  %4599 = vpow2.f32 %v6161_v42  ;;  %7028 = vst [vmem:[#allocation119_spill] sm:$0xff] %v6308_v2  ;;  %v1984_v42 = vsub.f32 0.0, %v1784_v32  ;;  %v7030_v14 = vld [vmem:[#allocation28_spill] sm:$0xff]  ;;  %v6323_v20 = vpop.f32.mrb[88].mxu1 }
 0x1d9   :  { %7025 = vst [vmem:[#allocation6_spill] sm:$0xff] %v6294_v16  ;;  %v6302_v51 = vpop.eup %4581  ;;  %4601 = vrcp.f32 %v2667_v55  ;;  %v2086_v58 = vsub.f32 0.0, %v1886_v53  ;;  %v1201_v55 = vadd.f32 %v6114_v33, %v5878_v5  ;;  %v7031_v32 = vld [vmem:[#allocation80_spill] sm:$0xff]  ;;  %v1204_v53 = vadd.f32 %v6114_v33, %v7032_v35  ;;  %7033 = vst [vmem:[#allocation9_spill] sm:$0xff] %v6323_v20  ;;  %v6327_v61 = vpop.f32.mrb[89].mxu1 }
 0x1da   :  { %7027 = vst [vmem:[#allocation7_spill] sm:$0xff] %v6302_v51  ;;  %v4584_v46 = vpop.eup %4583  ;;  %v2970_v13 = vadd.f32 %v7029_v6, %v2920_v4  ;;  %4603 = vpow2.f32 %v6168_v59  ;;  %v1193_v4 = vadd.f32 %v6114_v33, %v7030_v14  ;;  %v2084_v16 = vsub.f32 0.0, %v1884_v24  ;;  %7035 = vst [vmem:[#allocation80_spill] sm:$0xff] %v6327_v61 }
 0x1db   :  { %v4586_v28 = vpop.eup %4585  ;;  %4605 = vpow2.f32 %v6173_v10  ;;  %v1601_v10 = vadd.f32 %v6114_v33, %v7031_v32 }
 0x1dc   :  { %v4588_v0 = vpop.eup %4587  ;;  %v3020_v63 = vadd.f32 %v4584_v46, %v2970_v13  ;;  %v2573_v26 = vadd.f32 1.0, %v4586_v28  ;;  %4607 = vpow2.f32 %v6182_v15  ;;  %v3069_v46 = vmul.f32 0.25, %v3019_v31  ;;  %v6325_v28 = vpop.f32.mrb[90].mxu0 }
 0x1dd   :  { %v4590_v6 = vpop.eup %4589  ;;  %v2571_v59 = vadd.f32 1.0, %v4588_v0  ;;  %4609 = vpow2.f32 %v6184_v18  ;;  %7034 = vst [vmem:[#allocation28_spill] sm:$0xff] %v6325_v28  ;;  %v1789_v18 = vmax.f32 %v1201_v55, -30.0  ;;  %v1787_v2 = vmax.f32 %v1193_v4, -30.0  ;;  %v6329_v20 = vpop.f32.mrb[91].mxu0 }
 0x1de   :  { %v4592_v5 = vpop.eup %4591  ;;  %v3070_v13 = vmul.f32 0.25, %v3020_v63  ;;  %4611 = vrcp.f32 %v2573_v26  ;;  %v2673_v15 = vadd.f32 1.0, %v4590_v6  ;;  %7036 = vst [vmem:[#allocation82_spill] sm:$0xff] %v6329_v20  ;;  %v6331_v26 = vmul.f32 1.442695, %v2083_v47  ;;  %v6338_v4 = vpop.f32.mrb[90].mxu1 }
 0x1df   :  { %v4594_v14 = vpop.eup %4593  ;;  %4613 = vrcp.f32 %v2571_v59  ;;  %v2574_v0 = vadd.f32 1.0, %v4592_v5  ;;  %v1889_v6 = vmax.f32 %v1601_v10, -30.0  ;;  %v1790_v55 = vmax.f32 %v1204_v53, -30.0  ;;  %v7037_v59 = vld [vmem:[#allocation83_spill] sm:$0xff] }
 0x1e0   :  { %v4596_v32 = vpop.eup %4595  ;;  %v3585_v51 = vpack.c.bf16 %v3070_v13, %v3069_v46  ;;  %4615 = vrcp.f32 %v2673_v15  ;;  %v2671_v35 = vadd.f32 1.0, %v4594_v14  ;;  %v1593_v5 = vadd.f32 %v6114_v33, %v7037_v59  ;;  %7038 = vst [vmem:[#allocation83_spill] sm:$0xff] %v6338_v4 }
 0x1e1   :  { %v4598_v31 = vpop.eup %4597  ;;  %4617 = vrcp.f32 %v2574_v0  ;;  %v2572_v63 = vadd.f32 1.0, %v4596_v32  ;;  %v6342_v47 = vmul.f32 1.442695, %v1984_v42  ;;  %v1989_v10 = vsub.f32 0.0, %v1789_v18 }
 0x1e2   :  { %v4600_v28 = vpop.eup %4599  ;;  %3586 = vst [vmem:[%s6858_s3] sm:$0xff] %v3585_v51   ;;  %4619 = vrcp.f32 %v2671_v35  ;;  %v2674_v24 = vadd.f32 1.0, %v4598_v31  ;;  %v6344_v14 = vmul.f32 1.442695, %v2086_v58  ;;  %v6346_v51 = vmul.f32 1.442695, %v2084_v16  ;;  %v7040_v31 = vld [vmem:[#allocation85_spill] sm:$0xff] }
 0x1e3   :  { %v6340_v46 = vpop.eup %4601  ;;  %4621 = vrcp.f32 %v2572_v63  ;;  %v2672_v13 = vadd.f32 1.0, %v4600_v28  ;;  %v1987_v0 = vsub.f32 0.0, %v1787_v2  ;;  %v2089_v35 = vsub.f32 0.0, %v1889_v6  ;;  %v7042_v2 = vld [vmem:[#allocation32_spill] sm:$0xff] }
 0x1e4   :  { %7039 = vst [vmem:[#allocation120_spill] sm:$0xff] %v6340_v46  ;;  %v4604_v15 = vpop.eup %4603  ;;  %4623 = vrcp.f32 %v2674_v24  ;;  %v1196_v59 = vadd.f32 %v6114_v33, %v7040_v31  ;;  %v6350_v46 = vpop.f32.mrb[91].mxu1  ;;  %v1990_v18 = vsub.f32 0.0, %v1790_v55  ;;  %v1887_v63 = vmax.f32 %v1593_v5, -30.0 }
 0x1e5   :  { %v4606_v53 = vpop.eup %4605  ;;  %4625 = vrcp.f32 %v2672_v13  ;;  %v2577_v32 = vadd.f32 1.0, %v4604_v15  ;;  %7041 = vst [vmem:[#allocation85_spill] sm:$0xff] %v6350_v46  ;;  %v6353_v24 = vmul.f32 1.442695, %v1989_v10  ;;  %v1604_v13 = vadd.f32 %v6114_v33, %v7042_v2  ;;  %v7043_v46 = vld [vmem:[#allocation30_spill] sm:$0xff] }
 0x1e6   :  { %v4608_v28 = vpop.eup %4607  ;;  %v2575_v42 = vadd.f32 1.0, %v4606_v53  ;;  %4627 = vpow2.f32 %v6189_v23  ;;  %v6357_v31 = vmul.f32 1.442695, %v1987_v0  ;;  %v1596_v53 = vadd.f32 %v6114_v33, %v7043_v46  ;;  %v7044_v23 = vld [vmem:[#allocation11_spill] sm:$0xff]  ;;  %v7046_v0 = vld [vmem:[#allocation14_spill] sm:$0xff] }
 0x1e7   :  { %v4610_v58 = vpop.eup %4609  ;;  %4629 = vrcp.f32 %v2577_v32  ;;  %v2677_v16 = vadd.f32 1.0, %v4608_v28  ;;  %v6362_v5 = vmul.f32 1.442695, %v2089_v35  ;;  %v1788_v32 = vmax.f32 %v1196_v59, -30.0  ;;  %v7045_v28 = vld [vmem:[#allocation2_spill] sm:$0xff]  ;;  %v6373_v35 = vpop.f32.mrb[92].mxu0 }
 0x1e8   :  { %v4612_v6 = vpop.eup %4611  ;;  %4631 = vrcp.f32 %v2575_v42  ;;  %v2578_v15 = vadd.f32 1.0, %v4610_v58  ;;  %v6365_v2 = vmul.f32 1.442695, %v1990_v18  ;;  %v2087_v42 = vsub.f32 0.0, %v1887_v63  ;;  %7047 = vst [vmem:[#allocation32_spill] sm:$0xff] %v6373_v35  ;;  %v6378_v63 = vpop.f32.mrb[93].mxu0 }
 0x1e9   :  { %v4614_v4 = vpop.eup %4613  ;;  %v2923_v55 = vadd.f32 %v4612_v6, %v7044_v23  ;;  %4633 = vrcp.f32 %v2677_v16  ;;  %v1890_v46 = vmax.f32 %v1604_v13, -30.0  ;;  %v6371_v6 = vadd.f32 %v6114_v33, %v5972_v8  ;;  %v7048_v16 = vld [vmem:[#allocation15_spill] sm:$0xff]  ;;  %v7050_v35 = vld [vmem:[#allocation5_spill] sm:$0xff] }
 0x1ea   :  { %v4616_v10 = vpop.eup %4615  ;;  %v2921_v20 = vadd.f32 %v4614_v4, %v7045_v28  ;;  %4635 = vrcp.f32 %v2578_v15  ;;  %v7049_v4 = vld [vmem:[#allocation4_spill] sm:$0xff]  ;;  %v1888_v18 = vmax.f32 %v1596_v53, -30.0  ;;  %v6383_v8 = vadd.f32 %v6114_v33, %v5978_v11  ;;  %v6394_v11 = vpop.f32.mrb[94].mxu0 }
 0x1eb   :  { %v4618_v58 = vpop.eup %4617  ;;  %v2973_v61 = vadd.f32 %v7046_v0, %v2923_v55  ;;  %4637 = vpow2.f32 %v6191_v40  ;;  %v1988_v40 = vsub.f32 0.0, %v1788_v32  ;;  %v1793_v32 = vmax.f32 %v6371_v6, -30.0  ;;  %7053 = vst [vmem:[#allocation11_spill] sm:$0xff] %v6394_v11  ;;  %v7055_v11 = vld [vmem:[#allocation19_spill] sm:$0xff] }
 0x1ec   :  { %v4620_v59 = vpop.eup %4619  ;;  %v2924_v23 = vadd.f32 %v4618_v58, %v7048_v16  ;;  %v2971_v15 = vadd.f32 %v7049_v4, %v2921_v20  ;;  %4639 = vpow2.f32 %v6198_v22  ;;  %v7051_v16 = vld [vmem:[#allocation17_spill] sm:$0xff]  ;;  %v6388_v22 = vpop.f32.mrb[92].mxu1  ;;  %v7054_v4 = vld [vmem:[#allocation8_spill] sm:$0xff] }
 0x1ed   :  { %v4622_v55 = vpop.eup %4621  ;;  %v3023_v28 = vadd.f32 %v4616_v10, %v2973_v61  ;;  %4641 = vpow2.f32 %v6202_v34  ;;  %7052 = vst [vmem:[#allocation30_spill] sm:$0xff] %v6388_v22  ;;  %v6391_v61 = vmul.f32 1.442695, %v2087_v42  ;;  %v2090_v34 = vsub.f32 0.0, %v1890_v46  ;;  %v6400_v42 = vpop.f32.mrb[93].mxu1 }
 0x1ee   :  { %v4624_v13 = vpop.eup %4623  ;;  %v3021_v0 = vadd.f32 %v4620_v59, %v2971_v15  ;;  %v2922_v58 = vadd.f32 %v4622_v55, %v7050_v35  ;;  %v2974_v20 = vadd.f32 %v7051_v16, %v2924_v23  ;;  %4643 = vpow2.f32 %v6218_v39 }
 0x1ef   :  { %v4626_v53 = vpop.eup %4625  ;;  %4645 = vpow2.f32 %v6246_v37  ;;  %v2088_v23 = vsub.f32 0.0, %v1888_v18  ;;  %v3073_v15 = vmul.f32 0.25, %v3023_v28  ;;  %v1791_v37 = vmax.f32 %v6383_v8, -30.0 }
 0x1f0   :  { %v4628_v10 = vpop.eup %4627  ;;  %v3024_v59 = vadd.f32 %v4624_v13, %v2974_v20  ;;  %v2972_v35 = vadd.f32 %v7054_v4, %v2922_v58  ;;  %4647 = vpow2.f32 %v6253_v45  ;;  %v6404_v13 = vpop.f32.mrb[95].mxu0  ;;  %v3071_v18 = vmul.f32 0.25, %v3021_v0  ;;  %v7056_v58 = vld [vmem:[#allocation10_spill] sm:$0xff] }
 0x1f1   :  { %v4630_v39 = vpop.eup %4629  ;;  %v2675_v55 = vadd.f32 1.0, %v4628_v10  ;;  %4649 = vpow2.f32 %v6257_v43  ;;  %v1617_v43 = vadd.f32 %v6114_v33, %v5980_v29  ;;  %v7057_v4 = vld [vmem:[#allocation22_spill] sm:$0xff]  ;;  %v1220_v0 = vadd.f32 %v6114_v33, %v5986_v48  ;;  %v7061_v48 = vld [vmem:[#allocation43_spill] sm:$0xff] }
 0x1f2   :  { %v4632_v46 = vpop.eup %4631  ;;  %v3074_v6 = vmul.f32 0.25, %v3024_v59  ;;  %v3022_v16 = vadd.f32 %v4626_v53, %v2972_v35  ;;  %v2927_v22 = vadd.f32 %v4630_v39, %v7055_v11  ;;  %4651 = vpow2.f32 %v6262_v36  ;;  %v7058_v11 = vld [vmem:[#allocation23_spill] sm:$0xff]  ;;  %v7059_v35 = vld [vmem:[#allocation12_spill] sm:$0xff] }
 0x1f3   :  { %v4634_v45 = vpop.eup %4633  ;;  %v2925_v28 = vadd.f32 %v4632_v46, %v7056_v58  ;;  %4653 = vrcp.f32 %v2675_v55  ;;  %v6416_v55 = vpop.f32.mrb[94].mxu1  ;;  %v1609_v58 = vadd.f32 %v6114_v33, %v7061_v48 }
 0x1f4   :  { %v4636_v8 = vpop.eup %4635  ;;  %v3595_v20 = vpack.c.bf16 %v3074_v6, %v3073_v15  ;;  %v3072_v10 = vmul.f32 0.25, %v3022_v16  ;;  %v2977_v59 = vadd.f32 %v7057_v4, %v2927_v22  ;;  %4655 = vpow2.f32 %v6267_v27  ;;  %v7060_v16 = vld [vmem:[#allocation25_spill] sm:$0xff] }
 0x1f5   :  { %v4638_v53 = vpop.eup %4637  ;;  %v2928_v36 = vadd.f32 %v4636_v8, %v7058_v11  ;;  %v2975_v39 = vadd.f32 %v7059_v35, %v2925_v28  ;;  %4657 = vpow2.f32 %v6274_v1  ;;  %v6430_v28 = vpop.f32.mrb[95].mxu1  ;;  %v1993_v4 = vsub.f32 0.0, %v1793_v32 }
 0x1f6   :  { %v4640_v29 = vpop.eup %4639  ;;  %3708 = vst [vmem:[%s6858_s3 + $0x10] sm:$0xff] %v3595_v20   ;;  %v3590_v22 = vpack.c.bf16 %v3072_v10, %v3071_v18  ;;  %v6421_v15 = vadd.f32 %v4634_v45, %v2977_v59  ;;  %v2576_v27 = vadd.f32 1.0, %v4638_v53  ;;  %4659 = vpow2.f32 %v6282_v19  ;;  %v6445_v32 = vpop.f32.mrb[96].mxu0 }
 0x1f7   :  { %v4642_v46 = vpop.eup %4641  ;;  %v2678_v6 = vadd.f32 1.0, %v4640_v29  ;;  %v6425_v1 = vadd.f32 %v7060_v16, %v2928_v36  ;;  %4661 = vpow2.f32 %v6290_v12  ;;  %v6435_v19 = vmul.f32 1.442695, %v1988_v40  ;;  %7063 = vst [vmem:[#allocation2_spill] sm:$0xff] %v6445_v32  ;;  %v6449_v48 = vpop.f32.mrb[97].mxu0  ;;  %v7078_v32 = vld [vmem:[#allocation20_spill] sm:$0xff] }
 0x1f8   :  { %v4644_v8 = vpop.eup %4643  ;;  %3707 = vst [vmem:[%s6858_s3 + $0x8] sm:$0xff] %v3590_v22   ;;  %4663 = vrcp.f32 %v2576_v27  ;;  %v2676_v45 = vadd.f32 1.0, %v4642_v46  ;;  %v6437_v18 = vmul.f32 1.442695, %v2090_v34  ;;  %v6439_v12 = vmul.f32 1.442695, %v2088_v23 }
 0x1f9   :  { %v4646_v20 = vpop.eup %4645  ;;  %4665 = vrcp.f32 %v2678_v6  ;;  %v2581_v10 = vadd.f32 1.0, %v4644_v8  ;;  %v1893_v11 = vmax.f32 %v1617_v43, -30.0  ;;  %v1794_v36 = vmax.f32 %v1220_v0, -30.0  ;;  %v7062_v46 = vld [vmem:[#allocation42_spill] sm:$0xff]  ;;  %7064 = vst [vmem:[#allocation14_spill] sm:$0xff] %v6449_v48  ;;  %v7074_v48 = vld [vmem:[#allocation27_spill] sm:$0xff] }
 0x1fa   :  { %v4648_v59 = vpop.eup %4647  ;;  %4667 = vrcp.f32 %v2676_v45  ;;  %v2579_v53 = vadd.f32 1.0, %v4646_v20  ;;  %v1991_v22 = vsub.f32 0.0, %v1791_v37  ;;  %v1891_v27 = vmax.f32 %v1609_v58, -30.0  ;;  %v6451_v37 = vpop.f32.mrb[96].mxu1 }
 0x1fb   :  { %v4650_v35 = vpop.eup %4649  ;;  %4669 = vrcp.f32 %v2581_v10  ;;  %v2681_v29 = vadd.f32 1.0, %v4648_v59  ;;  %v1212_v6 = vadd.f32 %v6114_v33, %v7062_v46  ;;  %v1620_v23 = vadd.f32 %v6114_v33, %v6012_v62  ;;  %7065 = vst [vmem:[#allocation15_spill] sm:$0xff] %v6451_v37  ;;  %v6453_v10 = vpop.f32.mrb[98].mxu0 }
 0x1fc   :  { %v4652_v40 = vpop.eup %4651  ;;  %4671 = vrcp.f32 %v2579_v53  ;;  %v2582_v34 = vadd.f32 1.0, %v4650_v35  ;;  %v6447_v0 = vmul.f32 1.442695, %v1993_v4  ;;  %v2093_v45 = vsub.f32 0.0, %v1893_v11  ;;  %7066 = vst [vmem:[#allocation4_spill] sm:$0xff] %v6453_v10 }
 0x1fd   :  { %v4654_v16 = vpop.eup %4653  ;;  %4673 = vrcp.f32 %v2681_v29  ;;  %v2679_v43 = vadd.f32 1.0, %v4652_v40  ;;  %v1994_v20 = vsub.f32 0.0, %v1794_v36  ;;  %v6455_v53 = vmul.f32 1.442695, %v1991_v22  ;;  %v6457_v29 = vpop.f32.mrb[97].mxu1 }
 0x1fe   :  { %v4656_v58 = vpop.eup %4655  ;;  %v3025_v8 = vadd.f32 %v4654_v16, %v2975_v39  ;;  %4675 = vrcp.f32 %v2582_v34  ;;  %v2091_v35 = vsub.f32 0.0, %v1891_v27  ;;  %7067 = vst [vmem:[#allocation5_spill] sm:$0xff] %v6457_v29  ;;  %v1792_v46 = vmax.f32 %v1212_v6, -30.0  ;;  %v6460_v39 = vpop.f32.mrb[99].mxu0  ;;  %v7069_v34 = vld [vmem:[#allocation46_spill] sm:$0xff] }
 0x1ff   :  { %v4658_v59 = vpop.eup %4657  ;;  %4677 = vrcp.f32 %v2679_v43  ;;  %v2580_v62 = vadd.f32 1.0, %v4656_v58  ;;  %v1894_v37 = vmax.f32 %v1620_v23, -30.0  ;;  %7068 = vst [vmem:[#allocation17_spill] sm:$0xff] %v6460_v39  ;;  %v1612_v16 = vadd.f32 %v6114_v33, %v7069_v34  ;;  %v7070_v23 = vld [vmem:[#allocation13_spill] sm:$0xff]  ;;  %v6477_v39 = vpop.f32.mrb[98].mxu1 }
 0x200   :  { %v4660_v4 = vpop.eup %4659  ;;  %v2682_v40 = vadd.f32 1.0, %v4658_v59  ;;  %4679 = vpow2.f32 %v6298_v49  ;;  %v6466_v22 = vadd.f32 %v6114_v33, %v6070_v17  ;;  %v6468_v58 = vmul.f32 1.442695, %v2093_v45  ;;  %7072 = vst [vmem:[#allocation8_spill] sm:$0xff] %v6477_v39 }
 0x201   :  { %v4662_v11 = vpop.eup %4661  ;;  %4681 = vrcp.f32 %v2580_v62  ;;  %v2680_v36 = vadd.f32 1.0, %v4660_v4  ;;  %v6470_v49 = vmul.f32 1.442695, %v1994_v20  ;;  %v6473_v62 = vmul.f32 1.442695, %v2091_v35  ;;  %v7071_v4 = vld [vmem:[#allocation49_spill] sm:$0xff] }
 0x202   :  { %v4664_v27 = vpop.eup %4663  ;;  %4683 = vrcp.f32 %v2682_v40  ;;  %v2585_v43 = vadd.f32 1.0, %v4662_v11  ;;  %v1225_v34 = vadd.f32 %v6114_v33, %v7071_v4  ;;  %v1992_v40 = vsub.f32 0.0, %v1792_v46  ;;  %v7073_v20 = vld [vmem:[#allocation16_spill] sm:$0xff]  ;;  %v7075_v46 = vld [vmem:[#allocation18_spill] sm:$0xff] }
 0x203   :  { %v4666_v6 = vpop.eup %4665  ;;  %v2926_v59 = vadd.f32 %v4664_v27, %v7070_v23  ;;  %4685 = vrcp.f32 %v2680_v36  ;;  %v2094_v45 = vsub.f32 0.0, %v1894_v37  ;;  %v1892_v27 = vmax.f32 %v1612_v16, -30.0 }
 0x204   :  { %v4668_v17 = vpop.eup %4667  ;;  %v3028_v29 = vadd.f32 %v4666_v6, %v6425_v1  ;;  %4687 = vrcp.f32 %v2585_v43  ;;  %v1797_v35 = vmax.f32 %v6466_v22, -30.0  ;;  %v3077_v23 = vmul.f32 0.25, %v6421_v15  ;;  %v6490_v15 = vpop.f32.mrb[99].mxu1 }
 0x205   :  { %v4670_v11 = vpop.eup %4669  ;;  %v2976_v10 = vadd.f32 %v7073_v20, %v2926_v59  ;;  %4689 = vpow2.f32 %v6304_v41  ;;  %v1795_v6 = vmax.f32 %v1225_v34, -30.0  ;;  %v3075_v41 = vmul.f32 0.25, %v3025_v8  ;;  %v7076_v20 = vld [vmem:[#allocation34_spill] sm:$0xff] }
 0x206   :  { %v4672_v36 = vpop.eup %4671  ;;  %v3078_v4 = vmul.f32 0.25, %v3028_v29  ;;  %v2931_v39 = vadd.f32 %v4670_v11, %v7074_v48  ;;  %4691 = vpow2.f32 %v6306_v25  ;;  %v7077_v11 = vld [vmem:[#allocation37_spill] sm:$0xff]  ;;  %v6499_v8 = vmul.f32 1.442695, %v1992_v40 }
 0x207   :  { %v4674_v1 = vpop.eup %4673  ;;  %v3026_v43 = vadd.f32 %v4668_v17, %v2976_v10  ;;  %v2929_v37 = vadd.f32 %v4672_v36, %v7075_v46  ;;  %4693 = vpow2.f32 %v6331_v26 }
 0x208   :  { %v4676_v59 = vpop.eup %4675  ;;  %v3605_v16 = vpack.c.bf16 %v3078_v4, %v3077_v23  ;;  %v2981_v22 = vadd.f32 %v7076_v20, %v2931_v39  ;;  %4695 = vpow2.f32 %v6342_v47  ;;  %v6503_v47 = vadd.f32 %v6114_v33, %v6074_v56 }
 0x209   :  { %v4678_v29 = vpop.eup %4677  ;;  %v3076_v48 = vmul.f32 0.25, %v3026_v43  ;;  %v2932_v25 = vadd.f32 %v4676_v59, %v7077_v11  ;;  %v2979_v10 = vadd.f32 %v7078_v32, %v2929_v37  ;;  %4697 = vpow2.f32 %v6344_v14  ;;  %v7079_v32 = vld [vmem:[#allocation39_spill] sm:$0xff]  ;;  %v7080_v43 = vld [vmem:[#allocation21_spill] sm:$0xff] }
 0x20a   :  { %v4680_v17 = vpop.eup %4679  ;;  %3710 = vst [vmem:[%s6858_s3 + $0x20] sm:$0xff] %v3605_v16   ;;  %v3031_v26 = vadd.f32 %v4674_v1, %v2981_v22  ;;  %4699 = vpow2.f32 %v6346_v51  ;;  %v6508_v1 = vmul.f32 1.442695, %v2094_v45  ;;  %v2092_v51 = vsub.f32 0.0, %v1892_v27  ;;  %v7081_v16 = vld [vmem:[#allocation24_spill] sm:$0xff] }
 0x20b   :  { %v4682_v39 = vpop.eup %4681  ;;  %v3600_v34 = vpack.c.bf16 %v3076_v48, %v3075_v41  ;;  %v3029_v36 = vadd.f32 %v4678_v29, %v2979_v10  ;;  %v2982_v23 = vadd.f32 %v7079_v32, %v2932_v25  ;;  %v2583_v14 = vadd.f32 1.0, %v4680_v17  ;;  %v7082_v48 = vld [vmem:[#allocation41_spill] sm:$0xff] }
 0x20c   :  { %v4684_v4 = vpop.eup %4683  ;;  %v2930_v46 = vadd.f32 %v4682_v39, %v7080_v43  ;;  %4701 = vpow2.f32 %v6353_v24  ;;  %v1997_v37 = vsub.f32 0.0, %v1797_v35  ;;  %v1995_v59 = vsub.f32 0.0, %v1795_v6  ;;  %v7083_v10 = vld [vmem:[#allocation97_spill] sm:$0xff]  ;;  %v7084_v39 = vld [vmem:[#allocation52_spill] sm:$0xff] }
 0x20d   :  { %v4686_v40 = vpop.eup %4685  ;;  %3709 = vst [vmem:[%s6858_s3 + $0x18] sm:$0xff] %v3600_v34   ;;  %v3032_v56 = vadd.f32 %v4684_v4, %v2982_v23  ;;  %4703 = vrcp.f32 %v2583_v14  ;;  %v1897_v22 = vmax.f32 %v6503_v47, -30.0  ;;  %v1236_v24 = vadd.f32 %v6114_v33, %v6076_v30  ;;  %v7085_v4 = vld [vmem:[#allocation51_spill] sm:$0xff] }
 0x20e   :  { %v4688_v41 = vpop.eup %4687  ;;  %v2980_v20 = vadd.f32 %v7081_v16, %v2930_v46  ;;  %4705 = vpow2.f32 %v6357_v31  ;;  %v3081_v27 = vmul.f32 0.25, %v3031_v26  ;;  %v1625_v31 = vadd.f32 %v6114_v33, %v7083_v10 }
 0x20f   :  { %v4690_v45 = vpop.eup %4689  ;;  %v3082_v29 = vmul.f32 0.25, %v3032_v56  ;;  %v2935_v11 = vadd.f32 %v4688_v41, %v7082_v48  ;;  %4707 = vpow2.f32 %v6362_v5  ;;  %v3079_v32 = vmul.f32 0.25, %v3029_v36 }
 0x210   :  { %v4692_v25 = vpop.eup %4691  ;;  %v3030_v35 = vadd.f32 %v4686_v40, %v2980_v20  ;;  %v2685_v6 = vadd.f32 1.0, %v4690_v45  ;;  %4709 = vpow2.f32 %v6365_v2  ;;  %v1228_v43 = vadd.f32 %v6114_v33, %v7085_v4  ;;  %v6537_v20 = vld [vmem:[%s6857_s2] ss:$0 sm:$0xff]  ;;  %v7086_v45 = vld [vmem:[#allocation100_spill] sm:$0xff] }
 0x211   :  { %v4694_v17 = vpop.eup %4693  ;;  %v3615_v47 = vpack.c.bf16 %v3082_v29, %v3081_v27  ;;  %v2985_v34 = vadd.f32 %v7084_v39, %v2935_v11  ;;  %v2586_v30 = vadd.f32 1.0, %v4692_v25  ;;  %4711 = vpow2.f32 %v6391_v61 }
 0x212   :  { %v4696_v26 = vpop.eup %4695  ;;  %v3080_v23 = vmul.f32 0.25, %v3030_v35  ;;  %4713 = vrcp.f32 %v2685_v6  ;;  %v2683_v5 = vadd.f32 1.0, %v4694_v17  ;;  %v1636_v46 = vadd.f32 %v6114_v33, %v6090_v60  ;;  %v7087_v6 = vld [vmem:[#allocation26_spill] sm:$0xff] }
 0x213   :  { %v4698_v14 = vpop.eup %4697  ;;  %3712 = vst [vmem:[%s6858_s3 + $0x30] sm:$0xff] %v3615_v47   ;;  %4715 = vrcp.f32 %v2586_v30  ;;  %v2584_v2 = vadd.f32 1.0, %v4696_v26  ;;  %v1798_v56 = vmax.f32 %v1236_v24, -30.0  ;;  %v6532_v16 = vmul.f32 1.442695, %v2092_v51  ;;  %v7088_v26 = vld [vmem:[#allocation55_spill] sm:$0xff] }
 0x214   :  { %v4700_v40 = vpop.eup %4699  ;;  %v3610_v61 = vpack.c.bf16 %v3080_v23, %v3079_v32  ;;  %4717 = vrcp.f32 %v2683_v5  ;;  %v2686_v36 = vadd.f32 1.0, %v4698_v14  ;;  %v1628_v27 = vadd.f32 %v6537_v20, %v7086_v45  ;;  %v7089_v32 = vld [vmem:[#allocation29_spill] sm:$0xff] }
 0x215   :  { %4719 = vrcp.f32 %v2584_v2  ;;  %v2684_v41 = vadd.f32 1.0, %v4700_v40  ;;  %v6544_v60 = vmul.f32 1.442695, %v1997_v37  ;;  %v6546_v33 = vmul.f32 1.442695, %v1995_v59 }
 0x216   :  { %v4702_v29 = vpop.eup %4701  ;;  %3711 = vst [vmem:[%s6858_s3 + $0x28] sm:$0xff] %v3610_v61   ;;  %4721 = vrcp.f32 %v2686_v36  ;;  %v1895_v51 = vmax.f32 %v1625_v31, -30.0  ;;  %v1796_v11 = vmax.f32 %v1228_v43, -30.0  ;;  %v1898_v25 = vmax.f32 %v1636_v46, -30.0  ;;  %v7090_v61 = vld [vmem:[#allocation57_spill] sm:$0xff] }
 0x217   :  { %v4704_v24 = vpop.eup %4703  ;;  %4723 = vrcp.f32 %v2684_v41  ;;  %v2589_v48 = vadd.f32 1.0, %v4702_v29  ;;  %v2097_v17 = vsub.f32 0.0, %v1897_v22  ;;  %v1998_v47 = vsub.f32 0.0, %v1798_v56  ;;  %v7091_v29 = vld [vmem:[#allocation53_spill] sm:$0xff] }
 0x218   :  { %v4706_v35 = vpop.eup %4705  ;;  %v2933_v10 = vadd.f32 %v4704_v24, %v7087_v6  ;;  %4725 = vpow2.f32 %v6435_v19  ;;  %v1896_v37 = vmax.f32 %v1628_v27, -30.0  ;;  %v1249_v59 = vadd.f32 %v6537_v20, %v7088_v26 }
 0x219   :  { %v4708_v39 = vpop.eup %4707  ;;  %4727 = vrcp.f32 %v2589_v48  ;;  %v2587_v30 = vadd.f32 1.0, %v4706_v35  ;;  %v2095_v14 = vsub.f32 0.0, %v1895_v51  ;;  %v1996_v19 = vsub.f32 0.0, %v1796_v11 }
 0x21a   :  { %v4710_v31 = vpop.eup %4709  ;;  %v2983_v23 = vadd.f32 %v7089_v32, %v2933_v10  ;;  %v2689_v5 = vadd.f32 1.0, %v4708_v39  ;;  %4729 = vpow2.f32 %v6437_v18  ;;  %v2098_v22 = vsub.f32 0.0, %v1898_v25  ;;  %v7092_v10 = vld [vmem:[#allocation31_spill] sm:$0xff]  ;;  %v7093_v39 = vld [vmem:[#allocation56_spill] sm:$0xff] }
 0x21b   :  { %v4712_v2 = vpop.eup %4711  ;;  %4731 = vrcp.f32 %v2587_v30  ;;  %v2590_v4 = vadd.f32 1.0, %v4710_v31  ;;  %v6554_v40 = vmul.f32 1.442695, %v2097_v17  ;;  %v1241_v36 = vadd.f32 %v6537_v20, %v7090_v61  ;;  %v7094_v31 = vld [vmem:[#allocation103_spill] sm:$0xff] }
 0x21c   :  { %v4714_v43 = vpop.eup %4713  ;;  %4733 = vrcp.f32 %v2689_v5  ;;  %v2687_v46 = vadd.f32 1.0, %v4712_v2  ;;  %v2096_v45 = vsub.f32 0.0, %v1896_v37  ;;  %v1801_v27 = vmax.f32 %v1249_v59, -30.0  ;;  %v7095_v5 = vld [vmem:[#allocation38_spill] sm:$0xff]  ;;  %v7096_v2 = vld [vmem:[#allocation60_spill] sm:$0xff] }
 0x21d   :  { %v4716_v56 = vpop.eup %4715  ;;  %v3035_v41 = vadd.f32 %v4714_v43, %v2985_v34  ;;  %4735 = vrcp.f32 %v2590_v4  ;;  %v6559_v24 = vmul.f32 1.442695, %v1998_v47  ;;  %v6561_v48 = vmul.f32 1.442695, %v2095_v14 }
 0x21e   :  { %v4718_v18 = vpop.eup %4717  ;;  %v2936_v51 = vadd.f32 %v4716_v56, %v7091_v29  ;;  %4737 = vrcp.f32 %v2687_v46  ;;  %v6564_v35 = vmul.f32 1.442695, %v1996_v19  ;;  %v6566_v6 = vmul.f32 1.442695, %v2098_v22 }
 0x21f   :  { %v4720_v11 = vpop.eup %4719  ;;  %v3033_v25 = vadd.f32 %v4718_v18, %v2983_v23  ;;  %4739 = vpow2.f32 %v6439_v12  ;;  %v1799_v37 = vmax.f32 %v1241_v36, -30.0  ;;  %v6572_v26 = vmul.f32 1.442695, %v2096_v45  ;;  %v7097_v36 = vld [vmem:[#allocation61_spill] sm:$0xff] }
 0x220   :  { %v4722_v34 = vpop.eup %4721  ;;  %v2934_v17 = vadd.f32 %v4720_v11, %v7092_v10  ;;  %v2986_v30 = vadd.f32 %v7093_v39, %v2936_v51  ;;  %4741 = vpow2.f32 %v6447_v0  ;;  %v2001_v59 = vsub.f32 0.0, %v1801_v27  ;;  %v7098_v11 = vld [vmem:[#allocation40_spill] sm:$0xff] }
 0x221   :  { %v4724_v47 = vpop.eup %4723  ;;  %4743 = vpow2.f32 %v6455_v53  ;;  %v1649_v12 = vadd.f32 %v6537_v20, %v7094_v31  ;;  %v1252_v4 = vadd.f32 %v6537_v20, %v7096_v2  ;;  %v3085_v19 = vmul.f32 0.25, %v3035_v41  ;;  %v7100_v31 = vld [vmem:[#allocation65_spill] sm:$0xff] }
 0x222   :  { %v4726_v32 = vpop.eup %4725  ;;  %v3036_v23 = vadd.f32 %v4722_v34, %v2986_v30  ;;  %v2984_v14 = vadd.f32 %v7095_v5, %v2934_v17  ;;  %4745 = vpow2.f32 %v6468_v58  ;;  %v1641_v53 = vadd.f32 %v6537_v20, %v6156_v54  ;;  %v7099_v34 = vld [vmem:[#allocation64_spill] sm:$0xff] }
 0x223   :  { %v4728_v0 = vpop.eup %4727  ;;  %v2588_v22 = vadd.f32 1.0, %v4726_v32  ;;  %4747 = vpow2.f32 %v6470_v49  ;;  %v3083_v58 = vmul.f32 0.25, %v3033_v25  ;;  %v1901_v18 = vmax.f32 %v1649_v12, -30.0  ;;  %v7101_v32 = vld [vmem:[#allocation47_spill] sm:$0xff] }
 0x224   :  { %v4730_v43 = vpop.eup %4729  ;;  %v3086_v46 = vmul.f32 0.25, %v3036_v23  ;;  %v3034_v61 = vadd.f32 %v4724_v47, %v2984_v14  ;;  %v2939_v56 = vadd.f32 %v4728_v0, %v7097_v36  ;;  %4749 = vpow2.f32 %v6473_v62 }
 0x225   :  { %v4732_v45 = vpop.eup %4731  ;;  %4751 = vrcp.f32 %v2588_v22  ;;  %v2690_v27 = vadd.f32 1.0, %v4730_v43  ;;  %v1999_v17 = vsub.f32 0.0, %v1799_v37  ;;  %v1802_v39 = vmax.f32 %v1252_v4, -30.0 }
 0x226   :  { %v4734_v29 = vpop.eup %4733  ;;  %v3625_v41 = vpack.c.bf16 %v3086_v46, %v3085_v19  ;;  %v3084_v51 = vmul.f32 0.25, %v3034_v61  ;;  %v2937_v49 = vadd.f32 %v4732_v45, %v7098_v11  ;;  %v2989_v10 = vadd.f32 %v7099_v34, %v2939_v56  ;;  %v7102_v19 = vld [vmem:[#allocation69_spill] sm:$0xff] }
 0x227   :  { %v4736_v54 = vpop.eup %4735  ;;  %4753 = vrcp.f32 %v2690_v27  ;;  %v1899_v30 = vmax.f32 %v1641_v53, -30.0  ;;  %v6593_v14 = vmul.f32 1.442695, %v2001_v59  ;;  %v2101_v2 = vsub.f32 0.0, %v1901_v18 }
 0x228   :  { %v4738_v47 = vpop.eup %4737  ;;  %3714 = vst [vmem:[%s6858_s3 + $0x40] sm:$0xff] %v3625_v41   ;;  %v3620_v62 = vpack.c.bf16 %v3084_v51, %v3083_v58  ;;  %v3039_v25 = vadd.f32 %v4734_v29, %v2989_v10  ;;  %v2940_v12 = vadd.f32 %v4736_v54, %v7100_v31  ;;  %v2987_v23 = vadd.f32 %v7101_v32, %v2937_v49  ;;  %v7103_v10 = vld [vmem:[#allocation50_spill] sm:$0xff] }
 0x229   :  { %v4740_v5 = vpop.eup %4739  ;;  %4755 = vpow2.f32 %v6499_v8  ;;  %v1244_v37 = vadd.f32 %v6537_v20, %v6186_v57  ;;  %v1652_v43 = vadd.f32 %v6537_v20, %v6200_v44  ;;  %v6606_v46 = vmul.f32 1.442695, %v1999_v17 }
 0x22a   :  { %v4742_v4 = vpop.eup %4741  ;;  %3713 = vst [vmem:[%s6858_s3 + $0x38] sm:$0xff] %v3620_v62   ;;  %v6600_v0 = vadd.f32 %v4738_v47, %v2987_v23  ;;  %v2990_v22 = vadd.f32 %v7102_v19, %v2940_v12  ;;  %v2688_v53 = vadd.f32 1.0, %v4740_v5  ;;  %4757 = vpow2.f32 %v6508_v1  ;;  %v7104_v12 = vld [vmem:[#allocation54_spill] sm:$0xff] }
 0x22b   :  { %v4744_v8 = vpop.eup %4743  ;;  %v2593_v59 = vadd.f32 1.0, %v4742_v4  ;;  %v2002_v57 = vsub.f32 0.0, %v1802_v39  ;;  %v2099_v56 = vsub.f32 0.0, %v1899_v30  ;;  %v1644_v45 = vadd.f32 %v6537_v20, %v6206_v38 }
 0x22c   :  { %v4746_v61 = vpop.eup %4745  ;;  %4759 = vrcp.f32 %v2688_v53  ;;  %v2591_v36 = vadd.f32 1.0, %v4744_v8  ;;  %v1800_v18 = vmax.f32 %v1244_v37, -30.0  ;;  %v1265_v44 = vadd.f32 %v6537_v20, %v6220_v3 }
 0x22d   :  { %v4748_v58 = vpop.eup %4747  ;;  %4761 = vrcp.f32 %v2593_v59  ;;  %v2693_v27 = vadd.f32 1.0, %v4746_v61  ;;  %v6612_v41 = vmul.f32 1.442695, %v2101_v2  ;;  %v1902_v51 = vmax.f32 %v1652_v43, -30.0 }
 0x22e   :  { %v4750_v29 = vpop.eup %4749  ;;  %4763 = vrcp.f32 %v2591_v36  ;;  %v2594_v1 = vadd.f32 1.0, %v4748_v58  ;;  %v1257_v34 = vadd.f32 %v6537_v20, %v6226_v9  ;;  %v1665_v38 = vadd.f32 %v6537_v20, %v6228_v7  ;;  %v7105_v9 = vld [vmem:[#allocation113_spill] sm:$0xff] }
 0x22f   :  { %v4752_v11 = vpop.eup %4751  ;;  %4765 = vrcp.f32 %v2693_v27  ;;  %v2691_v49 = vadd.f32 1.0, %v4750_v29  ;;  %v6619_v17 = vmul.f32 1.442695, %v2002_v57  ;;  %v6621_v3 = vmul.f32 1.442695, %v2099_v56 }
 0x230   :  { %v2938_v54 = vadd.f32 %v4752_v11, %v7103_v10  ;;  %4767 = vrcp.f32 %v2594_v1  ;;  %v2000_v30 = vsub.f32 0.0, %v1800_v18  ;;  %v1900_v47 = vmax.f32 %v1644_v45, -30.0  ;;  %v7107_v18 = vld [vmem:[#allocation114_spill] sm:$0xff] }
 0x231   :  { %v4754_v39 = vpop.eup %4753  ;;  %4769 = vrcp.f32 %v2691_v49  ;;  %v1805_v62 = vmax.f32 %v1265_v44, -30.0  ;;  %v1268_v7 = vadd.f32 %v6537_v20, %v7105_v9  ;;  %v2102_v5 = vsub.f32 0.0, %v1902_v51 }
 0x232   :  { %v3040_v31 = vadd.f32 %v4754_v39, %v2990_v22  ;;  %v2988_v32 = vadd.f32 %v7104_v12, %v2938_v54  ;;  %4771 = vpow2.f32 %v6532_v16  ;;  %v1803_v2 = vmax.f32 %v1257_v34, -30.0  ;;  %v7109_v34 = vld [vmem:[#allocation77_spill] sm:$0xff]  ;;  %v7110_v54 = vld [vmem:[#allocation71_spill] sm:$0xff]  ;;  %v7112_v12 = vld [vmem:[#allocation62_spill] sm:$0xff] }
 0x233   :  { %v4756_v23 = vpop.eup %4755  ;;  %4773 = vpow2.f32 %v6544_v60  ;;  %v1905_v37 = vmax.f32 %v1665_v38, -30.0  ;;  %v3089_v4 = vmul.f32 0.25, %v3039_v25  ;;  %v6630_v22 = vmul.f32 1.442695, %v2000_v30 }
 0x234   :  { %v3090_v19 = vmul.f32 0.25, %v3040_v31  ;;  %v2592_v53 = vadd.f32 1.0, %v4756_v23  ;;  %4775 = vpow2.f32 %v6546_v33  ;;  %v4758_v43 = vpop.eup %4757  ;;  %v2100_v16 = vsub.f32 0.0, %v1900_v47 }
 0x235   :  { %4777 = vpow2.f32 %v6554_v40  ;;  %v2005_v8 = vsub.f32 0.0, %v1805_v62  ;;  %v2694_v61 = vadd.f32 1.0, %v4758_v43  ;;  %v1806_v60 = vmax.f32 %v1268_v7, -30.0  ;;  %v7106_v40 = vld [vmem:[#allocation74_spill] sm:$0xff] }
 0x236   :  { %v4760_v59 = vpop.eup %4759  ;;  %v3635_v57 = vpack.c.bf16 %v3090_v19, %v3089_v4  ;;  %4779 = vrcp.f32 %v2592_v53  ;;  %v6633_v25 = vmul.f32 1.442695, %v2102_v5  ;;  %v2003_v45 = vsub.f32 0.0, %v1803_v2  ;;  %v7111_v62 = vld [vmem:[#allocation78_spill] sm:$0xff]  ;;  %v7113_v5 = vld [vmem:[#allocation81_spill] sm:$0xff] }
 0x237   :  { %v4762_v36 = vpop.eup %4761  ;;  %v3038_v56 = vadd.f32 %v4760_v59, %v2988_v32  ;;  %4781 = vpow2.f32 %v6559_v24  ;;  %v2105_v27 = vsub.f32 0.0, %v1905_v37  ;;  %v1657_v44 = vadd.f32 %v6537_v20, %v7107_v18  ;;  %v7108_v24 = vld [vmem:[#allocation58_spill] sm:$0xff] }
 0x238   :  { %v4764_v33 = vpop.eup %4763  ;;  %3716 = vst [vmem:[%s6858_s3 + $0x50] sm:$0xff] %v3635_v57   ;;  %v2943_v58 = vadd.f32 %v4762_v36, %v7106_v40  ;;  %4783 = vrcp.f32 %v2694_v61  ;;  %v3087_v1 = vmul.f32 0.25, %v6600_v0  ;;  %v2006_v10 = vsub.f32 0.0, %v1806_v60 }
 0x239   :  { %v4766_v29 = vpop.eup %4765  ;;  %v3088_v51 = vmul.f32 0.25, %v3038_v56  ;;  %v2941_v11 = vadd.f32 %v4764_v33, %v7108_v24  ;;  %4785 = vpow2.f32 %v6561_v48  ;;  %v1260_v39 = vadd.f32 %v6537_v20, %v7110_v54  ;;  %v7114_v56 = vld [vmem:[#allocation63_spill] sm:$0xff] }
 0x23a   :  { %v4768_v49 = vpop.eup %4767  ;;  %v2993_v38 = vadd.f32 %v7109_v34, %v2943_v58  ;;  %4787 = vpow2.f32 %v6564_v35  ;;  %v1903_v48 = vmax.f32 %v1657_v44, -30.0  ;;  %v1668_v35 = vadd.f32 %v6537_v20, %v6248_v52  ;;  %v7115_v44 = vld [vmem:[#allocation66_spill] sm:$0xff] }
 0x23b   :  { %v4770_v30 = vpop.eup %4769  ;;  %v3630_v47 = vpack.c.bf16 %v3088_v51, %v3087_v1  ;;  %v2944_v31 = vadd.f32 %v4768_v49, %v7111_v62  ;;  %v2991_v0 = vadd.f32 %v7112_v12, %v2941_v11  ;;  %4789 = vpow2.f32 %v6566_v6  ;;  %v7116_v49 = vld [vmem:[#allocation119_spill] sm:$0xff] }
 0x23c   :  { %v4772_v32 = vpop.eup %4771  ;;  %v3043_v9 = vadd.f32 %v4766_v29, %v2993_v38  ;;  %4791 = vpow2.f32 %v6572_v26  ;;  %v6662_v26 = vmul.f32 1.442695, %v2100_v16  ;;  %v6664_v19 = vmul.f32 1.442695, %v2005_v8 }
 0x23d   :  { %v4774_v7 = vpop.eup %4773  ;;  %3715 = vst [vmem:[%s6858_s3 + $0x48] sm:$0xff] %v3630_v47   ;;  %v6657_v23 = vadd.f32 %v4770_v30, %v2991_v0  ;;  %v2994_v2 = vadd.f32 %v7113_v5, %v2944_v31  ;;  %v2692_v37 = vadd.f32 1.0, %v4772_v32  ;;  %4793 = vpow2.f32 %v6593_v14  ;;  %v7117_v5 = vld [vmem:[#allocation9_spill] sm:$0xff] }
 0x23e   :  { %v4776_v6 = vpop.eup %4775  ;;  %v2597_v4 = vadd.f32 1.0, %v4774_v7  ;;  %4795 = vpow2.f32 %v6606_v46  ;;  %v6666_v43 = vmul.f32 1.442695, %v2003_v45  ;;  %v1804_v59 = vmax.f32 %v1260_v39, -30.0 }
 0x23f   :  { %v4778_v52 = vpop.eup %4777  ;;  %4797 = vrcp.f32 %v2692_v37  ;;  %v2595_v53 = vadd.f32 1.0, %v4776_v6  ;;  %v6668_v60 = vmul.f32 1.442695, %v2105_v27  ;;  %v1906_v14 = vmax.f32 %v1668_v35, -30.0 }
 0x240   :  { %v4780_v57 = vpop.eup %4779  ;;  %4799 = vrcp.f32 %v2597_v4  ;;  %v2697_v61 = vadd.f32 1.0, %v4778_v52  ;;  %v6671_v46 = vmul.f32 1.442695, %v2006_v10  ;;  %v2103_v16 = vsub.f32 0.0, %v1903_v48 }
 0x241   :  { %v4782_v36 = vpop.eup %4781  ;;  %v2942_v33 = vadd.f32 %v4780_v57, %v7114_v56  ;;  %4801 = vrcp.f32 %v2595_v53  ;;  %v1660_v45 = vadd.f32 %v6537_v20, %v6255_v50  ;;  %v1281_v58 = vadd.f32 %v6537_v20, %v6300_v21 }
 0x242   :  { %v4784_v8 = vpop.eup %4783  ;;  %4803 = vrcp.f32 %v2697_v61  ;;  %v2598_v40 = vadd.f32 1.0, %v4782_v36  ;;  %v2004_v1 = vsub.f32 0.0, %v1804_v59  ;;  %v2106_v11 = vsub.f32 0.0, %v1906_v14  ;;  %v7118_v59 = vld [vmem:[#allocation86_spill] sm:$0xff]  ;;  %v7119_v61 = vld [vmem:[#allocation28_spill] sm:$0xff] }
 0x243   :  { %v4786_v18 = vpop.eup %4785  ;;  %v3044_v27 = vadd.f32 %v4784_v8, %v2994_v2  ;;  %v2992_v29 = vadd.f32 %v7115_v44, %v2942_v33  ;;  %4805 = vpow2.f32 %v6612_v41  ;;  %v1273_v34 = vadd.f32 %v6537_v20, %v7116_v49  ;;  %v7120_v36 = vld [vmem:[#allocation80_spill] sm:$0xff] }
 0x244   :  { %v4788_v51 = vpop.eup %4787  ;;  %4807 = vrcp.f32 %v2598_v40  ;;  %v2695_v24 = vadd.f32 1.0, %v4786_v18  ;;  %v3093_v10 = vmul.f32 0.25, %v3043_v9  ;;  %v1904_v30 = vmax.f32 %v1660_v45, -30.0  ;;  %v7121_v40 = vld [vmem:[#allocation73_spill] sm:$0xff]  ;;  %v7122_v18 = vld [vmem:[#allocation35_spill] sm:$0xff] }
 0x245   :  { %v4790_v38 = vpop.eup %4789  ;;  %v3094_v50 = vmul.f32 0.25, %v3044_v27  ;;  %v2596_v54 = vadd.f32 1.0, %v4788_v51  ;;  %4809 = vpow2.f32 %v6619_v17  ;;  %v1809_v47 = vmax.f32 %v1281_v58, -30.0 }
 0x246   :  { %v4792_v21 = vpop.eup %4791  ;;  %4811 = vrcp.f32 %v2695_v24  ;;  %v2698_v39 = vadd.f32 1.0, %v4790_v38  ;;  %v6682_v12 = vmul.f32 1.442695, %v2103_v16  ;;  %v6684_v48 = vmul.f32 1.442695, %v2004_v1  ;;  %v7123_v24 = vld [vmem:[#allocation75_spill] sm:$0xff] }
 0x247   :  { %v4794_v41 = vpop.eup %4793  ;;  %v3645_v62 = vpack.c.bf16 %v3094_v50, %v3093_v10  ;;  %4813 = vrcp.f32 %v2596_v54  ;;  %v2696_v31 = vadd.f32 1.0, %v4792_v21  ;;  %v1807_v9 = vmax.f32 %v1273_v34, -30.0  ;;  %v7124_v38 = vld [vmem:[#allocation33_spill] sm:$0xff] }
 0x248   :  { %v4796_v0 = vpop.eup %4795  ;;  %4815 = vrcp.f32 %v2698_v39  ;;  %v2601_v32 = vadd.f32 1.0, %v4794_v41  ;;  %v6689_v7 = vmul.f32 1.442695, %v2106_v11  ;;  %v1681_v2 = vadd.f32 %v6537_v20, %v7117_v5  ;;  %v7127_v5 = vld [vmem:[#allocation82_spill] sm:$0xff] }
 0x249   :  { %v4798_v35 = vpop.eup %4797  ;;  %3718 = vst [vmem:[%s6858_s3 + $0x60] sm:$0xff] %v3645_v62   ;;  %4817 = vrcp.f32 %v2696_v31  ;;  %v2599_v17 = vadd.f32 1.0, %v4796_v0  ;;  %v2104_v4 = vsub.f32 0.0, %v1904_v30  ;;  %v2009_v52 = vsub.f32 0.0, %v1809_v47  ;;  %v7126_v62 = vld [vmem:[#allocation76_spill] sm:$0xff] }
 0x24a   :  { %v4800_v37 = vpop.eup %4799  ;;  %v3042_v6 = vadd.f32 %v4798_v35, %v2992_v29  ;;  %4819 = vrcp.f32 %v2601_v32  ;;  %v1284_v14 = vadd.f32 %v6537_v20, %v7119_v61  ;;  %v1673_v56 = vadd.f32 %v6537_v20, %v7120_v36 }
 0x24b   :  { %v4802_v53 = vpop.eup %4801  ;;  %v2947_v57 = vadd.f32 %v4800_v37, %v7118_v59  ;;  %4821 = vrcp.f32 %v2599_v17  ;;  %v3091_v16 = vmul.f32 0.25, %v6657_v23  ;;  %v2007_v44 = vsub.f32 0.0, %v1807_v9 }
 0x24c   :  { %v4804_v33 = vpop.eup %4803  ;;  %v3092_v8 = vmul.f32 0.25, %v3042_v6  ;;  %v2945_v45 = vadd.f32 %v4802_v53, %v7121_v40  ;;  %4823 = vpow2.f32 %v6621_v3  ;;  %v1909_v29 = vmax.f32 %v1681_v2, -30.0  ;;  %v7128_v6 = vld [vmem:[#allocation79_spill] sm:$0xff] }
 0x24d   :  { %v4806_v58 = vpop.eup %4805  ;;  %v2997_v27 = vadd.f32 %v7122_v18, %v2947_v57  ;;  %4825 = vpow2.f32 %v6630_v22  ;;  %v1810_v3 = vmax.f32 %v1284_v14, -30.0  ;;  %v6710_v54 = vmul.f32 1.442695, %v2104_v4  ;;  %v7130_v14 = vld [vmem:[#allocation45_spill] sm:$0xff] }
 0x24e   :  { %v4808_v1 = vpop.eup %4807  ;;  %v3640_v51 = vpack.c.bf16 %v3092_v8, %v3091_v16  ;;  %v2995_v11 = vadd.f32 %v7123_v24, %v2945_v45  ;;  %v2701_v49 = vadd.f32 1.0, %v4806_v58  ;;  %4827 = vpow2.f32 %v6633_v25  ;;  %v7125_v25 = vld [vmem:[#allocation89_spill] sm:$0xff]  ;;  %v7131_v16 = vld [vmem:[#allocation84_spill] sm:$0xff] }
 0x24f   :  { %v4810_v23 = vpop.eup %4809  ;;  %v3047_v34 = vadd.f32 %v4804_v33, %v2997_v27  ;;  %v2948_v10 = vadd.f32 %v4808_v1, %v7124_v38  ;;  %4829 = vpow2.f32 %v6662_v26  ;;  %v1907_v21 = vmax.f32 %v1673_v56, -30.0  ;;  %v7132_v45 = vld [vmem:[#allocation93_spill] sm:$0xff] }
 0x250   :  { %v4812_v50 = vpop.eup %4811  ;;  %3717 = vst [vmem:[%s6858_s3 + $0x58] sm:$0xff] %v3640_v51   ;;  %4831 = vrcp.f32 %v2701_v49  ;;  %v2602_v22 = vadd.f32 1.0, %v4810_v23  ;;  %v6714_v41 = vmul.f32 1.442695, %v2009_v52  ;;  %v6717_v0 = vmul.f32 1.442695, %v2007_v44 }
 0x251   :  { %v4814_v39 = vpop.eup %4813  ;;  %v3045_v30 = vadd.f32 %v4812_v50, %v2995_v11  ;;  %v2998_v47 = vadd.f32 %v7125_v25, %v2948_v10  ;;  %4833 = vpow2.f32 %v6664_v19  ;;  %v2109_v32 = vsub.f32 0.0, %v1909_v29  ;;  %v7129_v52 = vld [vmem:[#allocation83_spill] sm:$0xff]  ;;  %v7134_v11 = vld [vmem:[#allocation85_spill] sm:$0xff] }
 0x252   :  { %v4816_v26 = vpop.eup %4815  ;;  %v2946_v31 = vadd.f32 %v4814_v39, %v7126_v62  ;;  %4835 = vrcp.f32 %v2602_v22  ;;  %v2010_v17 = vsub.f32 0.0, %v1810_v3  ;;  %v1276_v2 = vadd.f32 %v6537_v20, %v7127_v5  ;;  %v7133_v29 = vld [vmem:[#allocation87_spill] sm:$0xff] }
 0x253   :  { %v4818_v9 = vpop.eup %4817  ;;  %v3048_v35 = vadd.f32 %v4816_v26, %v2998_v47  ;;  %4837 = vpow2.f32 %v6666_v43  ;;  %v2107_v4 = vsub.f32 0.0, %v1907_v21  ;;  %v1684_v53 = vadd.f32 %v6537_v20, %v7129_v52  ;;  %v7136_v26 = vld [vmem:[#allocation44_spill] sm:$0xff] }
 0x254   :  { %v4820_v37 = vpop.eup %4819  ;;  %v2996_v19 = vadd.f32 %v7128_v6, %v2946_v31  ;;  %4839 = vpow2.f32 %v6668_v60  ;;  %v3097_v57 = vmul.f32 0.25, %v3047_v34  ;;  %v3095_v56 = vmul.f32 0.25, %v3045_v30  ;;  %v7135_v30 = vld [vmem:[#allocation32_spill] sm:$0xff] }
 0x255   :  { %v4822_v59 = vpop.eup %4821  ;;  %v3098_v61 = vmul.f32 0.25, %v3048_v35  ;;  %v2951_v36 = vadd.f32 %v4820_v37, %v7130_v14  ;;  %4841 = vpow2.f32 %v6671_v46  ;;  %v6737_v24 = vmul.f32 1.442695, %v2109_v32 }
 0x256   :  { %v4824_v43 = vpop.eup %4823  ;;  %v3046_v33 = vadd.f32 %v4818_v9, %v2996_v19  ;;  %v2949_v8 = vadd.f32 %v4822_v59, %v7131_v16  ;;  %4843 = vpow2.f32 %v6682_v12  ;;  %v1676_v49 = vadd.f32 %v6537_v20, %v7134_v11  ;;  %v7139_v19 = vld [vmem:[#allocation95_spill] sm:$0xff] }
 0x257   :  { %v4826_v40 = vpop.eup %4825  ;;  %v3655_v60 = vpack.c.bf16 %v3098_v61, %v3097_v57  ;;  %v3001_v58 = vadd.f32 %v7132_v45, %v2951_v36  ;;  %v2699_v18 = vadd.f32 1.0, %v4824_v43  ;;  %4845 = vpow2.f32 %v6684_v48 }
 0x258   :  { %v4828_v27 = vpop.eup %4827  ;;  %v3096_v44 = vmul.f32 0.25, %v3046_v33  ;;  %v2999_v1 = vadd.f32 %v7133_v29, %v2949_v8  ;;  %v2600_v51 = vadd.f32 1.0, %v4826_v40  ;;  %4847 = vpow2.f32 %v6689_v7 }
 0x259   :  { %v4830_v46 = vpop.eup %4829  ;;  %3720 = vst [vmem:[%s6858_s3 + $0x70] sm:$0xff] %v3655_v60   ;;  %4849 = vrcp.f32 %v2699_v18  ;;  %v2702_v12 = vadd.f32 1.0, %v4828_v27  ;;  %v1808_v38 = vmax.f32 %v1276_v2, -30.0  ;;  %v6743_v7 = vmul.f32 1.442695, %v2010_v17  ;;  %v7137_v17 = vld [vmem:[#allocation30_spill] sm:$0xff] }
 0x25a   :  { %v4832_v48 = vpop.eup %4831  ;;  %v3650_v23 = vpack.c.bf16 %v3096_v44, %v3095_v56  ;;  %4851 = vrcp.f32 %v2600_v51  ;;  %v2700_v34 = vadd.f32 1.0, %v4830_v46  ;;  %v6745_v50 = vmul.f32 1.442695, %v2107_v4  ;;  %v7138_v2 = vld [vmem:[#allocation11_spill] sm:$0xff]  ;;  %v7140_v51 = vld [vmem:[#allocation88_spill] sm:$0xff] }
 0x25b   :  { %v4834_v10 = vpop.eup %4833  ;;  %v6741_v3 = vadd.f32 %v4832_v48, %v3001_v58  ;;  %4853 = vrcp.f32 %v2702_v12  ;;  %v1910_v39 = vmax.f32 %v1684_v53, -30.0  ;;  %v1297_v25 = vadd.f32 %v6537_v20, %v7135_v30 }
 0x25c   :  { %v4836_v22 = vpop.eup %4835  ;;  %3719 = vst [vmem:[%s6858_s3 + $0x68] sm:$0xff] %v3650_v23   ;;  %4855 = vrcp.f32 %v2700_v34  ;;  %v2605_v21 = vadd.f32 1.0, %v4834_v10  ;;  %v1908_v31 = vmax.f32 %v1676_v49, -30.0  ;;  %v1289_v32 = vadd.f32 %v6537_v20, %v6378_v63  ;;  %v7141_v10 = vld [vmem:[#allocation36_spill] sm:$0xff] }
 0x25d   :  { %v4838_v47 = vpop.eup %4837  ;;  %v2952_v62 = vadd.f32 %v4836_v22, %v7136_v26  ;;  %4857 = vpow2.f32 %v6710_v54  ;;  %v1697_v5 = vadd.f32 %v6537_v20, %v7137_v17  ;;  %v1300_v37 = vadd.f32 %v6537_v20, %v7138_v2  ;;  %v7142_v26 = vld [vmem:[#allocation48_spill] sm:$0xff]  ;;  %v7143_v17 = vld [vmem:[#allocation90_spill] sm:$0xff]  ;;  %v7144_v2 = vld [vmem:[#allocation101_spill] sm:$0xff] }
 0x25e   :  { %v4840_v9 = vpop.eup %4839  ;;  %4859 = vrcp.f32 %v2605_v21  ;;  %v2603_v35 = vadd.f32 1.0, %v4838_v47  ;;  %v2008_v54 = vsub.f32 0.0, %v1808_v38  ;;  %v2110_v63 = vsub.f32 0.0, %v1910_v39 }
 0x25f   :  { %v4842_v6 = vpop.eup %4841  ;;  %v3002_v4 = vadd.f32 %v7139_v19, %v2952_v62  ;;  %v2705_v52 = vadd.f32 1.0, %v4840_v9  ;;  %4861 = vpow2.f32 %v6714_v41  ;;  %v1813_v57 = vmax.f32 %v1297_v25, -30.0 }
 0x260   :  { %v4844_v53 = vpop.eup %4843  ;;  %4863 = vrcp.f32 %v2603_v35  ;;  %v2606_v59 = vadd.f32 1.0, %v4842_v6  ;;  %v2108_v36 = vsub.f32 0.0, %v1908_v31  ;;  %v1811_v43 = vmax.f32 %v1289_v32, -30.0 }
 0x261   :  { %v4846_v61 = vpop.eup %4845  ;;  %4865 = vrcp.f32 %v2705_v52  ;;  %v2703_v14 = vadd.f32 1.0, %v4844_v53  ;;  %v1913_v16 = vmax.f32 %v1697_v5, -30.0  ;;  %v1814_v8 = vmax.f32 %v1300_v37, -30.0 }
 0x262   :  { %v4848_v56 = vpop.eup %4847  ;;  %4867 = vrcp.f32 %v2606_v59  ;;  %v2604_v33 = vadd.f32 1.0, %v4846_v61  ;;  %v2297_v41 = vmul.f32 1.442695, %v2008_v54  ;;  %v1689_v45 = vadd.f32 %v6537_v20, %v6400_v42  ;;  %v7145_v54 = vld [vmem:[#allocation102_spill] sm:$0xff]  ;;  %v7146_v59 = vld [vmem:[#allocation91_spill] sm:$0xff] }
 0x263   :  { %v4850_v40 = vpop.eup %4849  ;;  %4869 = vrcp.f32 %v2703_v14  ;;  %v2706_v60 = vadd.f32 1.0, %v4848_v56  ;;  %v2501_v27 = vmul.f32 1.442695, %v2110_v63  ;;  %v2013_v44 = vsub.f32 0.0, %v1813_v57 }
 0x264   :  { %v4852_v58 = vpop.eup %4851  ;;  %v3049_v18 = vadd.f32 %v4850_v40, %v2999_v1  ;;  %4871 = vrcp.f32 %v2604_v33  ;;  %v2497_v12 = vmul.f32 1.442695, %v2108_v36  ;;  %v2011_v11 = vsub.f32 0.0, %v1811_v43  ;;  %v7147_v33 = vld [vmem:[#allocation92_spill] sm:$0xff] }
 0x265   :  { %v4854_v29 = vpop.eup %4853  ;;  %v2950_v46 = vadd.f32 %v4852_v58, %v7140_v51  ;;  %4873 = vrcp.f32 %v2706_v60  ;;  %v2113_v23 = vsub.f32 0.0, %v1913_v16  ;;  %v2014_v34 = vsub.f32 0.0, %v1814_v8  ;;  %v7148_v16 = vld [vmem:[#allocation104_spill] sm:$0xff] }
 0x266   :  { %v4856_v49 = vpop.eup %4855  ;;  %v3052_v48 = vadd.f32 %v4854_v29, %v3002_v4  ;;  %4875 = vpow2.f32 %v6717_v0  ;;  %v1911_v1 = vmax.f32 %v1689_v45, -30.0  ;;  %v1292_v22 = vadd.f32 %v6537_v20, %v6404_v13 }
 0x267   :  { %v4858_v38 = vpop.eup %4857  ;;  %v3000_v42 = vadd.f32 %v7141_v10, %v2950_v46  ;;  %4877 = vpow2.f32 %v6737_v24  ;;  %v3101_v39 = vmul.f32 0.25, %v6741_v3  ;;  %v1700_v24 = vadd.f32 %v6537_v20, %v6416_v55 }
 0x268   :  { %v4860_v21 = vpop.eup %4859  ;;  %v3102_v30 = vmul.f32 0.25, %v3052_v48  ;;  %v2704_v25 = vadd.f32 1.0, %v4858_v38  ;;  %4879 = vpow2.f32 %v6743_v7  ;;  %v3099_v32 = vmul.f32 0.25, %v3049_v18  ;;  %v7150_v48 = vld [vmem:[#allocation2_spill] sm:$0xff] }
 0x269   :  { %v4862_v47 = vpop.eup %4861  ;;  %v3050_v0 = vadd.f32 %v4856_v49, %v3000_v42  ;;  %v2955_v62 = vadd.f32 %v4860_v21, %v7142_v26  ;;  %4881 = vpow2.f32 %v6745_v50  ;;  %v2111_v50 = vsub.f32 0.0, %v1911_v1  ;;  %v7151_v38 = vld [vmem:[#allocation14_spill] sm:$0xff] }
 0x26a   :  { %v4864_v31 = vpop.eup %4863  ;;  %v3665_v9 = vpack.c.bf16 %v3102_v30, %v3101_v39  ;;  %4883 = vrcp.f32 %v2704_v25  ;;  %v2609_v13 = vadd.f32 1.0, %v4862_v47  ;;  %v1812_v55 = vmax.f32 %v1292_v22, -30.0  ;;  %v7152_v30 = vld [vmem:[#allocation15_spill] sm:$0xff] }
 0x26b   :  { %v4866_v35 = vpop.eup %4865  ;;  %v3100_v3 = vmul.f32 0.25, %v3050_v0  ;;  %v2953_v5 = vadd.f32 %v4864_v31, %v7143_v17  ;;  %v3005_v7 = vadd.f32 %v7144_v2, %v2955_v62  ;;  %4885 = vpow2.f32 %v2297_v41 }
 0x26c   :  { %v4868_v37 = vpop.eup %4867  ;;  %3722 = vst [vmem:[%s6858_s3 + $0x80] sm:$0xff] %v3665_v9   ;;  %4887 = vrcp.f32 %v2609_v13  ;;  %v1692_v6 = vadd.f32 %v6537_v20, %v6430_v28  ;;  %v2307_v61 = vmul.f32 1.442695, %v2013_v44  ;;  %v2303_v14 = vmul.f32 1.442695, %v2011_v11  ;;  %v7149_v44 = vld [vmem:[#allocation94_spill] sm:$0xff] }
 0x26d   :  { %v4870_v19 = vpop.eup %4869  ;;  %v3660_v4 = vpack.c.bf16 %v3100_v3, %v3099_v32  ;;  %v3055_v52 = vadd.f32 %v4866_v35, %v3005_v7  ;;  %v2956_v53 = vadd.f32 %v4868_v37, %v7145_v54  ;;  %v3003_v63 = vadd.f32 %v7146_v59, %v2953_v5  ;;  %v7153_v3 = vld [vmem:[#allocation106_spill] sm:$0xff]  ;;  %v7154_v7 = vld [vmem:[#allocation4_spill] sm:$0xff] }
 0x26e   :  { %v4872_v57 = vpop.eup %4871  ;;  %4889 = vpow2.f32 %v2501_v27  ;;  %v2507_v36 = vmul.f32 1.442695, %v2113_v23  ;;  %v2309_v40 = vmul.f32 1.442695, %v2014_v34  ;;  %v2503_v41 = vmul.f32 1.442695, %v2111_v50 }
 0x26f   :  { %v4874_v43 = vpop.eup %4873  ;;  %3721 = vst [vmem:[%s6858_s3 + $0x78] sm:$0xff] %v3660_v4   ;;  %v3053_v56 = vadd.f32 %v4870_v19, %v3003_v63  ;;  %v2954_v28 = vadd.f32 %v4872_v57, %v7147_v33  ;;  %v3006_v8 = vadd.f32 %v7148_v16, %v2956_v53  ;;  %4891 = vpow2.f32 %v2497_v12  ;;  %v7155_v50 = vld [vmem:[#allocation5_spill] sm:$0xff] }
 0x270   :  { %v4876_v60 = vpop.eup %4875  ;;  %v2012_v45 = vsub.f32 0.0, %v1812_v55  ;;  %v1914_v58 = vmax.f32 %v1700_v24, -30.0  ;;  %v1912_v46 = vmax.f32 %v1692_v6, -30.0  ;;  %4893 = vpow2.f32 %v2307_v61  ;;  %v7156_v19 = vld [vmem:[#allocation109_spill] sm:$0xff] }
 0x271   :  { %v4878_v18 = vpop.eup %4877  ;;  %v3056_v27 = vadd.f32 %v4874_v43, %v3006_v8  ;;  %v3004_v29 = vadd.f32 %v7149_v44, %v2954_v28  ;;  %v2607_v51 = vadd.f32 1.0, %v4876_v60  ;;  %v1313_v23 = vadd.f32 %v6537_v20, %v7150_v48  ;;  %v7157_v61 = vld [vmem:[#allocation17_spill] sm:$0xff] }
 0x272   :  { %v4880_v11 = vpop.eup %4879  ;;  %v2709_v49 = vadd.f32 1.0, %v4878_v18  ;;  %v1305_v34 = vadd.f32 %v6537_v20, %v7151_v38  ;;  %v3105_v12 = vmul.f32 0.25, %v3055_v52  ;;  %v2114_v39 = vsub.f32 0.0, %v1914_v58 }
 0x273   :  { %v4882_v10 = vpop.eup %4881  ;;  %v3106_v42 = vmul.f32 0.25, %v3056_v27  ;;  %4895 = vrcp.f32 %v2607_v51  ;;  %v2610_v1 = vadd.f32 1.0, %v4880_v11  ;;  %v1713_v25 = vadd.f32 %v6537_v20, %v7152_v30 }
 0x274   :  { %v4884_v22 = vpop.eup %4883  ;;  %4897 = vrcp.f32 %v2709_v49  ;;  %v2707_v21 = vadd.f32 1.0, %v4882_v10  ;;  %v2112_v62 = vsub.f32 0.0, %v1912_v46  ;;  %v1817_v32 = vmax.f32 %v1313_v23, -30.0  ;;  %v7160_v49 = vld [vmem:[#allocation98_spill] sm:$0xff] }
 0x275   :  { %v4886_v47 = vpop.eup %4885  ;;  %v3675_v0 = vpack.c.bf16 %v3106_v42, %v3105_v12  ;;  %v3054_v26 = vadd.f32 %v4884_v22, %v3004_v29  ;;  %4899 = vrcp.f32 %v2610_v1  ;;  %v1815_v9 = vmax.f32 %v1305_v34, -30.0  ;;  %v7161_v12 = vld [vmem:[#allocation8_spill] sm:$0xff] }
 0x276   :  { %v4888_v24 = vpop.eup %4887  ;;  %4901 = vrcp.f32 %v2707_v21  ;;  %v2608_v31 = vadd.f32 1.0, %v4886_v47  ;;  %v3103_v13 = vmul.f32 0.25, %v3053_v56  ;;  %v1917_v2 = vmax.f32 %v1713_v25, -30.0  ;;  %v7162_v21 = vld [vmem:[#allocation112_spill] sm:$0xff]  ;;  %v7163_v47 = vld [vmem:[#allocation99_spill] sm:$0xff] }
 0x277   :  { %3724 = vst [vmem:[%s6858_s3 + $0x90] sm:$0xff] %v3675_v0   ;;  %v3104_v35 = vmul.f32 0.25, %v3054_v26  ;;  %v2959_v17 = vadd.f32 %v4888_v24, %v7153_v3  ;;  %4903 = vpow2.f32 %v2303_v14  ;;  %v1316_v37 = vadd.f32 %v6537_v20, %v7154_v7 }
 0x278   :  { %v4890_v5 = vpop.eup %4889  ;;  %4905 = vrcp.f32 %v2608_v31  ;;  %v1705_v55 = vadd.f32 %v6537_v20, %v7155_v50  ;;  %v2305_v53 = vmul.f32 1.442695, %v2012_v45  ;;  %v2017_v59 = vsub.f32 0.0, %v1817_v32  ;;  %v4982_v20 = vld [vmem:[%s6857_s2] ss:$0 sm:$0xff]  ;;  %v7158_v45 = vld [vmem:[#allocation96_spill] sm:$0xff] }
 0x279   :  { %v3670_v6 = vpack.c.bf16 %v3104_v35, %v3103_v13  ;;  %v3009_v4 = vadd.f32 %v7156_v19, %v2959_v17  ;;  %v2710_v52 = vadd.f32 1.0, %v4890_v5  ;;  %4907 = vpow2.f32 %v2507_v36  ;;  %v4892_v54 = vpop.eup %4891  ;;  %v7164_v13 = vld [vmem:[#allocation59_spill] sm:$0xff] }
 0x27a   :  { %4909 = vpow2.f32 %v2309_v40  ;;  %v2708_v63 = vadd.f32 1.0, %v4892_v54  ;;  %v2015_v57 = vsub.f32 0.0, %v1815_v9  ;;  %v1308_v14 = vadd.f32 %v4982_v20, %v7157_v61  ;;  %v4894_v43 = vpop.eup %4893 }
 0x27b   :  { %3723 = vst [vmem:[%s6858_s3 + $0x88] sm:$0xff] %v3670_v6   ;;  %4911 = vrcp.f32 %v2710_v52  ;;  %v2509_v36 = vmul.f32 1.442695, %v2114_v39  ;;  %v2505_v56 = vmul.f32 1.442695, %v2112_v62  ;;  %v1818_v33 = vmax.f32 %v1316_v37, -30.0 }
 0x27c   :  { %4913 = vpow2.f32 %v2503_v41  ;;  %v2613_v16 = vadd.f32 1.0, %v4894_v43  ;;  %v2117_v8 = vsub.f32 0.0, %v1917_v2  ;;  %v1915_v40 = vmax.f32 %v1705_v55, -30.0  ;;  %v7159_v41 = vld [vmem:[#allocation110_spill] sm:$0xff] }
 0x27d   :  { %v4896_v28 = vpop.eup %4895  ;;  %4915 = vrcp.f32 %v2708_v63  ;;  %v2315_v18 = vmul.f32 1.442695, %v2017_v59  ;;  %v2311_v29 = vmul.f32 1.442695, %v2015_v57  ;;  %v1816_v51 = vmax.f32 %v1308_v14, -30.0  ;;  %v7165_v14 = vld [vmem:[#allocation68_spill] sm:$0xff] }
 0x27e   :  { %v4898_v60 = vpop.eup %4897  ;;  %v2957_v58 = vadd.f32 %v4896_v28, %v7158_v45  ;;  %4917 = vpow2.f32 %v2305_v53  ;;  %v2018_v23 = vsub.f32 0.0, %v1818_v33  ;;  %v2515_v34 = vmul.f32 1.442695, %v2117_v8  ;;  %v7166_v8 = vld [vmem:[#allocation117_spill] sm:$0xff] }
 0x27f   :  { %v4900_v27 = vpop.eup %4899  ;;  %v3059_v44 = vadd.f32 %v4898_v60, %v3009_v4  ;;  %4919 = vrcp.f32 %v2613_v16  ;;  %v2115_v10 = vsub.f32 0.0, %v1915_v40  ;;  %v1716_v42 = vadd.f32 %v4982_v20, %v7161_v12 }
 0x280   :  { %v4902_v46 = vpop.eup %4901  ;;  %v2960_v11 = vadd.f32 %v4900_v27, %v7159_v41  ;;  %v3007_v48 = vadd.f32 %v7160_v49, %v2957_v58  ;;  %4921 = vpow2.f32 %v2509_v36  ;;  %v2016_v26 = vsub.f32 0.0, %v1816_v51  ;;  %v7167_v51 = vld [vmem:[#allocation105_spill] sm:$0xff]  ;;  %v7168_v49 = vld [vmem:[#allocation116_spill] sm:$0xff] }
 0x281   :  { %v4904_v38 = vpop.eup %4903  ;;  %4923 = vpow2.f32 %v2505_v56  ;;  %v1708_v62 = vadd.f32 %v4982_v20, %v6490_v15  ;;  %v2317_v32 = vmul.f32 1.442695, %v2018_v23  ;;  %v1918_v17 = vmax.f32 %v1716_v42, -30.0 }
 0x282   :  { %v4906_v1 = vpop.eup %4905  ;;  %v3057_v22 = vadd.f32 %v4902_v46, %v3007_v48  ;;  %v3010_v39 = vadd.f32 %v7162_v21, %v2960_v11  ;;  %v2611_v30 = vadd.f32 1.0, %v4904_v38  ;;  %4925 = vpow2.f32 %v2315_v18  ;;  %v7171_v21 = vld [vmem:[#allocation118_spill] sm:$0xff] }
 0x283   :  { %v4908_v25 = vpop.eup %4907  ;;  %v2958_v0 = vadd.f32 %v4906_v1, %v7163_v47  ;;  %4927 = vpow2.f32 %v2311_v29  ;;  %v2511_v7 = vmul.f32 1.442695, %v2115_v10  ;;  %v2313_v55 = vmul.f32 1.442695, %v2016_v26  ;;  %v7169_v10 = vld [vmem:[#allocation107_spill] sm:$0xff] }
 0x284   :  { %v4910_v24 = vpop.eup %4909  ;;  %4929 = vrcp.f32 %v2611_v30  ;;  %v2713_v31 = vadd.f32 1.0, %v4908_v25  ;;  %v1916_v6 = vmax.f32 %v1708_v62, -30.0  ;;  %v3109_v19 = vmul.f32 0.25, %v3059_v44  ;;  %v7170_v1 = vld [vmem:[#allocation7_spill] sm:$0xff] }
 0x285   :  { %v4912_v9 = vpop.eup %4911  ;;  %v3008_v35 = vadd.f32 %v7164_v13, %v2958_v0  ;;  %v2614_v3 = vadd.f32 1.0, %v4910_v24  ;;  %4931 = vpow2.f32 %v2515_v34  ;;  %v3107_v53 = vmul.f32 0.25, %v3057_v22  ;;  %v7172_v0 = vld [vmem:[#allocation70_spill] sm:$0xff]  ;;  %v7173_v24 = vld [vmem:[#allocation3_spill] sm:$0xff] }
 0x286   :  { %v4914_v5 = vpop.eup %4913  ;;  %v3060_v2 = vadd.f32 %v4912_v9, %v3010_v39  ;;  %4933 = vrcp.f32 %v2713_v31  ;;  %v2118_v63 = vsub.f32 0.0, %v1918_v17  ;;  %v2116_v33 = vsub.f32 0.0, %v1916_v6 }
 0x287   :  { %v4916_v37 = vpop.eup %4915  ;;  %4935 = vrcp.f32 %v2614_v3  ;;  %v2711_v50 = vadd.f32 1.0, %v4914_v5  ;;  %v2568_v48 = vadd.f32 1.0, %v7168_v49  ;;  %v2668_v22 = vadd.f32 1.0, %v7170_v1  ;;  %v7175_v5 = vld [vmem:[#allocation72_spill] sm:$0xff] }
 0x288   :  { %v4918_v15 = vpop.eup %4917  ;;  %v3110_v4 = vmul.f32 0.25, %v3060_v2  ;;  %v3058_v52 = vadd.f32 %v4916_v37, %v3008_v35  ;;  %4937 = vpow2.f32 %v2317_v32  ;;  %v2517_v18 = vmul.f32 1.442695, %v2118_v63  ;;  %v7174_v35 = vld [vmem:[#allocation108_spill] sm:$0xff] }
 0x289   :  { %v4920_v54 = vpop.eup %4919  ;;  %4939 = vrcp.f32 %v2711_v50  ;;  %v2612_v59 = vadd.f32 1.0, %v4918_v15  ;;  %v2513_v41 = vmul.f32 1.442695, %v2116_v33  ;;  %v2566_v26 = vadd.f32 1.0, %v7172_v0 }
 0x28a   :  { %v4922_v57 = vpop.eup %4921  ;;  %v3685_v20 = vpack.c.bf16 %v3110_v4, %v3109_v19  ;;  %v3108_v61 = vmul.f32 0.25, %v3058_v52  ;;  %v2963_v43 = vadd.f32 %v4920_v54, %v7165_v14  ;;  %4941 = vpow2.f32 %v2511_v7 }
 0x28b   :  { %v4924_v36 = vpop.eup %4923  ;;  %4943 = vrcp.f32 %v2612_v59  ;;  %v2714_v56 = vadd.f32 1.0, %v4922_v57  ;;  %v2666_v2 = vadd.f32 1.0, %v7175_v5 }
 0x28c   :  { %v4926_v28 = vpop.eup %4925  ;;  %3726 = vst [vmem:[%s6858_s3 + $0xa0] sm:$0xff] %v3685_v20   ;;  %v3680_v16 = vpack.c.bf16 %v3108_v61, %v3107_v53  ;;  %v3013_v40 = vadd.f32 %v7166_v8, %v2963_v43  ;;  %v2712_v60 = vadd.f32 1.0, %v4924_v36  ;;  %4945 = vpow2.f32 %v2313_v55  ;;  %v7176_v55 = vld [vmem:[#allocation111_spill] sm:$0xff]  ;;  %v7177_v53 = vld [vmem:[#allocation6_spill] sm:$0xff] }
 0x28d   :  { %v4928_v45 = vpop.eup %4927  ;;  %4947 = vrcp.f32 %v2714_v56  ;;  %v2617_v58 = vadd.f32 1.0, %v4926_v28  ;;  %v7178_v20 = vld [vmem:[#allocation67_spill] sm:$0xff]  ;;  %v7179_v56 = vld [vmem:[#allocation120_spill] sm:$0xff] }
 0x28e   :  { %v4930_v27 = vpop.eup %4929  ;;  %3725 = vst [vmem:[%s6858_s3 + $0x98] sm:$0xff] %v3680_v16   ;;  %4949 = vrcp.f32 %v2712_v60  ;;  %v2615_v44 = vadd.f32 1.0, %v4928_v45  ;;  %v7180_v8 = vld [vmem:[#allocation115_spill] sm:$0xff] }
 0x28f   :  { %v4932_v29 = vpop.eup %4931  ;;  %v2961_v46 = vadd.f32 %v4930_v27, %v7167_v51  ;;  %4951 = vrcp.f32 %v2617_v58 }
 0x290   :  { %v4934_v11 = vpop.eup %4933  ;;  %4953 = vrcp.f32 %v2615_v44  ;;  %v2717_v23 = vadd.f32 1.0, %v4932_v29 }
 0x291   :  { %v4936_v38 = vpop.eup %4935  ;;  %v3063_v34 = vadd.f32 %v4934_v11, %v3013_v40  ;;  %v3011_v12 = vadd.f32 %v7169_v10, %v2961_v46  ;;  %4955 = vpow2.f32 %v2517_v18 }
 0x292   :  { %v4938_v42 = vpop.eup %4937  ;;  %v2964_v39 = vadd.f32 %v4936_v38, %v7171_v21  ;;  %4957 = vrcp.f32 %v2717_v23 }
 0x293   :  { %v4940_v30 = vpop.eup %4939  ;;  %v2618_v25 = vadd.f32 1.0, %v4938_v42  ;;  %4959 = vpow2.f32 %v2513_v41  ;;  %v3113_v4 = vmul.f32 0.25, %v3063_v34 }
 0x294   :  { %v4942_v47 = vpop.eup %4941  ;;  %4961 = vrcp.f32 %v2568_v48  ;;  %v3061_v62 = vadd.f32 %v4940_v30, %v3011_v12  ;;  %v3014_v31 = vadd.f32 %v7173_v24, %v2964_v39 }
 0x295   :  { %v4944_v32 = vpop.eup %4943  ;;  %4963 = vrcp.f32 %v2618_v25  ;;  %v2715_v9 = vadd.f32 1.0, %v4942_v47 }
 0x296   :  { %v4946_v13 = vpop.eup %4945  ;;  %4965 = vrcp.f32 %v2668_v22  ;;  %v2962_v3 = vadd.f32 %v4944_v32, %v7174_v35  ;;  %v3111_v57 = vmul.f32 0.25, %v3061_v62 }
 0x297   :  { %v4948_v17 = vpop.eup %4947  ;;  %4967 = vrcp.f32 %v2715_v9  ;;  %v2616_v7 = vadd.f32 1.0, %v4946_v13 }
 0x298   :  { %v4950_v37 = vpop.eup %4949  ;;  %4969 = vrcp.f32 %v2566_v26  ;;  %v3064_v50 = vadd.f32 %v4948_v17, %v3014_v31  ;;  %v3012_v6 = vadd.f32 %v7176_v55, %v2962_v3 }
 0x299   :  { %v4952_v15 = vpop.eup %4951  ;;  %4971 = vrcp.f32 %v2616_v7 }
 0x29a   :  { %v4954_v19 = vpop.eup %4953  ;;  %v3114_v52 = vmul.f32 0.25, %v3064_v50  ;;  %v3062_v54 = vadd.f32 %v4950_v37, %v3012_v6  ;;  %v2967_v59 = vadd.f32 %v4952_v15, %v7177_v53  ;;  %4973 = vrcp.f32 %v2666_v2 }
 0x29b   :  { %v4956_v63 = vpop.eup %4955  ;;  %v2965_v61 = vadd.f32 %v4954_v19, %v7178_v20 }
 0x29c   :  { %v4958_v14 = vpop.eup %4957  ;;  %v3695_v43 = vpack.c.bf16 %v3114_v52, %v3113_v4  ;;  %v3112_v36 = vmul.f32 0.25, %v3062_v54  ;;  %v3017_v33 = vadd.f32 %v7179_v56, %v2967_v59  ;;  %v2718_v28 = vadd.f32 1.0, %v4956_v63 }
 0x29d   :  { %v4960_v16 = vpop.eup %4959  ;;  %v3015_v40 = vadd.f32 %v7180_v8, %v2965_v61 }
 0x29e   :  { %v4962_v60 = vpop.eup %4961  ;;  %3728 = vst [vmem:[%s6858_s3 + $0xb0] sm:$0xff] %v3695_v43   ;;  %v3690_v45 = vpack.c.bf16 %v3112_v36, %v3111_v57  ;;  %v3067_v58 = vadd.f32 %v4958_v14, %v3017_v33  ;;  %4975 = vrcp.f32 %v2718_v28  ;;  %v2716_v18 = vadd.f32 1.0, %v4960_v16 }
 0x29f   :  { %v4964_v27 = vpop.eup %4963 }
 0x2a0   :  { %v4966_v44 = vpop.eup %4965  ;;  %3727 = vst [vmem:[%s6858_s3 + $0xa8] sm:$0xff] %v3690_v45   ;;  %v2968_v29 = vadd.f32 %v4964_v27, %v4962_v60  ;;  %4977 = vrcp.f32 %v2716_v18  ;;  %v3117_v42 = vmul.f32 0.25, %v3067_v58 }
 0x2a1   :  { %v4968_v51 = vpop.eup %4967 }
 0x2a2   :  { %v4970_v46 = vpop.eup %4969  ;;  %v3065_v41 = vadd.f32 %v4968_v51, %v3015_v40  ;;  %v3018_v11 = vadd.f32 %v4966_v44, %v2968_v29 }
 0x2a3   :  { %v4972_v49 = vpop.eup %4971 }
 0x2a4   :  { %v2966_v48 = vadd.f32 %v4972_v49, %v4970_v46  ;;  %v4974_v23 = vpop.eup %4973  ;;  %v3115_v21 = vmul.f32 0.25, %v3065_v41 }
 0x2a6   :  { %v3016_v38 = vadd.f32 %v4974_v23, %v2966_v48 }
 0x2a8   :  { %v4976_v34 = vpop.eup %4975 }
 0x2a9   :  { %v3068_v10 = vadd.f32 %v4976_v34, %v3018_v11 }
 0x2aa   :  { %v4978_v12 = vpop.eup %4977 }
 0x2ab   :  { %v3118_v1 = vmul.f32 0.25, %v3068_v10  ;;  %v3066_v22 = vadd.f32 %v4978_v12, %v3016_v38 }
 0x2ad   :  { %v3705_v39 = vpack.c.bf16 %v3118_v1, %v3117_v42  ;;  %v3116_v30 = vmul.f32 0.25, %v3066_v22 }
 0x2af   :  { %3730 = vst [vmem:[%s6858_s3 + $0xc0] sm:$0xff] %v3705_v39   ;;  %v3700_v25 = vpack.c.bf16 %v3116_v30, %v3115_v21 }
 0x2b1   :  { %3729 = vst [vmem:[%s6858_s3 + $0xb8] sm:$0xff] %v3700_v25  }

// kernel: lenet_forward.5
= control target key start
LH: loop header
LB: loop body
LE: loop exit
PB: predicated region body
PF: predicated region fallthrough
CT: control target
= control target key end

     0   :  { %v887_v34 = vmov 0.0   ;;  %vm888_vm0 = vmmov 0   ;;  %s1118_s1 = inlined_call_operand.vmem [shape: bf16[512,128], index: 1, kind: input, shape index: {}]   ;;  %s1119_s0 = inlined_call_operand.vmem [shape: bf16[16,512], index: 0, kind: input, shape index: {}]   ;;  %s1120_s3 = inlined_call_operand.vmem [shape: bf16[128,128], index: 3, kind: input, shape index: {}]   ;;  %s1121_s2 = inlined_call_operand.vmem [shape: f32[1,128], index: 2, kind: input, shape index: {}]   ;;  %s1122_s5 = inlined_call_operand.vmem [shape: bf16[128,128], index: 5, kind: input, shape index: {}]   ;;  %s1123_s4 = inlined_call_operand.vmem [shape: f32[1,128], index: 4, kind: input, shape index: {}]   ;;  %s1124_s6 = inlined_call_operand.vmem [shape: f32[1,128], index: 6, kind: input, shape index: {}]   ;;  %s1125_s7 = inlined_call_operand.vmem [shape: f32[16,128], index: 7, kind: output, shape index: {}]  }
   0x1   :  { %v817_v0 = vld [vmem:[%s1118_s1 + $0x40] sm:$0xff]   ;;  %v821_v4 = vld [vmem:[%s1118_s1 + $0x48] sm:$0xff]   ;;  %v825_v8 = vld [vmem:[%s1118_s1 + $0x50] sm:$0xff]  }
   0x2   :  { %v818_v1 = vld [vmem:[%s1118_s1 + $0xc0] sm:$0xff]   ;;  %713 = vmatprep.subr.bf16.mxu0 %v817_v0  ;;  %v822_v5 = vld [vmem:[%s1118_s1 + $0xc8] sm:$0xff]   ;;  %v826_v9 = vld [vmem:[%s1118_s1 + $0xd0] sm:$0xff]  }
   0x3   :  { %v819_v2 = vld [vmem:[%s1118_s1] sm:$0xff]   ;;  %735 = vmatprep.subr.bf16.mxu1 %v818_v1  ;;  %v823_v6 = vld [vmem:[%s1118_s1 + $0x8] sm:$0xff]   ;;  %v827_v10 = vld [vmem:[%s1118_s1 + $0x10] sm:$0xff]  }
   0x4   :  { %v820_v3 = vld [vmem:[%s1118_s1 + $0x80] sm:$0xff]   ;;  %714 = vmatpush3.bf16.msra.mxu0 %v819_v2  ;;  %v824_v7 = vld [vmem:[%s1118_s1 + $0x88] sm:$0xff]   ;;  %v828_v11 = vld [vmem:[%s1118_s1 + $0x90] sm:$0xff]  }
   0x5   :  { %736 = vmatpush3.bf16.msra.mxu1 %v820_v3  ;;  %715 = vmatprep.subr.bf16.mxu0 %v821_v4  ;;  %v829_v12 = vld [vmem:[%s1118_s1 + $0x58] sm:$0xff]   ;;  %v833_v16 = vld [vmem:[%s1118_s1 + $0x60] sm:$0xff]   ;;  %v837_v20 = vld [vmem:[%s1118_s1 + $0x68] sm:$0xff]  }
   0x6   :  { %737 = vmatprep.subr.bf16.mxu1 %v822_v5  ;;  %v830_v13 = vld [vmem:[%s1118_s1 + $0xd8] sm:$0xff]   ;;  %v834_v17 = vld [vmem:[%s1118_s1 + $0xe0] sm:$0xff]   ;;  %v838_v21 = vld [vmem:[%s1118_s1 + $0xe8] sm:$0xff]  }
   0x7   :  { %v831_v14 = vld [vmem:[%s1118_s1 + $0x18] sm:$0xff]   ;;  %v835_v18 = vld [vmem:[%s1118_s1 + $0x20] sm:$0xff]   ;;  %v839_v22 = vld [vmem:[%s1118_s1 + $0x28] sm:$0xff]  }
   0x8   :  { %716 = vmatpush3.bf16.msra.mxu0 %v823_v6  ;;  %v832_v15 = vld [vmem:[%s1118_s1 + $0x98] sm:$0xff]   ;;  %v836_v19 = vld [vmem:[%s1118_s1 + $0xa0] sm:$0xff]   ;;  %v840_v23 = vld [vmem:[%s1118_s1 + $0xa8] sm:$0xff]  }
   0x9   :  { %738 = vmatpush3.bf16.msra.mxu1 %v824_v7  ;;  %717 = vmatprep.subr.bf16.mxu0 %v825_v8  ;;  %v841_v24 = vld [vmem:[%s1118_s1 + $0x70] sm:$0xff]   ;;  %v845_v28 = vld [vmem:[%s1118_s1 + $0x78] sm:$0xff]   ;;  %v855_v37 = vld [vmem:[%s1120_s3] sm:$0xff]  }
   0xa   :  { %739 = vmatprep.subr.bf16.mxu1 %v826_v9  ;;  %v842_v25 = vld [vmem:[%s1118_s1 + $0xf0] sm:$0xff]   ;;  %v846_v29 = vld [vmem:[%s1118_s1 + $0xf8] sm:$0xff]   ;;  %v856_v38 = vld [vmem:[%s1120_s3 + $0x8] sm:$0xff]  }
   0xb   :  { %v843_v26 = vld [vmem:[%s1118_s1 + $0x30] sm:$0xff]   ;;  %v847_v30 = vld [vmem:[%s1118_s1 + $0x38] sm:$0xff]   ;;  %v859_v41 = vld [vmem:[%s1120_s3 + $0x20] sm:$0xff]  }
   0xc   :  { %718 = vmatpush3.bf16.msra.mxu0 %v827_v10  ;;  %v844_v27 = vld [vmem:[%s1118_s1 + $0xb0] sm:$0xff]   ;;  %v848_v31 = vld [vmem:[%s1118_s1 + $0xb8] sm:$0xff]   ;;  %v860_v42 = vld [vmem:[%s1120_s3 + $0x28] sm:$0xff]  }
   0xd   :  { %740 = vmatpush3.bf16.msra.mxu1 %v828_v11  ;;  %719 = vmatprep.subr.bf16.mxu0 %v829_v12  ;;  %v849_v32 = vld [vmem:[%s1119_s0] ss:$16 sps:$4 sm:$0xff]   ;;  %v851_v33 = vld [vmem:[%s1119_s0 + $0x4] ss:$16 sps:$4 sm:$0xff]   ;;  %v852_v35 = vld [vmem:[%s1119_s0 + $0x8] ss:$16 sps:$4 sm:$0xff]  }
   0xe   :  { %741 = vmatprep.subr.bf16.mxu1 %v830_v13  ;;  %v854_v36 = vld [vmem:[%s1119_s0 + $0xc] ss:$16 sps:$4 sm:$0xff]   ;;  %346 = vmatprep.mubr.bf16.mxu0 %v851_v33  ;;  %v857_v39 = vld [vmem:[%s1120_s3 + $0x10] sm:$0xff]   ;;  %v658_v47 = vld [vmem:[%s1121_s2] ss:$0 sm:$0xff] }
   0xf   :  { %387 = vmatprep.mubr.bf16.mxu1 %v854_v36  ;;  %v858_v40 = vld [vmem:[%s1120_s3 + $0x18] sm:$0xff]   ;;  %v861_v43 = vld [vmem:[%s1120_s3 + $0x30] sm:$0xff]   ;;  %v863_v63 = vld [vmem:[%s1122_s5] sm:$0xff]  }
  0x10   :  { %720 = vmatpush3.bf16.msra.mxu0 %v831_v14  ;;  %v862_v44 = vld [vmem:[%s1120_s3 + $0x38] sm:$0xff]   ;;  %v864_v0 = vld [vmem:[%s1122_s5 + $0x8] sm:$0xff]   ;;  %v865_v1 = vld [vmem:[%s1122_s5 + $0x10] sm:$0xff]  }
  0x11   :  { %742 = vmatpush3.bf16.msra.mxu1 %v832_v15  ;;  %721 = vmatprep.subr.bf16.mxu0 %v833_v16  ;;  %v866_v2 = vld [vmem:[%s1122_s5 + $0x18] sm:$0xff]   ;;  %v867_v3 = vld [vmem:[%s1122_s5 + $0x20] sm:$0xff]   ;;  %v868_v4 = vld [vmem:[%s1122_s5 + $0x28] sm:$0xff]  }
  0x12   :  { %743 = vmatprep.subr.bf16.mxu1 %v834_v17  ;;  %v869_v5 = vld [vmem:[%s1122_s5 + $0x30] sm:$0xff]   ;;  %v870_v6 = vld [vmem:[%s1122_s5 + $0x38] sm:$0xff]   ;;  %v695_v7 = vld [vmem:[%s1123_s4] ss:$0 sm:$0xff] }
  0x14   :  { %722 = vmatpush3.bf16.msra.mxu0 %v835_v18 }
  0x15   :  { %744 = vmatpush3.bf16.msra.mxu1 %v836_v19  ;;  %723 = vmatprep.subr.bf16.mxu0 %v837_v20 }
  0x16   :  { %745 = vmatprep.subr.bf16.mxu1 %v838_v21 }
  0x18   :  { %724 = vmatpush3.bf16.msra.mxu0 %v839_v22 }
  0x19   :  { %746 = vmatpush3.bf16.msra.mxu1 %v840_v23  ;;  %725 = vmatprep.subr.bf16.mxu0 %v841_v24 }
  0x1a   :  { %747 = vmatprep.subr.bf16.mxu1 %v842_v25 }
  0x1c   :  { %726 = vmatpush3.bf16.msra.mxu0 %v843_v26 }
  0x1d   :  { %748 = vmatpush3.bf16.msra.mxu1 %v844_v27  ;;  %727 = vmatprep.subr.bf16.mxu0 %v845_v28  ;;  %v704_v27 = vld [vmem:[%s1124_s6] ss:$0 sm:$0xff] }
  0x1e   :  { %749 = vmatprep.subr.bf16.mxu1 %v846_v29 }
  0x20   :  { %728 = vmatpush3.bf16.msra.mxu0 %v847_v30 }
  0x21   :  { %750 = vmatpush3.bf16.msra.mxu1 %v848_v31  ;;  %775 = vmatprep.subr.bf16.mxu0 %v887_v34 }
  0x22   :  { %795 = vmatprep.subr.bf16.mxu1 %v887_v34 }
  0x23   :  { %347 = vmatmul.mubr.bf16.vlgmr.msra.gmra.mrb[0].mxu0 %v849_v32 }
  0x24   :  { %388 = vmatmul.mubr.bf16.vlgmr.msra.gmra.mrb[0].mxu1 %v852_v35  ;;  %776 = vmatpush3.bf16.msra.mxu0 %v855_v37 }
  0x25   :  { %777 = vmatprep.subr.bf16.mxu0 %v887_v34  ;;  %791 = vmatprep.mubr.msk.bf16.mxu0 %vm888_vm0, %v887_v34 }
  0x26   :  { %811 = vmatprep.mubr.msk.bf16.mxu1 %vm888_vm0, %v887_v34  ;;  %796 = vmatpush3.bf16.msra.mxu1 %v863_v63 }
  0x27   :  { %797 = vmatprep.subr.bf16.mxu1 %v887_v34 }
  0x28   :  { %778 = vmatpush3.bf16.msra.mxu0 %v856_v38 }
  0x29   :  { %779 = vmatprep.subr.bf16.mxu0 %v887_v34 }
  0x2a   :  { %798 = vmatpush3.bf16.msra.mxu1 %v864_v0 }
  0x2b   :  { %799 = vmatprep.subr.bf16.mxu1 %v887_v34 }
  0x2c   :  { %780 = vmatpush3.bf16.msra.mxu0 %v857_v39 }
  0x2d   :  { %781 = vmatprep.subr.bf16.mxu0 %v887_v34 }
  0x2e   :  { %800 = vmatpush3.bf16.msra.mxu1 %v865_v1 }
  0x2f   :  { %801 = vmatprep.subr.bf16.mxu1 %v887_v34 }
  0x30   :  { %782 = vmatpush3.bf16.msra.mxu0 %v858_v40 }
  0x31   :  { %783 = vmatprep.subr.bf16.mxu0 %v887_v34 }
  0x32   :  { %802 = vmatpush3.bf16.msra.mxu1 %v866_v2 }
  0x33   :  { %803 = vmatprep.subr.bf16.mxu1 %v887_v34 }
  0x34   :  { %784 = vmatpush3.bf16.msra.mxu0 %v859_v41 }
  0x35   :  { %785 = vmatprep.subr.bf16.mxu0 %v887_v34 }
  0x36   :  { %804 = vmatpush3.bf16.msra.mxu1 %v867_v3 }
  0x37   :  { %805 = vmatprep.subr.bf16.mxu1 %v887_v34 }
  0x38   :  { %786 = vmatpush3.bf16.msra.mxu0 %v860_v42 }
  0x39   :  { %787 = vmatprep.subr.bf16.mxu0 %v887_v34 }
  0x3a   :  { %806 = vmatpush3.bf16.msra.mxu1 %v868_v4 }
  0x3b   :  { %807 = vmatprep.subr.bf16.mxu1 %v887_v34 }
  0x3c   :  { %788 = vmatpush3.bf16.msra.mxu0 %v861_v43 }
  0x3d   :  { %789 = vmatprep.subr.bf16.mxu0 %v887_v34 }
  0x3e   :  { %808 = vmatpush3.bf16.msra.mxu1 %v869_v5 }
  0x3f   :  { %809 = vmatprep.subr.bf16.mxu1 %v887_v34 }
  0x40   :  { %790 = vmatpush3.bf16.msra.mxu0 %v862_v44 }
  0x42   :  { %810 = vmatpush3.bf16.msra.mxu1 %v870_v6 }
  0xf6   :  { %v729_v45 = vpop.f32.mrb[0].mxu0 }
  0xf7   :  { %v751_v46 = vpop.f32.mrb[0].mxu1  ;;  %v730_v48 = vpop.f32.mrb[1].mxu0 }
  0xf8   :  { %v731_v49 = vadd.f32 %v730_v48, %v729_v45  ;;  %v752_v50 = vpop.f32.mrb[1].mxu1  ;;  %v732_v51 = vpop.f32.mrb[2].mxu0 }
  0xf9   :  { %v753_v52 = vadd.f32 %v752_v50, %v751_v46  ;;  %v754_v53 = vpop.f32.mrb[2].mxu1  ;;  %v733_v54 = vpop.f32.mrb[3].mxu0 }
  0xfa   :  { %v349_v55 = vadd.f32 %v731_v49, %v658_v47  ;;  %v734_v56 = vadd.f32 %v733_v54, %v732_v51  ;;  %v755_v57 = vpop.f32.mrb[3].mxu1 }
  0xfb   :  { %v756_v58 = vadd.f32 %v755_v57, %v754_v53 }
  0xfc   :  { %v390_v59 = vadd.f32 %v753_v52, %v349_v55  ;;  %v352_v60 = vadd.f32 %v734_v56, %v658_v47 }
  0xfe   :  { %v393_v61 = vadd.f32 %v756_v58, %v352_v60 }
 0x100   :  { %v396_v62 = vpack.c.bf16 %v393_v61, %v390_v59 }
 0x102   :  { %792 = vmatmul.mubr.bf16.vlgmr.msra.gmra.mrb[4].mxu0 %v396_v62 }
 0x1d5   :  { %v502_v8 = vpop.f32.mrb[4].mxu0 }
 0x1d6   :  { %v503_v9 = vadd.f32 %v695_v7, %v502_v8  ;;  %v793_v10 = vpop.f32.mrb[5].mxu0 }
 0x1d7   :  { %v505_v11 = vpop.f32.mrb[6].mxu0 }
 0x1d8   :  { %v509_v12 = vmax.f32 %v503_v9, -30.0  ;;  %v506_v13 = vadd.f32 %v695_v7, %v505_v11  ;;  %v794_v14 = vpop.f32.mrb[7].mxu0 }
 0x1da   :  { %v511_v15 = vsub.f32 0.0, %v509_v12  ;;  %v510_v16 = vmax.f32 %v506_v13, -30.0 }
 0x1dc   :  { %v513_v17 = vmul.f32 1.442695, %v511_v15  ;;  %v512_v18 = vsub.f32 0.0, %v510_v16 }
 0x1de   :  { %871 = vpow2.f32 %v513_v17  ;;  %v515_v19 = vmul.f32 1.442695, %v512_v18 }
 0x1e0   :  { %873 = vpow2.f32 %v515_v19 }
 0x1e8   :  { %v872_v20 = vpop.eup %871 }
 0x1e9   :  { %v517_v21 = vadd.f32 1.0, %v872_v20 }
 0x1ea   :  { %v874_v22 = vpop.eup %873 }
 0x1eb   :  { %v518_v23 = vadd.f32 1.0, %v874_v22  ;;  %875 = vrcp.f32 %v517_v21 }
 0x1ed   :  { %877 = vrcp.f32 %v518_v23 }
 0x1f5   :  { %v876_v24 = vpop.eup %875 }
 0x1f7   :  { %v878_v25 = vpop.eup %877 }
 0x1f8   :  { %v521_v26 = vpack.c.bf16 %v878_v25, %v876_v24 }
 0x1fa   :  { %812 = vmatmul.mubr.bf16.vlgmr.msra.gmra.mrb[4].mxu1 %v521_v26 }
 0x2cd   :  { %v627_v28 = vpop.f32.mrb[4].mxu1 }
 0x2ce   :  { %v628_v29 = vadd.f32 %v704_v27, %v627_v28  ;;  %v813_v30 = vpop.f32.mrb[5].mxu1 }
 0x2cf   :  { %v630_v31 = vpop.f32.mrb[6].mxu1 }
 0x2d0   :  { %634 = vmax.xlane.f32.xlu0 %v628_v29  ;;  %v814_v32 = vpop.f32.mrb[7].mxu1  ;;  %v631_v33 = vadd.f32 %v704_v27, %v630_v31 }
 0x2d4   :  { %636 = vmax.xlane.f32.xlu0 %v631_v33 }
 0x35d   :  { %v635_v34 = vpop.xlane.xlu0 %634 }
 0x35e   :  { %v638_v35 = vsub.f32 %v628_v29, %v635_v34 }
 0x360   :  { %v640_v36 = vmul.f32 1.442695, %v638_v35 }
 0x361   :  { %v637_v37 = vpop.xlane.xlu0 %636 }
 0x362   :  { %879 = vpow2.f32 %v640_v36  ;;  %v639_v38 = vsub.f32 %v631_v33, %v637_v37 }
 0x364   :  { %v642_v39 = vmul.f32 1.442695, %v639_v38 }
 0x366   :  { %881 = vpow2.f32 %v642_v39 }
 0x36c   :  { %v880_v40 = vpop.eup %879 }
 0x36d   :  { %644 = vadd.xlane.f32.xlu1 %v880_v40 }
 0x370   :  { %v882_v41 = vpop.eup %881 }
 0x371   :  { %646 = vadd.xlane.f32.xlu1 %v882_v41 }
 0x3fa   :  { %v645_v42 = vpop.xlane.xlu1 %644 }
 0x3fb   :  { %883 = vrcp.f32 %v645_v42 }
 0x3fe   :  { %v647_v43 = vpop.xlane.xlu1 %646 }
 0x3ff   :  { %885 = vrcp.f32 %v647_v43 }
 0x405   :  { %v884_v44 = vpop.eup %883 }
 0x406   :  { %v649_v45 = vmul.f32 %v884_v44, %v880_v40 }
 0x408   :  { %652 = vst [vmem:[%s1125_s7] sm:$0xff] %v649_v45 }
 0x409   :  { %v886_v46 = vpop.eup %885 }
 0x40a   :  { %v651_v47 = vmul.f32 %v886_v46, %v882_v41 }
 0x40c   :  { %653 = vst [vmem:[%s1125_s7 + $0x8] sm:$0xff] %v651_v47 }

// kernel: lenet_forward.4
= control target key start
LH: loop header
LB: loop body
LE: loop exit
PB: predicated region body
PF: predicated region fallthrough
CT: control target
= control target key end

     0   :  { %s1437_s1 = inlined_call_operand.vmem [shape: bf16[256,128], index: 1, kind: input, shape index: {}]   ;;  %s1438_s0 = inlined_call_operand.vmem [shape: bf16[4,64,256], index: 0, kind: input, shape index: {}]   ;;  %s1439_s2 = inlined_call_operand.vmem [shape: f32[1,128], index: 2, kind: input, shape index: {}]   ;;  %s1440_s3 = inlined_call_operand.vmem [shape: bf16[64,128], index: 3, kind: output, shape index: {}]  }
   0x1   :  { %v987_v0 = vld [vmem:[%s1437_s1 + $0x40] sm:$0xff]   ;;  %v989_v2 = vld [vmem:[%s1437_s1 + $0x48] sm:$0xff]   ;;  %v991_v4 = vld [vmem:[%s1437_s1 + $0x50] sm:$0xff]  }
   0x2   :  { %v988_v1 = vld [vmem:[%s1437_s1] sm:$0xff]   ;;  %859 = vmatprep.subr.bf16.mxu0 %v987_v0  ;;  %971 = vmatprep.subr.bf16.mxu1 %v987_v0  ;;  %v990_v3 = vld [vmem:[%s1437_s1 + $0x8] sm:$0xff]   ;;  %v992_v5 = vld [vmem:[%s1437_s1 + $0x10] sm:$0xff]  }
   0x3   :  { %860 = vmatpush3.bf16.msra.mxu0 %v988_v1  ;;  %979 = vmatpush3.bf16.msra.mxu1 %v988_v1  ;;  %v993_v6 = vld [vmem:[%s1437_s1 + $0x58] sm:$0xff]   ;;  %v995_v8 = vld [vmem:[%s1437_s1 + $0x60] sm:$0xff]   ;;  %v997_v10 = vld [vmem:[%s1437_s1 + $0x68] sm:$0xff]  }
   0x4   :  { %861 = vmatprep.subr.bf16.mxu0 %v989_v2  ;;  %972 = vmatprep.subr.bf16.mxu1 %v989_v2  ;;  %v994_v7 = vld [vmem:[%s1437_s1 + $0x18] sm:$0xff]   ;;  %v996_v9 = vld [vmem:[%s1437_s1 + $0x20] sm:$0xff]   ;;  %v998_v13 = vld [vmem:[%s1437_s1 + $0x28] sm:$0xff]  }
   0x5   :  { %v1005_v11 = vld [vmem:[%s1438_s0 + $0x4] ss:$8 sps:$4 sm:$0xff]   ;;  %v999_v14 = vld [vmem:[%s1437_s1 + $0x70] sm:$0xff]   ;;  %v1001_v16 = vld [vmem:[%s1437_s1 + $0x78] sm:$0xff]  }
   0x6   :  { %v1008_v12 = vld [vmem:[%s1438_s0 + $0x84] ss:$8 sps:$4 sm:$0xff]   ;;  %374 = vmatprep.mubr.bf16.mxu0 %v1005_v11  ;;  %v1000_v15 = vld [vmem:[%s1437_s1 + $0x30] sm:$0xff]   ;;  %v1002_v17 = vld [vmem:[%s1437_s1 + $0x38] sm:$0xff]  }
   0x7   :  { %862 = vmatpush3.bf16.msra.mxu0 %v990_v3  ;;  %980 = vmatpush3.bf16.msra.mxu1 %v990_v3  ;;  %v1003_v18 = vld [vmem:[%s1438_s0] ss:$8 sps:$4 sm:$0xff]   ;;  %v1009_v20 = vld [vmem:[%s1438_s0 + $0x14] ss:$8 sps:$4 sm:$0xff]   ;;  %v1011_v22 = vld [vmem:[%s1438_s0 + $0x10] ss:$8 sps:$4 sm:$0xff]  }
   0x8   :  { %863 = vmatprep.subr.bf16.mxu0 %v991_v4  ;;  %973 = vmatprep.subr.bf16.mxu1 %v991_v4  ;;  %v1006_v19 = vld [vmem:[%s1438_s0 + $0x80] ss:$8 sps:$4 sm:$0xff]   ;;  %v1012_v21 = vld [vmem:[%s1438_s0 + $0x94] ss:$8 sps:$4 sm:$0xff]   ;;  %v1014_v23 = vld [vmem:[%s1438_s0 + $0x90] ss:$8 sps:$4 sm:$0xff]  }
   0x9   :  { %438 = vmatprep.mubr.bf16.mxu1 %v1008_v12  ;;  %v1015_v24 = vld [vmem:[%s1438_s0 + $0x24] ss:$8 sps:$4 sm:$0xff]   ;;  %v1017_v26 = vld [vmem:[%s1438_s0 + $0x20] ss:$8 sps:$4 sm:$0xff]   ;;  %v1021_v28 = vld [vmem:[%s1438_s0 + $0x34] ss:$8 sps:$4 sm:$0xff]  }
   0xa   :  { %v1018_v25 = vld [vmem:[%s1438_s0 + $0xa4] ss:$8 sps:$4 sm:$0xff]   ;;  %v1020_v27 = vld [vmem:[%s1438_s0 + $0xa0] ss:$8 sps:$4 sm:$0xff]   ;;  %v1024_v29 = vld [vmem:[%s1438_s0 + $0xb4] ss:$8 sps:$4 sm:$0xff]  }
   0xb   :  { %864 = vmatpush3.bf16.msra.mxu0 %v992_v5  ;;  %981 = vmatpush3.bf16.msra.mxu1 %v992_v5  ;;  %v1023_v30 = vld [vmem:[%s1438_s0 + $0x30] ss:$8 sps:$4 sm:$0xff]   ;;  %v1027_v32 = vld [vmem:[%s1438_s0 + $0x44] ss:$8 sps:$4 sm:$0xff]   ;;  %v1029_v34 = vld [vmem:[%s1438_s0 + $0x40] ss:$8 sps:$4 sm:$0xff]  }
   0xc   :  { %865 = vmatprep.subr.bf16.mxu0 %v993_v6  ;;  %974 = vmatprep.subr.bf16.mxu1 %v993_v6  ;;  %v1026_v31 = vld [vmem:[%s1438_s0 + $0xb0] ss:$8 sps:$4 sm:$0xff]   ;;  %v1030_v33 = vld [vmem:[%s1438_s0 + $0xc4] ss:$8 sps:$4 sm:$0xff]   ;;  %v1032_v35 = vld [vmem:[%s1438_s0 + $0xc0] ss:$8 sps:$4 sm:$0xff]  }
   0xd   :  { %v1033_v36 = vld [vmem:[%s1438_s0 + $0x54] ss:$8 sps:$4 sm:$0xff]   ;;  %v1035_v38 = vld [vmem:[%s1438_s0 + $0x50] ss:$8 sps:$4 sm:$0xff]   ;;  %v1039_v40 = vld [vmem:[%s1438_s0 + $0x64] ss:$8 sps:$4 sm:$0xff]  }
   0xe   :  { %v1036_v37 = vld [vmem:[%s1438_s0 + $0xd4] ss:$8 sps:$4 sm:$0xff]   ;;  %v1038_v39 = vld [vmem:[%s1438_s0 + $0xd0] ss:$8 sps:$4 sm:$0xff]   ;;  %v1042_v41 = vld [vmem:[%s1438_s0 + $0xe4] ss:$8 sps:$4 sm:$0xff]  }
   0xf   :  { %866 = vmatpush3.bf16.msra.mxu0 %v994_v7  ;;  %982 = vmatpush3.bf16.msra.mxu1 %v994_v7  ;;  %v1041_v42 = vld [vmem:[%s1438_s0 + $0x60] ss:$8 sps:$4 sm:$0xff]   ;;  %v1045_v44 = vld [vmem:[%s1438_s0 + $0x74] ss:$8 sps:$4 sm:$0xff]   ;;  %v1047_v46 = vld [vmem:[%s1438_s0 + $0x70] ss:$8 sps:$4 sm:$0xff]  }
  0x10   :  { %867 = vmatprep.subr.bf16.mxu0 %v995_v8  ;;  %975 = vmatprep.subr.bf16.mxu1 %v995_v8  ;;  %v1044_v43 = vld [vmem:[%s1438_s0 + $0xe0] ss:$8 sps:$4 sm:$0xff]   ;;  %v1048_v45 = vld [vmem:[%s1438_s0 + $0xf4] ss:$8 sps:$4 sm:$0xff]   ;;  %v1050_v47 = vld [vmem:[%s1438_s0 + $0xf0] ss:$8 sps:$4 sm:$0xff]  }
  0x11   :  { %v1346_v50 = vld [vmem:[%s1439_s2] ss:$0 sm:$0xff] }
  0x13   :  { %868 = vmatpush3.bf16.msra.mxu0 %v996_v9  ;;  %983 = vmatpush3.bf16.msra.mxu1 %v996_v9 }
  0x14   :  { %869 = vmatprep.subr.bf16.mxu0 %v997_v10  ;;  %976 = vmatprep.subr.bf16.mxu1 %v997_v10 }
  0x17   :  { %870 = vmatpush3.bf16.msra.mxu0 %v998_v13  ;;  %984 = vmatpush3.bf16.msra.mxu1 %v998_v13 }
  0x18   :  { %871 = vmatprep.subr.bf16.mxu0 %v999_v14  ;;  %977 = vmatprep.subr.bf16.mxu1 %v999_v14 }
  0x1b   :  { %872 = vmatpush3.bf16.msra.mxu0 %v1000_v15  ;;  %985 = vmatpush3.bf16.msra.mxu1 %v1000_v15 }
  0x1c   :  { %873 = vmatprep.subr.bf16.mxu0 %v1001_v16  ;;  %978 = vmatprep.subr.bf16.mxu1 %v1001_v16 }
  0x1f   :  { %874 = vmatpush3.bf16.msra.mxu0 %v1002_v17  ;;  %986 = vmatpush3.bf16.msra.mxu1 %v1002_v17 }
  0x22   :  { %375 = vmatmul.mubr.bf16.vlgmr.msra.gmra.mrb[0].mxu0 %v1003_v18  ;;  %439 = vmatmul.mubr.bf16.vlgmr.msra.gmra.mrb[0].mxu1 %v1006_v19 }
  0x23   :  { %382 = vmatprep.mubr.bf16.mxu0 %v1009_v20  ;;  %446 = vmatprep.mubr.bf16.mxu1 %v1012_v21 }
  0x2a   :  { %383 = vmatmul.mubr.bf16.gmra.mrb[4].mxu0 %v1011_v22  ;;  %447 = vmatmul.mubr.bf16.gmra.mrb[4].mxu1 %v1014_v23 }
  0x2b   :  { %390 = vmatprep.mubr.bf16.mxu0 %v1015_v24  ;;  %454 = vmatprep.mubr.bf16.mxu1 %v1018_v25 }
  0x32   :  { %391 = vmatmul.mubr.bf16.gmra.mrb[8].mxu0 %v1017_v26  ;;  %455 = vmatmul.mubr.bf16.gmra.mrb[8].mxu1 %v1020_v27 }
  0x33   :  { %398 = vmatprep.mubr.bf16.mxu0 %v1021_v28  ;;  %462 = vmatprep.mubr.bf16.mxu1 %v1024_v29 }
  0x3a   :  { %399 = vmatmul.mubr.bf16.gmra.mrb[12].mxu0 %v1023_v30  ;;  %463 = vmatmul.mubr.bf16.gmra.mrb[12].mxu1 %v1026_v31 }
  0x3b   :  { %406 = vmatprep.mubr.bf16.mxu0 %v1027_v32  ;;  %470 = vmatprep.mubr.bf16.mxu1 %v1030_v33 }
  0x42   :  { %407 = vmatmul.mubr.bf16.gmra.mrb[16].mxu0 %v1029_v34  ;;  %471 = vmatmul.mubr.bf16.gmra.mrb[16].mxu1 %v1032_v35 }
  0x43   :  { %414 = vmatprep.mubr.bf16.mxu0 %v1033_v36  ;;  %478 = vmatprep.mubr.bf16.mxu1 %v1036_v37 }
  0x4a   :  { %415 = vmatmul.mubr.bf16.gmra.mrb[20].mxu0 %v1035_v38  ;;  %479 = vmatmul.mubr.bf16.gmra.mrb[20].mxu1 %v1038_v39 }
  0x4b   :  { %422 = vmatprep.mubr.bf16.mxu0 %v1039_v40  ;;  %486 = vmatprep.mubr.bf16.mxu1 %v1042_v41 }
  0x52   :  { %423 = vmatmul.mubr.bf16.gmra.mrb[24].mxu0 %v1041_v42  ;;  %487 = vmatmul.mubr.bf16.gmra.mrb[24].mxu1 %v1044_v43 }
  0x53   :  { %430 = vmatprep.mubr.bf16.mxu0 %v1045_v44  ;;  %494 = vmatprep.mubr.bf16.mxu1 %v1048_v45 }
  0x5a   :  { %431 = vmatmul.mubr.bf16.gmra.mrb[28].mxu0 %v1047_v46  ;;  %495 = vmatmul.mubr.bf16.gmra.mrb[28].mxu1 %v1050_v47 }
  0xf5   :  { %v875_v48 = vpop.f32.mrb[0].mxu0  ;;  %v923_v49 = vpop.f32.mrb[0].mxu1 }
  0xf6   :  { %v876_v51 = vpop.f32.mrb[1].mxu0  ;;  %v924_v52 = vpop.f32.mrb[1].mxu1 }
  0xf7   :  { %v877_v53 = vadd.f32 %v876_v51, %v875_v48  ;;  %v878_v54 = vpop.f32.mrb[2].mxu0  ;;  %v925_v55 = vadd.f32 %v924_v52, %v923_v49  ;;  %v926_v56 = vpop.f32.mrb[2].mxu1 }
  0xf8   :  { %v879_v57 = vpop.f32.mrb[3].mxu0  ;;  %v927_v58 = vpop.f32.mrb[3].mxu1 }
  0xf9   :  { %v377_v59 = vadd.f32 %v877_v53, %v1346_v50  ;;  %v441_v60 = vadd.f32 %v925_v55, %v1346_v50  ;;  %v880_v61 = vadd.f32 %v879_v57, %v878_v54  ;;  %v928_v62 = vadd.f32 %v927_v58, %v926_v56 }
  0xfb   :  { %v503_v63 = vmax.f32 %v377_v59, -30.0  ;;  %v519_v0 = vmax.f32 %v441_v60, -30.0  ;;  %v380_v1 = vadd.f32 %v880_v61, %v1346_v50  ;;  %v444_v2 = vadd.f32 %v928_v62, %v1346_v50 }
  0xfd   :  { %v535_v3 = vsub.f32 0.0, %v503_v63  ;;  %v551_v4 = vsub.f32 0.0, %v519_v0  ;;  %v504_v5 = vmax.f32 %v380_v1, -30.0  ;;  %v520_v6 = vmax.f32 %v444_v2, -30.0  ;;  %v881_v7 = vpop.f32.mrb[4].mxu0  ;;  %v929_v8 = vpop.f32.mrb[4].mxu1 }
  0xfe   :  { %v882_v9 = vpop.f32.mrb[5].mxu0  ;;  %v930_v10 = vpop.f32.mrb[5].mxu1 }
  0xff   :  { %v567_v11 = vmul.f32 1.442695, %v535_v3  ;;  %v599_v12 = vmul.f32 1.442695, %v551_v4  ;;  %v536_v13 = vsub.f32 0.0, %v504_v5  ;;  %v552_v14 = vsub.f32 0.0, %v520_v6 }
 0x100   :  { %v883_v15 = vadd.f32 %v882_v9, %v881_v7  ;;  %v884_v16 = vpop.f32.mrb[6].mxu0  ;;  %v931_v17 = vadd.f32 %v930_v10, %v929_v8  ;;  %v932_v18 = vpop.f32.mrb[6].mxu1 }
 0x101   :  { %1051 = vpow2.f32 %v567_v11  ;;  %v569_v19 = vmul.f32 1.442695, %v536_v13  ;;  %v601_v20 = vmul.f32 1.442695, %v552_v14  ;;  %v885_v21 = vpop.f32.mrb[7].mxu0  ;;  %v933_v22 = vpop.f32.mrb[7].mxu1 }
 0x102   :  { %1053 = vpow2.f32 %v599_v12  ;;  %v385_v23 = vadd.f32 %v883_v15, %v1346_v50  ;;  %v449_v24 = vadd.f32 %v931_v17, %v1346_v50  ;;  %v886_v25 = vadd.f32 %v885_v21, %v884_v16 }
 0x103   :  { %1055 = vpow2.f32 %v569_v19  ;;  %v934_v26 = vadd.f32 %v933_v22, %v932_v18 }
 0x104   :  { %1057 = vpow2.f32 %v601_v20  ;;  %v505_v27 = vmax.f32 %v385_v23, -30.0  ;;  %v521_v28 = vmax.f32 %v449_v24, -30.0  ;;  %v388_v29 = vadd.f32 %v886_v25, %v1346_v50 }
 0x105   :  { %v452_v30 = vadd.f32 %v934_v26, %v1346_v50  ;;  %v887_v31 = vpop.f32.mrb[8].mxu0  ;;  %v935_v32 = vpop.f32.mrb[8].mxu1 }
 0x106   :  { %v537_v33 = vsub.f32 0.0, %v505_v27  ;;  %v553_v34 = vsub.f32 0.0, %v521_v28  ;;  %v506_v35 = vmax.f32 %v388_v29, -30.0  ;;  %v888_v36 = vpop.f32.mrb[9].mxu0  ;;  %v936_v37 = vpop.f32.mrb[9].mxu1 }
 0x107   :  { %v522_v38 = vmax.f32 %v452_v30, -30.0  ;;  %v889_v39 = vadd.f32 %v888_v36, %v887_v31  ;;  %v890_v40 = vpop.f32.mrb[10].mxu0  ;;  %v937_v41 = vadd.f32 %v936_v37, %v935_v32  ;;  %v938_v42 = vpop.f32.mrb[10].mxu1 }
 0x108   :  { %v571_v43 = vmul.f32 1.442695, %v537_v33  ;;  %v603_v44 = vmul.f32 1.442695, %v553_v34  ;;  %v538_v45 = vsub.f32 0.0, %v506_v35  ;;  %v891_v46 = vpop.f32.mrb[11].mxu0 }
 0x109   :  { %v554_v47 = vsub.f32 0.0, %v522_v38  ;;  %v393_v48 = vadd.f32 %v889_v39, %v1346_v50  ;;  %v457_v49 = vadd.f32 %v937_v41, %v1346_v50  ;;  %v892_v51 = vadd.f32 %v891_v46, %v890_v40  ;;  %v939_v52 = vpop.f32.mrb[11].mxu1 }
 0x10a   :  { %v573_v53 = vmul.f32 1.442695, %v538_v45  ;;  %v940_v54 = vadd.f32 %v939_v52, %v938_v42  ;;  %1059 = vpow2.f32 %v571_v43 }
 0x10b   :  { %v1052_v55 = vpop.eup %1051  ;;  %v605_v56 = vmul.f32 1.442695, %v554_v47  ;;  %v507_v57 = vmax.f32 %v393_v48, -30.0  ;;  %v523_v58 = vmax.f32 %v457_v49, -30.0  ;;  %v396_v60 = vadd.f32 %v892_v51, %v1346_v50 }
 0x10c   :  { %v1054_v59 = vpop.eup %1053  ;;  %v460_v61 = vadd.f32 %v940_v54, %v1346_v50  ;;  %v631_v63 = vadd.f32 1.0, %v1052_v55  ;;  %1061 = vpow2.f32 %v603_v44 }
 0x10d   :  { %v1056_v62 = vpop.eup %1055  ;;  %v893_v0 = vpop.f32.mrb[12].mxu0  ;;  %1063 = vpow2.f32 %v573_v53  ;;  %v539_v3 = vsub.f32 0.0, %v507_v57  ;;  %v508_v4 = vmax.f32 %v396_v60, -30.0  ;;  %v647_v8 = vadd.f32 1.0, %v1054_v59 }
 0x10e   :  { %v941_v1 = vpop.f32.mrb[12].mxu1  ;;  %v1058_v2 = vpop.eup %1057  ;;  %v524_v5 = vmax.f32 %v460_v61, -30.0  ;;  %1065 = vpow2.f32 %v605_v56  ;;  %v555_v9 = vsub.f32 0.0, %v523_v58  ;;  %v632_v11 = vadd.f32 1.0, %v1056_v62 }
 0x10f   :  { %v894_v6 = vpop.f32.mrb[13].mxu0  ;;  %v942_v7 = vpop.f32.mrb[13].mxu1  ;;  %v540_v12 = vsub.f32 0.0, %v508_v4  ;;  %v648_v16 = vadd.f32 1.0, %v1058_v2  ;;  %1067 = vrcp.f32 %v631_v63  ;;  %v575_v21 = vmul.f32 1.442695, %v539_v3 }
 0x110   :  { %v896_v10 = vpop.f32.mrb[14].mxu0  ;;  %v895_v13 = vadd.f32 %v894_v6, %v893_v0  ;;  %v944_v15 = vpop.f32.mrb[14].mxu1  ;;  %v556_v17 = vsub.f32 0.0, %v524_v5  ;;  %v943_v18 = vadd.f32 %v942_v7, %v941_v1  ;;  %1069 = vrcp.f32 %v647_v8 }
 0x111   :  { %v897_v14 = vpop.f32.mrb[15].mxu0  ;;  %v945_v20 = vpop.f32.mrb[15].mxu1  ;;  %v607_v23 = vmul.f32 1.442695, %v555_v9  ;;  %1071 = vrcp.f32 %v632_v11  ;;  %v577_v26 = vmul.f32 1.442695, %v540_v12 }
 0x112   :  { %v898_v19 = vadd.f32 %v897_v14, %v896_v10  ;;  %v401_v22 = vadd.f32 %v895_v13, %v1346_v50  ;;  %v465_v24 = vadd.f32 %v943_v18, %v1346_v50  ;;  %v946_v25 = vadd.f32 %v945_v20, %v944_v15 }
 0x113   :  { %1073 = vrcp.f32 %v648_v16  ;;  %v609_v27 = vmul.f32 1.442695, %v556_v17 }
 0x114   :  { %v509_v28 = vmax.f32 %v401_v22, -30.0  ;;  %v1060_v31 = vpop.eup %1059  ;;  %1075 = vpow2.f32 %v575_v21  ;;  %v525_v32 = vmax.f32 %v465_v24, -30.0  ;;  %v404_v36 = vadd.f32 %v898_v19, %v1346_v50 }
 0x115   :  { %v899_v29 = vpop.f32.mrb[16].mxu0  ;;  %v947_v30 = vpop.f32.mrb[16].mxu1  ;;  %1077 = vpow2.f32 %v607_v23  ;;  %v468_v40 = vadd.f32 %v946_v25, %v1346_v50  ;;  %v633_v44 = vadd.f32 1.0, %v1060_v31 }
 0x116   :  { %v900_v33 = vpop.f32.mrb[17].mxu0  ;;  %v948_v34 = vpop.f32.mrb[17].mxu1  ;;  %1079 = vpow2.f32 %v577_v26  ;;  %v541_v45 = vsub.f32 0.0, %v509_v28  ;;  %v557_v48 = vsub.f32 0.0, %v525_v32  ;;  %v510_v53 = vmax.f32 %v404_v36, -30.0 }
 0x117   :  { %v1062_v35 = vpop.eup %1061  ;;  %v902_v37 = vpop.f32.mrb[18].mxu0  ;;  %1081 = vpow2.f32 %v609_v27  ;;  %v901_v46 = vadd.f32 %v900_v33, %v899_v29  ;;  %v949_v49 = vadd.f32 %v948_v34, %v947_v30  ;;  %v526_v58 = vmax.f32 %v468_v40, -30.0 }
 0x118   :  { %v950_v38 = vpop.f32.mrb[18].mxu1  ;;  %v1064_v39 = vpop.eup %1063  ;;  %v649_v47 = vadd.f32 1.0, %v1062_v35  ;;  %1083 = vrcp.f32 %v633_v44  ;;  %v579_v62 = vmul.f32 1.442695, %v541_v45  ;;  %v611_v4 = vmul.f32 1.442695, %v557_v48 }
 0x119   :  { %v903_v41 = vpop.f32.mrb[19].mxu0  ;;  %v951_v42 = vpop.f32.mrb[19].mxu1  ;;  %v634_v52 = vadd.f32 1.0, %v1064_v39  ;;  %v409_v54 = vadd.f32 %v901_v46, %v1346_v50  ;;  %v473_v59 = vadd.f32 %v949_v49, %v1346_v50  ;;  %v542_v10 = vsub.f32 0.0, %v510_v53 }
 0x11a   :  { %v1066_v43 = vpop.eup %1065  ;;  %v904_v51 = vadd.f32 %v903_v41, %v902_v37  ;;  %v952_v55 = vadd.f32 %v951_v42, %v950_v38  ;;  %1085 = vrcp.f32 %v649_v47  ;;  %v558_v16 = vsub.f32 0.0, %v526_v58 }
 0x11b   :  { %v1365_v56 = vpop.eup %1067  ;;  %v650_v57 = vadd.f32 1.0, %v1066_v43  ;;  %v511_v63 = vmax.f32 %v409_v54, -30.0  ;;  %v527_v5 = vmax.f32 %v473_v59, -30.0  ;;  %1087 = vrcp.f32 %v634_v52 }
 0x11c   :  { %v412_v60 = vadd.f32 %v904_v51, %v1346_v50  ;;  %v1369_v61 = vpop.eup %1069  ;;  %v476_v0 = vadd.f32 %v952_v55, %v1346_v50  ;;  %v581_v33 = vmul.f32 1.442695, %v542_v10  ;;  %v613_v36 = vmul.f32 1.442695, %v558_v16 }
 0x11d   :  { %v905_v1 = vpop.f32.mrb[20].mxu0  ;;  %v953_v2 = vpop.f32.mrb[20].mxu1  ;;  %v543_v11 = vsub.f32 0.0, %v511_v63  ;;  %1089 = vrcp.f32 %v650_v57  ;;  %v559_v17 = vsub.f32 0.0, %v527_v5 }
 0x11e   :  { %v1372_v3 = vpop.eup %1071  ;;  %v512_v6 = vmax.f32 %v412_v60, -30.0  ;;  %v906_v7 = vpop.f32.mrb[21].mxu0  ;;  %v528_v12 = vmax.f32 %v476_v0, -30.0  ;;  %1091 = vpow2.f32 %v579_v62 }
 0x11f   :  { %v954_v8 = vpop.f32.mrb[21].mxu1  ;;  %v1374_v9 = vpop.eup %1073  ;;  %v583_v22 = vmul.f32 1.442695, %v543_v11  ;;  %v907_v24 = vadd.f32 %v906_v7, %v905_v1  ;;  %1093 = vpow2.f32 %v611_v4  ;;  %v615_v26 = vmul.f32 1.442695, %v559_v17 }
 0x120   :  { %v908_v13 = vpop.f32.mrb[22].mxu0  ;;  %v956_v14 = vpop.f32.mrb[22].mxu1  ;;  %v544_v18 = vsub.f32 0.0, %v512_v6  ;;  %v560_v23 = vsub.f32 0.0, %v528_v12  ;;  %v955_v28 = vadd.f32 %v954_v8, %v953_v2 }
 0x121   :  { %v1076_v15 = vpop.eup %1075  ;;  %v909_v19 = vpop.f32.mrb[23].mxu0  ;;  %1095 = vpow2.f32 %v583_v22  ;;  %v417_v31 = vadd.f32 %v907_v24, %v1346_v50 }
 0x122   :  { %v957_v20 = vpop.f32.mrb[23].mxu1  ;;  %v1078_v21 = vpop.eup %1077  ;;  %v585_v27 = vmul.f32 1.442695, %v544_v18  ;;  %v617_v30 = vmul.f32 1.442695, %v560_v23  ;;  %v910_v32 = vadd.f32 %v909_v19, %v908_v13  ;;  %1097 = vpow2.f32 %v615_v26 }
 0x123   :  { %v1080_v25 = vpop.eup %1079  ;;  %v481_v34 = vadd.f32 %v955_v28, %v1346_v50  ;;  %v958_v35 = vadd.f32 %v957_v20, %v956_v14  ;;  %v513_v37 = vmax.f32 %v417_v31, -30.0  ;;  %v635_v41 = vadd.f32 1.0, %v1076_v15 }
 0x124   :  { %v1376_v29 = vpop.eup %1081  ;;  %1099 = vpow2.f32 %v585_v27  ;;  %v420_v38 = vadd.f32 %v910_v32, %v1346_v50  ;;  %v651_v47 = vadd.f32 1.0, %v1078_v21  ;;  %v636_v15 = vadd.f32 1.0, %v1080_v25 }
 0x125   :  { %v911_v39 = vpop.f32.mrb[24].mxu0  ;;  %v959_v40 = vpop.f32.mrb[24].mxu1  ;;  %1101 = vpow2.f32 %v617_v30  ;;  %v529_v42 = vmax.f32 %v481_v34, -30.0  ;;  %v484_v43 = vadd.f32 %v958_v35, %v1346_v50  ;;  %v545_v48 = vsub.f32 0.0, %v513_v37 }
 0x126   :  { %v912_v44 = vpop.f32.mrb[25].mxu0  ;;  %v960_v45 = vpop.f32.mrb[25].mxu1  ;;  %v514_v49 = vmax.f32 %v420_v38, -30.0  ;;  %1103 = vpow2.f32 %v581_v33 }
 0x127   :  { %v1382_v46 = vpop.eup %1083  ;;  %v913_v51 = vadd.f32 %v912_v44, %v911_v39  ;;  %v914_v52 = vpop.f32.mrb[26].mxu0  ;;  %v561_v55 = vsub.f32 0.0, %v529_v42  ;;  %v530_v57 = vmax.f32 %v484_v43, -30.0  ;;  %1105 = vpow2.f32 %v613_v36 }
 0x128   :  { %v962_v53 = vpop.f32.mrb[26].mxu1  ;;  %v1384_v54 = vpop.eup %1085  ;;  %v587_v62 = vmul.f32 1.442695, %v545_v48  ;;  %v546_v63 = vsub.f32 0.0, %v514_v49  ;;  %1107 = vrcp.f32 %v635_v41  ;;  %v961_v7 = vadd.f32 %v960_v45, %v959_v40 }
 0x129   :  { %v915_v58 = vpop.f32.mrb[27].mxu0  ;;  %v963_v59 = vpop.f32.mrb[27].mxu1  ;;  %v619_v1 = vmul.f32 1.442695, %v561_v55  ;;  %v562_v2 = vsub.f32 0.0, %v530_v57  ;;  %v425_v4 = vadd.f32 %v913_v51, %v1346_v50  ;;  %1109 = vrcp.f32 %v651_v47 }
 0x12a   :  { %v1386_v60 = vpop.eup %1087  ;;  %v589_v6 = vmul.f32 1.442695, %v546_v63  ;;  %v916_v8 = vadd.f32 %v915_v58, %v914_v52  ;;  %1111 = vpow2.f32 %v587_v62  ;;  %v964_v13 = vadd.f32 %v963_v59, %v962_v53 }
 0x12b   :  { %v1388_v0 = vpop.eup %1089  ;;  %v621_v11 = vmul.f32 1.442695, %v562_v2  ;;  %v515_v12 = vmax.f32 %v425_v4, -30.0  ;;  %1113 = vpow2.f32 %v619_v1  ;;  %v489_v16 = vadd.f32 %v961_v7, %v1346_v50 }
 0x12c   :  { %v1391_v5 = vpop.eup %1091  ;;  %v428_v17 = vadd.f32 %v916_v8, %v1346_v50  ;;  %1115 = vpow2.f32 %v589_v6  ;;  %v492_v23 = vadd.f32 %v964_v13, %v1346_v50 }
 0x12d   :  { %v1393_v10 = vpop.eup %1093  ;;  %v917_v18 = vpop.f32.mrb[28].mxu0  ;;  %v547_v22 = vsub.f32 0.0, %v515_v12  ;;  %1117 = vpow2.f32 %v621_v11  ;;  %v531_v30 = vmax.f32 %v489_v16, -30.0 }
 0x12e   :  { %v1096_v14 = vpop.eup %1095  ;;  %v965_v19 = vpop.f32.mrb[28].mxu1  ;;  %v516_v25 = vmax.f32 %v428_v17, -30.0  ;;  %v532_v36 = vmax.f32 %v492_v23, -30.0 }
 0x12f   :  { %v1098_v20 = vpop.eup %1097  ;;  %v639_v21 = vadd.f32 1.0, %v1096_v14  ;;  %v918_v24 = vpop.f32.mrb[29].mxu0  ;;  %v591_v35 = vmul.f32 1.442695, %v547_v22  ;;  %v563_v40 = vsub.f32 0.0, %v531_v30 }
 0x130   :  { %v966_v26 = vpop.f32.mrb[29].mxu1  ;;  %v1100_v27 = vpop.eup %1099  ;;  %v655_v28 = vadd.f32 1.0, %v1098_v20  ;;  %v548_v41 = vsub.f32 0.0, %v516_v25  ;;  %v564_v43 = vsub.f32 0.0, %v532_v36  ;;  %v919_v44 = vadd.f32 %v918_v24, %v917_v18 }
 0x131   :  { %v920_v31 = vpop.f32.mrb[30].mxu0  ;;  %v968_v32 = vpop.f32.mrb[30].mxu1  ;;  %1119 = vrcp.f32 %v639_v21  ;;  %v640_v34 = vadd.f32 1.0, %v1100_v27  ;;  %v967_v45 = vadd.f32 %v966_v26, %v965_v19  ;;  %v623_v48 = vmul.f32 1.442695, %v563_v40 }
 0x132   :  { %v1102_v33 = vpop.eup %1101  ;;  %v921_v37 = vpop.f32.mrb[31].mxu0  ;;  %1121 = vrcp.f32 %v655_v28  ;;  %v593_v49 = vmul.f32 1.442695, %v548_v41  ;;  %v625_v53 = vmul.f32 1.442695, %v564_v43  ;;  %v433_v55 = vadd.f32 %v919_v44, %v1346_v50 }
 0x133   :  { %v969_v38 = vpop.f32.mrb[31].mxu1  ;;  %v656_v39 = vadd.f32 1.0, %v1102_v33  ;;  %v1398_v42 = vpop.eup %1103  ;;  %1123 = vrcp.f32 %v640_v34  ;;  %v922_v51 = vadd.f32 %v921_v37, %v920_v31  ;;  %v497_v57 = vadd.f32 %v967_v45, %v1346_v50 }
 0x134   :  { %v1400_v47 = vpop.eup %1105  ;;  %v970_v62 = vadd.f32 %v969_v38, %v968_v32  ;;  %v517_v1 = vmax.f32 %v433_v55, -30.0  ;;  %v637_v41 = vadd.f32 1.0, %v1391_v5 }
 0x135   :  { %1125 = vrcp.f32 %v656_v39  ;;  %v1402_v52 = vpop.eup %1107  ;;  %v436_v59 = vadd.f32 %v922_v51, %v1346_v50  ;;  %v533_v2 = vmax.f32 %v497_v57, -30.0  ;;  %v652_v39 = vadd.f32 1.0, %v1376_v29 }
 0x136   :  { %1127 = vpow2.f32 %v591_v35  ;;  %v1406_v58 = vpop.eup %1109  ;;  %v500_v8 = vadd.f32 %v970_v62, %v1346_v50  ;;  %v549_v13 = vsub.f32 0.0, %v517_v1  ;;  %v638_v29 = vadd.f32 1.0, %v1398_v42 }
 0x137   :  { %1129 = vpow2.f32 %v623_v48  ;;  %v1112_v63 = vpop.eup %1111  ;;  %v518_v7 = vmax.f32 %v436_v59, -30.0  ;;  %v565_v14 = vsub.f32 0.0, %v533_v2 }
 0x138   :  { %1131 = vpow2.f32 %v593_v49  ;;  %v1114_v4 = vpop.eup %1113  ;;  %v641_v6 = vadd.f32 1.0, %v1112_v63  ;;  %v534_v19 = vmax.f32 %v500_v8, -30.0  ;;  %v595_v22 = vmul.f32 1.442695, %v549_v13 }
 0x139   :  { %1133 = vpow2.f32 %v625_v53  ;;  %v1116_v11 = vpop.eup %1115  ;;  %v657_v12 = vadd.f32 1.0, %v1114_v4  ;;  %v550_v18 = vsub.f32 0.0, %v518_v7  ;;  %v627_v23 = vmul.f32 1.442695, %v565_v14 }
 0x13a   :  { %1135 = vrcp.f32 %v636_v15  ;;  %v1118_v16 = vpop.eup %1117  ;;  %v642_v17 = vadd.f32 1.0, %v1116_v11  ;;  %v566_v27 = vsub.f32 0.0, %v534_v19  ;;  %v653_v49 = vadd.f32 1.0, %v1393_v10 }
 0x13b   :  { %1137 = vrcp.f32 %v641_v6  ;;  %v1120_v20 = vpop.eup %1119  ;;  %v658_v21 = vadd.f32 1.0, %v1118_v16  ;;  %v597_v50 = vmul.f32 1.442695, %v550_v18 }
 0x13c   :  { %1139 = vrcp.f32 %v657_v12  ;;  %v1122_v24 = vpop.eup %1121  ;;  %v695_v26 = vadd.f32 %v1120_v20, %v1365_v56  ;;  %v629_v31 = vmul.f32 1.442695, %v566_v27 }
 0x13d   :  { %1141 = vrcp.f32 %v642_v17  ;;  %v1124_v15 = vpop.eup %1123 }
 0x13e   :  { %1143 = vrcp.f32 %v658_v21  ;;  %v703_v30 = vadd.f32 %v1369_v61, %v695_v26  ;;  %v696_v25 = vadd.f32 %v1124_v15, %v1372_v3 }
 0x13f   :  { %v1126_v28 = vpop.eup %1125  ;;  %1145 = vpow2.f32 %v595_v22 }
 0x140   :  { %v1128_v32 = vpop.eup %1127  ;;  %1147 = vpow2.f32 %v627_v23  ;;  %v711_v34 = vadd.f32 %v1122_v24, %v703_v30  ;;  %v704_v35 = vadd.f32 %v1374_v9, %v696_v25 }
 0x141   :  { %v1130_v33 = vpop.eup %1129  ;;  %v643_v36 = vadd.f32 1.0, %v1128_v32  ;;  %1149 = vpow2.f32 %v597_v50 }
 0x142   :  { %v1132_v56 = vpop.eup %1131  ;;  %v659_v37 = vadd.f32 1.0, %v1130_v33  ;;  %1151 = vpow2.f32 %v629_v31  ;;  %v712_v40 = vadd.f32 %v1126_v28, %v704_v35  ;;  %v719_v44 = vmul.f32 0.25, %v711_v34 }
 0x143   :  { %v1134_v38 = vpop.eup %1133  ;;  %1153 = vrcp.f32 %v643_v36  ;;  %v644_v61 = vadd.f32 1.0, %v1132_v56 }
 0x144   :  { %v1136_v3 = vpop.eup %1135  ;;  %1155 = vrcp.f32 %v659_v37  ;;  %v720_v45 = vmul.f32 0.25, %v712_v40  ;;  %v660_v9 = vadd.f32 1.0, %v1134_v38 }
 0x145   :  { %v1138_v43 = vpop.eup %1137  ;;  %1157 = vrcp.f32 %v644_v61 }
 0x146   :  { %v1140_v48 = vpop.eup %1139  ;;  %v697_v51 = vadd.f32 %v1138_v43, %v1382_v46  ;;  %1159 = vrcp.f32 %v652_v39  ;;  %v839_v55 = vpack.c.bf16 %v720_v45, %v719_v44 }
 0x147   :  { %v1142_v53 = vpop.eup %1141  ;;  %1161 = vrcp.f32 %v637_v41 }
 0x148   :  { %v1144_v57 = vpop.eup %1143  ;;  %v705_v5 = vadd.f32 %v1384_v54, %v697_v51  ;;  %v698_v59 = vadd.f32 %v1142_v53, %v1386_v60  ;;  %840 = vst [vmem:[%s1440_s3] sm:$0xff] %v839_v55   ;;  %1163 = vrcp.f32 %v660_v9  ;;  %v654_v54 = vadd.f32 1.0, %v1400_v47 }
 0x149   :  { %v1146_v62 = vpop.eup %1145  ;;  %1165 = vrcp.f32 %v653_v49 }
 0x14a   :  { %v1148_v10 = vpop.eup %1147  ;;  %v713_v46 = vadd.f32 %v1140_v48, %v705_v5  ;;  %v706_v63 = vadd.f32 %v1388_v0, %v698_v59  ;;  %v645_v1 = vadd.f32 1.0, %v1146_v62  ;;  %1167 = vrcp.f32 %v638_v29 }
 0x14b   :  { %v1150_v42 = vpop.eup %1149  ;;  %v661_v2 = vadd.f32 1.0, %v1148_v10 }
 0x14c   :  { %v1152_v4 = vpop.eup %1151  ;;  %v714_v6 = vadd.f32 %v1144_v57, %v706_v63  ;;  %1169 = vrcp.f32 %v645_v1  ;;  %v646_v60 = vadd.f32 1.0, %v1150_v42  ;;  %v721_v8 = vmul.f32 0.25, %v713_v46 }
 0x14d   :  { %v1154_v7 = vpop.eup %1153  ;;  %1171 = vrcp.f32 %v661_v2  ;;  %v662_v14 = vadd.f32 1.0, %v1152_v4 }
 0x14e   :  { %v1156_v11 = vpop.eup %1155  ;;  %v722_v12 = vmul.f32 0.25, %v714_v6  ;;  %v699_v13 = vadd.f32 %v1154_v7, %v1402_v52  ;;  %1173 = vrcp.f32 %v646_v60 }
 0x14f   :  { %v1158_v0 = vpop.eup %1157  ;;  %1175 = vrcp.f32 %v654_v54 }
 0x150   :  { %v844_v16 = vpack.c.bf16 %v722_v12, %v721_v8  ;;  %v707_v17 = vadd.f32 %v1406_v58, %v699_v13  ;;  %v700_v18 = vadd.f32 %v1158_v0, %v1136_v3  ;;  %v1160_v19 = vpop.eup %1159  ;;  %1177 = vrcp.f32 %v662_v14 }
 0x151   :  { %v1162_v47 = vpop.eup %1161 }
 0x152   :  { %856 = vst [vmem:[%s1440_s3 + $0x8] sm:$0xff] %v844_v16   ;;  %v715_v20 = vadd.f32 %v1156_v11, %v707_v17  ;;  %v708_v21 = vadd.f32 %v1160_v19, %v700_v18  ;;  %v1164_v22 = vpop.eup %1163 }
 0x153   :  { %v1166_v23 = vpop.eup %1165 }
 0x154   :  { %v716_v52 = vadd.f32 %v1164_v22, %v708_v21  ;;  %v1168_v24 = vpop.eup %1167  ;;  %v723_v50 = vmul.f32 0.25, %v715_v20 }
 0x156   :  { %v1170_v26 = vpop.eup %1169  ;;  %v724_v27 = vmul.f32 0.25, %v716_v52 }
 0x157   :  { %v1172_v15 = vpop.eup %1171  ;;  %v701_v28 = vadd.f32 %v1170_v26, %v1162_v47 }
 0x158   :  { %v1174_v58 = vpop.eup %1173  ;;  %v849_v30 = vpack.c.bf16 %v724_v27, %v723_v50 }
 0x159   :  { %v709_v25 = vadd.f32 %v1166_v23, %v701_v28  ;;  %v702_v31 = vadd.f32 %v1174_v58, %v1168_v24  ;;  %v1176_v32 = vpop.eup %1175 }
 0x15a   :  { %857 = vst [vmem:[%s1440_s3 + $0x10] sm:$0xff] %v849_v30   ;;  %v1178_v35 = vpop.eup %1177 }
 0x15b   :  { %v717_v33 = vadd.f32 %v1172_v15, %v709_v25  ;;  %v710_v34 = vadd.f32 %v1176_v32, %v702_v31 }
 0x15d   :  { %v718_v36 = vadd.f32 %v1178_v35, %v710_v34  ;;  %v725_v56 = vmul.f32 0.25, %v717_v33 }
 0x15f   :  { %v726_v37 = vmul.f32 0.25, %v718_v36 }
 0x161   :  { %v854_v38 = vpack.c.bf16 %v726_v37, %v725_v56 }
 0x163   :  { %858 = vst [vmem:[%s1440_s3 + $0x18] sm:$0xff] %v854_v38  }

</bundles_post_ra>
